<compile_context>
chip_gen: v7x
topology: tpu7x:2x2x1
jax: 0.10.0
libtpu: 0.0.40
codegen_flags: <defaults>
</compile_context>

<pallas_src>
import functools

import jax
import jax.numpy as jnp
from jax import lax
from jax.experimental import pallas as pl
from jax.experimental.pallas import tpu as pltpu


CHUNK_STEPS = 32  # T-chunk for the hoisted input->gate projection (bounds gates scratch)


def _unroll_factor(tc):
    """Small unroll for the serial recurrence; full unroll for short chunks."""
    if tc <= 8:
        return max(tc, 1)
    for u in (4, 2):
        if tc % u == 0:
            return u
    return 1


# ----------------------------- kernel ---------------------------------------


def _lstm_actor_critic_kernel(num_layers, seq_len, chunk, hidden, num_actions, *refs):
    """refs = [x_t, (w_ih, w_hh, b) * num_layers, head_w, head_b,
               fused_out, gates_scratch, (seq_scratch if num_layers > 1)]

    x_t          : (T, bb, D_in)  f32   time-major batch block
    w_ih (l=0)   : (D_in, 4H)     bf16
    w_ih (l>0)   : (H, 4H)        bf16
    w_hh         : (H, 4H)        bf16
    b            : (1, 4H)        f32   (b_ih + b_hh)
    head_w       : (H, A+1)       bf16  [actor | critic] fused
    head_b       : (1, A+1)       f32
    fused_out    : (bb, A+1)      f32   [softmax(actor) | value]
    gates_scratch: (chunk, bb, 4H) f32 VMEM  per-chunk input->gate projections
    seq_scratch  : (T, bb, H)      f32 VMEM  previous layer's output sequence
    """
    n_in = 1 + 3 * num_layers + 2
    in_refs = refs[:n_in]
    out_ref = refs[n_in]
    gates_scratch = refs[n_in + 1]
    seq_scratch = refs[n_in + 2] if num_layers > 1 else None

    x_ref = in_refs[0]
    head_w_ref, head_b_ref = in_refs[n_in - 2], in_refs[n_in - 1]

    T, H = seq_len, hidden
    bb = x_ref.shape[1]
    chunk_starts = list(range(0, T, chunk))

    h = jnp.zeros((bb, H), jnp.float32)
    c = jnp.zeros((bb, H), jnp.float32)

    for layer in range(num_layers):
        w_ih_ref = in_refs[1 + 3 * layer]
        w_hh_ref = in_refs[2 + 3 * layer]
        b_ref = in_refs[3 + 3 * layer]
        write_seq = layer < num_layers - 1

        h = jnp.zeros((bb, H), jnp.float32)
        c = jnp.zeros((bb, H), jnp.float32)

        for t0 in chunk_starts:
            tc = min(chunk, T - t0)

            # ---- Hoisted input->gate projection: one bf16 MXU call per chunk. ----
            # (Chunking bounds gates_scratch to (chunk, bb, 4H) instead of full T.)
            if layer == 0:
                lin = x_ref[t0:t0 + tc].reshape(tc * bb, x_ref.shape[2])
            else:
                lin = seq_scratch[t0:t0 + tc].reshape(tc * bb, H)
            gx = jnp.dot(lin.astype(jnp.bfloat16), w_ih_ref[...],
                         preferred_element_type=jnp.float32) + b_ref[...]
            gates_scratch[0:tc] = gx.reshape(tc, bb, 4 * H)

            # ---- Serial recurrence: only h @ w_hh (bf16 MXU) + f32 activations. ----
            # In-place overwrite of seq_scratch is safe: this chunk's projection has
            # already consumed the previous layer's rows before they are rewritten.
            def step(i, carry, _t0=t0, _write=write_seq):
                h, c = carry
                g = gates_scratch[i] + jnp.dot(
                    h.astype(jnp.bfloat16), w_hh_ref[...],
                    preferred_element_type=jnp.float32)          # (bb, 4H) f32
                i_g = jax.nn.sigmoid(g[:, 0 * H:1 * H])
                f_g = jax.nn.sigmoid(g[:, 1 * H:2 * H])
                g_g = jnp.tanh(g[:, 2 * H:3 * H])
                o_g = jax.nn.sigmoid(g[:, 3 * H:4 * H])
                c = f_g * c + i_g * g_g                           # cell state stays f32
                h = o_g * jnp.tanh(c)
                if _write:
                    seq_scratch[_t0 + i] = h
                return h, c

            h, c = lax.fori_loop(0, tc, step, (h, c), unroll=_unroll_factor(tc))

    # ---- Fused actor+critic head: one bf16 matmul, one store. ----
    head = jnp.dot(h.astype(jnp.bfloat16), head_w_ref[...],
                   preferred_element_type=jnp.float32) + head_b_ref[...]   # (bb, A+1)
    lane = lax.broadcasted_iota(jnp.int32, head.shape, 1)
    is_actor = lane < num_actions
    logits = jnp.where(is_actor, head, jnp.float32(-1e30))        # mask the value lane
    m = jnp.max(logits, axis=-1, keepdims=True)
    e = jnp.exp(logits - m)                                       # value lane -> exactly 0
    denom = jnp.sum(e, axis=-1, keepdims=True)
    r = pl.reciprocal(denom, approx=True)                         # EUP slot
    r = r * (2.0 - denom * r)                                     # one Newton step
    out_ref[...] = jnp.where(is_actor, e * r, head)               # [policy | value]


# ----------------------------- wrapper ---------------------------------------


def _pick_batch_block(batch):
    """Batch block: whole batch when small/ragged; otherwise multiples of 8 with
    >= 2 grid steps (v7x megacore sharding) and up to 256 rows (fills the 256-wide
    MXU on v6e/v7x; harmless on v5e's 128-wide MXU)."""
    if batch < 16 or batch % 8 != 0:
        return batch
    cap = min(256, batch // 2)
    cap -= cap % 8
    bb = max(cap, 8)
    while batch % bb != 0:
        bb -= 8
    return max(bb, 8)


def actor_critic_lstm_forward(x, params, *, hidden_dim, num_layers,
                              single_buffer_weights=True):
    """Forward pass: returns (policy, value) like the PyTorch module."""
    if x.ndim == 2:
        x = x[:, None, :]                       # (B, D) -> (B, 1, D), matches unsqueeze(1)
    B, T, D = x.shape
    H = hidden_dim
    A = params["actor_w"].shape[1]

    # Time-major so the per-chunk projection / per-step reads index the leading axis.
    x_t = jnp.transpose(x, (1, 0, 2)).astype(jnp.float32)        # (T, B, D)

    # Weights in bf16 (MXU-native, half the VMEM/DMA); biases stay f32.
    flat = [x_t]
    for l in range(num_layers):
        flat += [params["w_ih"][l].astype(jnp.bfloat16),
                 params["w_hh"][l].astype(jnp.bfloat16),
                 params["b"][l].astype(jnp.float32)]
    head_w = jnp.concatenate([params["actor_w"], params["critic_w"]], axis=1)
    head_b = jnp.concatenate([params["actor_b"], params["critic_b"]], axis=1)
    flat += [head_w.astype(jnp.bfloat16), head_b.astype(jnp.float32)]

    bb = _pick_batch_block(B)
    grid = (B // bb,)
    chunk = min(T, CHUNK_STEPS)

    kernel = functools.partial(_lstm_actor_critic_kernel, num_layers, T, chunk, H, A)

    scratch_shapes = [pltpu.VMEM((chunk, bb, 4 * H), jnp.float32)]
    if num_layers > 1:
        scratch_shapes.append(pltpu.VMEM((T, bb, H), jnp.float32))

    def run(single_buf):
        def const_spec(arr):
            shape = arr.shape
            idx = lambda i: (0,) * len(shape)
            if single_buf:
                # Grid-invariant weights: single-buffered to halve weight VMEM.
                return pl.BlockSpec(shape, idx, pipeline_mode=pl.Buffered(1))
            return pl.BlockSpec(shape, idx)

        in_specs = [pl.BlockSpec((T, bb, D), lambda i: (0, i, 0))]
        in_specs += [const_spec(a) for a in flat[1:]]

        # Explicit VMEM budget: weights (x1 or x2) + double-buffered x/out blocks +
        # scratch, plus headroom.  Defaults (16/32 MiB) break at modest T*bb*H.
        weight_bytes = sum(int(a.size) * a.dtype.itemsize for a in flat[1:])
        weight_bytes *= 1 if single_buf else 2
        io_bytes = 2 * (T * bb * D * 4) + 2 * (bb * (A + 1) * 4)
        scratch_bytes = chunk * bb * 4 * H * 4
        if num_layers > 1:
            scratch_bytes += T * bb * H * 4
        vmem_limit = int(min(max((weight_bytes + io_bytes + scratch_bytes) * 1.3
                                 + (4 << 20), 32 << 20), 96 << 20))

        out = pl.pallas_call(
            kernel,
            out_shape=jax.ShapeDtypeStruct((B, A + 1), jnp.float32),
            grid_spec=pltpu.PrefetchScalarGridSpec(
                num_scalar_prefetch=0,
                grid=grid,
                in_specs=in_specs,
                out_specs=pl.BlockSpec((bb, A + 1), lambda i: (i, 0)),
                scratch_shapes=scratch_shapes),
            compiler_params=pltpu.CompilerParams(
                dimension_semantics=("parallel",),
                vmem_limit_bytes=vmem_limit),
        )(*flat)
        return jax.block_until_ready(out)

    if single_buffer_weights:
        try:
            fused = run(True)
        except Exception:
            # Fallback if this Mosaic build rejects pl.Buffered(1) on the main pipeline.
            fused = run(False)
    else:
        fused = run(False)

    return fused[:, :A], fused[:, A:A + 1]


# ------------------------- params / reference --------------------------------


def init_params(key, input_dim, hidden_dim, output_dim, num_layers):
    """Deterministic synthetic init (uniform(-1/sqrt(H), 1/sqrt(H)), like PyTorch)."""
    scale = 1.0 / jnp.sqrt(jnp.float32(hidden_dim))
    keys = jax.random.split(key, 4 * num_layers + 4)
    ki = iter(range(len(keys)))

    def u(k, shape):
        return jax.random.uniform(keys[k], shape, jnp.float32, -scale, scale)

    w_ih, w_hh, b = [], [], []
    for l in range(num_layers):
        in_d = input_dim if l == 0 else hidden_dim
        w_ih.append(u(next(ki), (in_d, 4 * hidden_dim)))
        w_hh.append(u(next(ki), (hidden_dim, 4 * hidden_dim)))
        b_ih = u(next(ki), (1, 4 * hidden_dim))
        b_hh = u(next(ki), (1, 4 * hidden_dim))
        b.append(b_ih + b_hh)                   # biases always appear summed in the gates

    return {
        "w_ih": w_ih,
        "w_hh": w_hh,
        "b": b,
        "actor_w": u(next(ki), (hidden_dim, output_dim)),
        "actor_b": u(next(ki), (1, output_dim)),
        "critic_w": u(next(ki), (hidden_dim, 1)),
        "critic_b": u(next(ki), (1, 1)),
    }


def _reference_forward(x, params, *, hidden_dim, num_layers,
                       matmul_dtype=jnp.float32):
    """Plain-JAX reference (self-test only).  matmul_dtype=bf16 mimics the kernel's
    bf16 MXU operands (f32 accumulate) for a tight mechanics comparison."""
    if x.ndim == 2:
        x = x[:, None, :]
    B, T, _ = x.shape
    H = hidden_dim

    def mm(a, w):
        return jnp.dot(a.astype(matmul_dtype), w.astype(matmul_dtype),
                       preferred_element_type=jnp.float32)

    seq = x.astype(jnp.float32)
    for l in range(num_layers):
        w_ih, w_hh, b = params["w_ih"][l], params["w_hh"][l], params["b"][l]
        h = jnp.zeros((B, H), jnp.float32)
        c = jnp.zeros((B, H), jnp.float32)
        outs = []
        for t in range(T):
            g = mm(seq[:, t, :], w_ih) + mm(h, w_hh) + b
            i_g = jax.nn.sigmoid(g[:, 0 * H:1 * H])
            f_g = jax.nn.sigmoid(g[:, 1 * H:2 * H])
            g_g = jnp.tanh(g[:, 2 * H:3 * H])
            o_g = jax.nn.sigmoid(g[:, 3 * H:4 * H])
            c = f_g * c + i_g * g_g
            h = o_g * jnp.tanh(c)
            outs.append(h)
        seq = jnp.stack(outs, axis=1)
    h_last = seq[:, -1, :]
    policy = jax.nn.softmax(mm(h_last, params["actor_w"]) + params["actor_b"], axis=-1)
    value = mm(h_last, params["critic_w"]) + params["critic_b"]
    return policy, value


# ------------------------------- demo -----------------------------------------


if __name__ == "__main__":
    input_dim, hidden_dim, output_dim, num_layers = 16, 32, 4, 2
    batch, seq_len = 2, 8

    root = jax.random.PRNGKey(0)
    k_param, k_x, k_x2 = jax.random.split(root, 3)
    params = init_params(k_param, input_dim, hidden_dim, output_dim, num_layers)
    x = jax.random.normal(k_x, (batch, seq_len, input_dim), jnp.float32)

    policy, value = actor_critic_lstm_forward(
        x, params, hidden_dim=hidden_dim, num_layers=num_layers)
    jax.block_until_ready((policy, value))

    assert policy.shape == (batch, output_dim)
    assert value.shape == (batch, 1)
    # softmax rows must sum to 1
    assert bool(jnp.allclose(jnp.sum(policy, axis=-1), 1.0, atol=1e-4))

    # Mechanics check: vs a plain-JAX reference using the same bf16 matmul operands.
    ref_p16, ref_v16 = _reference_forward(
        x, params, hidden_dim=hidden_dim, num_layers=num_layers,
        matmul_dtype=jnp.bfloat16)
    assert bool(jnp.allclose(policy, ref_p16, atol=1e-3, rtol=1e-3))
    assert bool(jnp.allclose(value, ref_v16, atol=1e-3, rtol=1e-3))

    # Semantics check: vs the full-f32 reference (PyTorch-equivalent math); the gap is
    # bounded by bf16 weight/operand rounding.
    ref_p32, ref_v32 = _reference_forward(
        x, params, hidden_dim=hidden_dim, num_layers=num_layers)
    assert bool(jnp.allclose(policy, ref_p32, atol=3e-2, rtol=3e-2))
    assert bool(jnp.allclose(value, ref_v32, atol=3e-2, rtol=3e-2))

    # Second config: exercises the batch-parallel grid (bb < B) and T-chunking (T > 32).
    b2, t2 = 16, 40
    x2 = jax.random.normal(k_x2, (b2, t2, input_dim), jnp.float32)
    p2, v2 = actor_critic_lstm_forward(
        x2, params, hidden_dim=hidden_dim, num_layers=num_layers)
    jax.block_until_ready((p2, v2))
    assert p2.shape == (b2, output_dim) and v2.shape == (b2, 1)
    rp2, rv2 = _reference_forward(
        x2, params, hidden_dim=hidden_dim, num_layers=num_layers,
        matmul_dtype=jnp.bfloat16)
    assert bool(jnp.allclose(jnp.sum(p2, axis=-1), 1.0, atol=1e-4))
    assert bool(jnp.allclose(p2, rp2, atol=2e-3, rtol=2e-3))
    assert bool(jnp.allclose(v2, rv2, atol=2e-3, rtol=2e-3))

    print("KERNEL_OK")
</pallas_src>

<mosaic_0001>
module attributes {stable_mosaic.version = 11 : i64} {
  func.func @_lstm_actor_critic_kernel(%arg0: i32, %arg1: memref<8x2x16xf32, #tpu.memory_space<vmem>>, %arg2: memref<16x128xbf16, #tpu.memory_space<vmem>>, %arg3: memref<32x128xbf16, #tpu.memory_space<vmem>>, %arg4: memref<1x128xf32, #tpu.memory_space<vmem>>, %arg5: memref<32x128xbf16, #tpu.memory_space<vmem>>, %arg6: memref<32x128xbf16, #tpu.memory_space<vmem>>, %arg7: memref<1x128xf32, #tpu.memory_space<vmem>>, %arg8: memref<32x5xbf16, #tpu.memory_space<vmem>>, %arg9: memref<1x5xf32, #tpu.memory_space<vmem>>, %arg10: memref<2x5xf32, #tpu.memory_space<vmem>>, %arg11: memref<8x2x128xf32, #tpu.memory_space<vmem>>, %arg12: memref<8x2x32xf32, #tpu.memory_space<vmem>>) attributes {dimension_semantics = [#tpu.dimension_semantics<parallel>], iteration_bounds = array<i64: 1>, scalar_prefetch = 0 : i64, scratch_operands = 2 : i64, tpu.core_type = #tpu.core_type<tc>, window_params = [{transform_indices = @transform_0, window_bounds = array<i64: 8, 2, 16>}, {pipeline_mode = #tpu.pipeline_mode<synchronous>, transform_indices = @transform_1, window_bounds = array<i64: 16, 128>}, {pipeline_mode = #tpu.pipeline_mode<synchronous>, transform_indices = @transform_2, window_bounds = array<i64: 32, 128>}, {pipeline_mode = #tpu.pipeline_mode<synchronous>, transform_indices = @transform_3, window_bounds = array<i64: 1, 128>}, {pipeline_mode = #tpu.pipeline_mode<synchronous>, transform_indices = @transform_4, window_bounds = array<i64: 32, 128>}, {pipeline_mode = #tpu.pipeline_mode<synchronous>, transform_indices = @transform_5, window_bounds = array<i64: 32, 128>}, {pipeline_mode = #tpu.pipeline_mode<synchronous>, transform_indices = @transform_6, window_bounds = array<i64: 1, 128>}, {pipeline_mode = #tpu.pipeline_mode<synchronous>, transform_indices = @transform_7, window_bounds = array<i64: 32, 5>}, {pipeline_mode = #tpu.pipeline_mode<synchronous>, transform_indices = @transform_8, window_bounds = array<i64: 1, 5>}, {transform_indices = @transform_9, window_bounds = array<i64: 2, 5>}]} {
    %cst = arith.constant 0.000000e+00 : f32
    %0 = vector.broadcast %cst : f32 to vector<2x32xf32>
    %cst_0 = arith.constant 0.000000e+00 : f32
    %1 = vector.broadcast %cst_0 : f32 to vector<2x32xf32>
    %c0 = arith.constant 0 : index
    %c0_1 = arith.constant 0 : index
    %c0_2 = arith.constant 0 : index
    %2 = vector.load %arg1[%c0, %c0_1, %c0_2] : memref<8x2x16xf32, #tpu.memory_space<vmem>>, vector<8x2x16xf32>
    %3 = vector.shape_cast %2 : vector<8x2x16xf32> to vector<16x16xf32>
    %4 = arith.truncf %3 : vector<16x16xf32> to vector<16x16xbf16>
    %c0_3 = arith.constant 0 : index
    %c0_4 = arith.constant 0 : index
    %5 = vector.load %arg2[%c0_3, %c0_4] : memref<16x128xbf16, #tpu.memory_space<vmem>>, vector<16x128xbf16>
    %cst_5 = arith.constant dense<0.000000e+00> : vector<16x128xf32>
    %6 = tpu.matmul %4, %5, %cst_5 {dimension_numbers = #tpu.dot_dimension_numbers<[1], [0], [0], [1], [0, 0, 1, 1], [], []>} : vector<16x16xbf16>, vector<16x128xbf16>, vector<16x128xf32> -> vector<16x128xf32>
    %c0_6 = arith.constant 0 : index
    %c0_7 = arith.constant 0 : index
    %7 = vector.load %arg4[%c0_6, %c0_7] : memref<1x128xf32, #tpu.memory_space<vmem>>, vector<1x128xf32>
    %8 = vector.broadcast %7 : vector<1x128xf32> to vector<16x128xf32>
    %9 = arith.addf %6, %8 : vector<16x128xf32>
    %10 = vector.shape_cast %9 : vector<16x128xf32> to vector<8x2x128xf32>
    %c0_8 = arith.constant 0 : index
    %c0_9 = arith.constant 0 : index
    %c0_10 = arith.constant 0 : index
    %11 = vector.load %arg11[%c0_8, %c0_9, %c0_10] : memref<8x2x128xf32, #tpu.memory_space<vmem>>, vector<8x2x128xf32>
    tpu.vector_store %arg11[%c0_8, %c0_9, %c0_10], %10 {strides = array<i32>} : memref<8x2x128xf32, #tpu.memory_space<vmem>>, vector<8x2x128xf32>,
    %c0_i32 = arith.constant 0 : i32
    %12 = arith.index_cast %c0_i32 : i32 to index
    %c0_11 = arith.constant 0 : index
    %c0_12 = arith.constant 0 : index
    %13 = vector.load %arg11[%12, %c0_11, %c0_12] : memref<8x2x128xf32, #tpu.memory_space<vmem>>, vector<1x2x128xf32>
    %14 = vector.shape_cast %13 : vector<1x2x128xf32> to vector<2x128xf32>
    %15 = arith.truncf %0 : vector<2x32xf32> to vector<2x32xbf16>
    %c0_13 = arith.constant 0 : index
    %c0_14 = arith.constant 0 : index
    %16 = vector.load %arg3[%c0_13, %c0_14] : memref<32x128xbf16, #tpu.memory_space<vmem>>, vector<32x128xbf16>
    %cst_15 = arith.constant dense<0.000000e+00> : vector<2x128xf32>
    %17 = tpu.matmul %15, %16, %cst_15 {dimension_numbers = #tpu.dot_dimension_numbers<[1], [0], [0], [1], [0, 0, 1, 1], [], []>} : vector<2x32xbf16>, vector<32x128xbf16>, vector<2x128xf32> -> vector<2x128xf32>
    %18 = arith.addf %14, %17 : vector<2x128xf32>
    %19 = vector.extract_strided_slice %18 {offsets = [0, 0], sizes = [2, 32], strides = [1, 1]} : vector<2x128xf32> to vector<2x32xf32>
    %20 = arith.negf %19 : vector<2x32xf32>
    %21 = math.exp %20 : vector<2x32xf32>
    %cst_16 = arith.constant 1.000000e+00 : f32
    %22 = vector.broadcast %cst_16 : f32 to vector<2x32xf32>
    %23 = arith.addf %22, %21 : vector<2x32xf32>
    %24 = arith.divf %22, %23 : vector<2x32xf32>
    %25 = vector.extract_strided_slice %18 {offsets = [0, 32], sizes = [2, 32], strides = [1, 1]} : vector<2x128xf32> to vector<2x32xf32>
    %26 = arith.negf %25 : vector<2x32xf32>
    %27 = math.exp %26 : vector<2x32xf32>
    %cst_17 = arith.constant 1.000000e+00 : f32
    %28 = vector.broadcast %cst_17 : f32 to vector<2x32xf32>
    %29 = arith.addf %28, %27 : vector<2x32xf32>
    %30 = arith.divf %28, %29 : vector<2x32xf32>
    %31 = vector.extract_strided_slice %18 {offsets = [0, 64], sizes = [2, 32], strides = [1, 1]} : vector<2x128xf32> to vector<2x32xf32>
    %32 = math.tanh %31 : vector<2x32xf32>
    %33 = vector.extract_strided_slice %18 {offsets = [0, 96], sizes = [2, 32], strides = [1, 1]} : vector<2x128xf32> to vector<2x32xf32>
    %34 = arith.negf %33 : vector<2x32xf32>
    %35 = math.exp %34 : vector<2x32xf32>
    %cst_18 = arith.constant 1.000000e+00 : f32
    %36 = vector.broadcast %cst_18 : f32 to vector<2x32xf32>
    %37 = arith.addf %36, %35 : vector<2x32xf32>
    %38 = arith.divf %36, %37 : vector<2x32xf32>
    %39 = arith.mulf %30, %1 : vector<2x32xf32>
    %40 = arith.mulf %24, %32 : vector<2x32xf32>
    %41 = arith.addf %39, %40 : vector<2x32xf32>
    %42 = math.tanh %41 : vector<2x32xf32>
    %43 = arith.mulf %38, %42 : vector<2x32xf32>
    %c0_i32_19 = arith.constant 0 : i32
    %44 = arith.addi %c0_i32_19, %c0_i32 : i32
    %45 = arith.index_cast %44 : i32 to index
    %c0_20 = arith.constant 0 : index
    %c0_21 = arith.constant 0 : index
    %46 = vector.load %arg12[%45, %c0_20, %c0_21] : memref<8x2x32xf32, #tpu.memory_space<vmem>>, vector<1x2x32xf32>
    %47 = vector.shape_cast %46 : vector<1x2x32xf32> to vector<2x32xf32>
    %48 = vector.shape_cast %43 : vector<2x32xf32> to vector<1x2x32xf32>
    tpu.vector_store %arg12[%45, %c0_20, %c0_21], %48 {strides = array<i32>} : memref<8x2x32xf32, #tpu.memory_space<vmem>>, vector<1x2x32xf32>,
    %c1_i32 = arith.constant 1 : i32
    %49 = arith.index_cast %c1_i32 : i32 to index
    %c0_22 = arith.constant 0 : index
    %c0_23 = arith.constant 0 : index
    %50 = vector.load %arg11[%49, %c0_22, %c0_23] : memref<8x2x128xf32, #tpu.memory_space<vmem>>, vector<1x2x128xf32>
    %51 = vector.shape_cast %50 : vector<1x2x128xf32> to vector<2x128xf32>
    %52 = arith.truncf %43 : vector<2x32xf32> to vector<2x32xbf16>
    %c0_24 = arith.constant 0 : index
    %c0_25 = arith.constant 0 : index
    %53 = vector.load %arg3[%c0_24, %c0_25] : memref<32x128xbf16, #tpu.memory_space<vmem>>, vector<32x128xbf16>
    %cst_26 = arith.constant dense<0.000000e+00> : vector<2x128xf32>
    %54 = tpu.matmul %52, %53, %cst_26 {dimension_numbers = #tpu.dot_dimension_numbers<[1], [0], [0], [1], [0, 0, 1, 1], [], []>} : vector<2x32xbf16>, vector<32x128xbf16>, vector<2x128xf32> -> vector<2x128xf32>
    %55 = arith.addf %51, %54 : vector<2x128xf32>
    %56 = vector.extract_strided_slice %55 {offsets = [0, 0], sizes = [2, 32], strides = [1, 1]} : vector<2x128xf32> to vector<2x32xf32>
    %57 = arith.negf %56 : vector<2x32xf32>
    %58 = math.exp %57 : vector<2x32xf32>
    %cst_27 = arith.constant 1.000000e+00 : f32
    %59 = vector.broadcast %cst_27 : f32 to vector<2x32xf32>
    %60 = arith.addf %59, %58 : vector<2x32xf32>
    %61 = arith.divf %59, %60 : vector<2x32xf32>
    %62 = vector.extract_strided_slice %55 {offsets = [0, 32], sizes = [2, 32], strides = [1, 1]} : vector<2x128xf32> to vector<2x32xf32>
    %63 = arith.negf %62 : vector<2x32xf32>
    %64 = math.exp %63 : vector<2x32xf32>
    %cst_28 = arith.constant 1.000000e+00 : f32
    %65 = vector.broadcast %cst_28 : f32 to vector<2x32xf32>
    %66 = arith.addf %65, %64 : vector<2x32xf32>
    %67 = arith.divf %65, %66 : vector<2x32xf32>
    %68 = vector.extract_strided_slice %55 {offsets = [0, 64], sizes = [2, 32], strides = [1, 1]} : vector<2x128xf32> to vector<2x32xf32>
    %69 = math.tanh %68 : vector<2x32xf32>
    %70 = vector.extract_strided_slice %55 {offsets = [0, 96], sizes = [2, 32], strides = [1, 1]} : vector<2x128xf32> to vector<2x32xf32>
    %71 = arith.negf %70 : vector<2x32xf32>
    %72 = math.exp %71 : vector<2x32xf32>
    %cst_29 = arith.constant 1.000000e+00 : f32
    %73 = vector.broadcast %cst_29 : f32 to vector<2x32xf32>
    %74 = arith.addf %73, %72 : vector<2x32xf32>
    %75 = arith.divf %73, %74 : vector<2x32xf32>
    %76 = arith.mulf %67, %41 : vector<2x32xf32>
    %77 = arith.mulf %61, %69 : vector<2x32xf32>
    %78 = arith.addf %76, %77 : vector<2x32xf32>
    %79 = math.tanh %78 : vector<2x32xf32>
    %80 = arith.mulf %75, %79 : vector<2x32xf32>
    %c0_i32_30 = arith.constant 0 : i32
    %81 = arith.addi %c0_i32_30, %c1_i32 : i32
    %82 = arith.index_cast %81 : i32 to index
    %c0_31 = arith.constant 0 : index
    %c0_32 = arith.constant 0 : index
    %83 = vector.load %arg12[%82, %c0_31, %c0_32] : memref<8x2x32xf32, #tpu.memory_space<vmem>>, vector<1x2x32xf32>
    %84 = vector.shape_cast %83 : vector<1x2x32xf32> to vector<2x32xf32>
    %85 = vector.shape_cast %80 : vector<2x32xf32> to vector<1x2x32xf32>
    tpu.vector_store %arg12[%82, %c0_31, %c0_32], %85 {strides = array<i32>} : memref<8x2x32xf32, #tpu.memory_space<vmem>>, vector<1x2x32xf32>,
    %c2_i32 = arith.constant 2 : i32
    %86 = arith.index_cast %c2_i32 : i32 to index
    %c0_33 = arith.constant 0 : index
    %c0_34 = arith.constant 0 : index
    %87 = vector.load %arg11[%86, %c0_33, %c0_34] : memref<8x2x128xf32, #tpu.memory_space<vmem>>, vector<1x2x128xf32>
    %88 = vector.shape_cast %87 : vector<1x2x128xf32> to vector<2x128xf32>
    %89 = arith.truncf %80 : vector<2x32xf32> to vector<2x32xbf16>
    %c0_35 = arith.constant 0 : index
    %c0_36 = arith.constant 0 : index
    %90 = vector.load %arg3[%c0_35, %c0_36] : memref<32x128xbf16, #tpu.memory_space<vmem>>, vector<32x128xbf16>
    %cst_37 = arith.constant dense<0.000000e+00> : vector<2x128xf32>
    %91 = tpu.matmul %89, %90, %cst_37 {dimension_numbers = #tpu.dot_dimension_numbers<[1], [0], [0], [1], [0, 0, 1, 1], [], []>} : vector<2x32xbf16>, vector<32x128xbf16>, vector<2x128xf32> -> vector<2x128xf32>
    %92 = arith.addf %88, %91 : vector<2x128xf32>
    %93 = vector.extract_strided_slice %92 {offsets = [0, 0], sizes = [2, 32], strides = [1, 1]} : vector<2x128xf32> to vector<2x32xf32>
    %94 = arith.negf %93 : vector<2x32xf32>
    %95 = math.exp %94 : vector<2x32xf32>
    %cst_38 = arith.constant 1.000000e+00 : f32
    %96 = vector.broadcast %cst_38 : f32 to vector<2x32xf32>
    %97 = arith.addf %96, %95 : vector<2x32xf32>
    %98 = arith.divf %96, %97 : vector<2x32xf32>
    %99 = vector.extract_strided_slice %92 {offsets = [0, 32], sizes = [2, 32], strides = [1, 1]} : vector<2x128xf32> to vector<2x32xf32>
    %100 = arith.negf %99 : vector<2x32xf32>
    %101 = math.exp %100 : vector<2x32xf32>
    %cst_39 = arith.constant 1.000000e+00 : f32
    %102 = vector.broadcast %cst_39 : f32 to vector<2x32xf32>
    %103 = arith.addf %102, %101 : vector<2x32xf32>
    %104 = arith.divf %102, %103 : vector<2x32xf32>
    %105 = vector.extract_strided_slice %92 {offsets = [0, 64], sizes = [2, 32], strides = [1, 1]} : vector<2x128xf32> to vector<2x32xf32>
    %106 = math.tanh %105 : vector<2x32xf32>
    %107 = vector.extract_strided_slice %92 {offsets = [0, 96], sizes = [2, 32], strides = [1, 1]} : vector<2x128xf32> to vector<2x32xf32>
    %108 = arith.negf %107 : vector<2x32xf32>
    %109 = math.exp %108 : vector<2x32xf32>
    %cst_40 = arith.constant 1.000000e+00 : f32
    %110 = vector.broadcast %cst_40 : f32 to vector<2x32xf32>
    %111 = arith.addf %110, %109 : vector<2x32xf32>
    %112 = arith.divf %110, %111 : vector<2x32xf32>
    %113 = arith.mulf %104, %78 : vector<2x32xf32>
    %114 = arith.mulf %98, %106 : vector<2x32xf32>
    %115 = arith.addf %113, %114 : vector<2x32xf32>
    %116 = math.tanh %115 : vector<2x32xf32>
    %117 = arith.mulf %112, %116 : vector<2x32xf32>
    %c0_i32_41 = arith.constant 0 : i32
    %118 = arith.addi %c0_i32_41, %c2_i32 : i32
    %119 = arith.index_cast %118 : i32 to index
    %c0_42 = arith.constant 0 : index
    %c0_43 = arith.constant 0 : index
    %120 = vector.load %arg12[%119, %c0_42, %c0_43] : memref<8x2x32xf32, #tpu.memory_space<vmem>>, vector<1x2x32xf32>
    %121 = vector.shape_cast %120 : vector<1x2x32xf32> to vector<2x32xf32>
    %122 = vector.shape_cast %117 : vector<2x32xf32> to vector<1x2x32xf32>
    tpu.vector_store %arg12[%119, %c0_42, %c0_43], %122 {strides = array<i32>} : memref<8x2x32xf32, #tpu.memory_space<vmem>>, vector<1x2x32xf32>,
    %c3_i32 = arith.constant 3 : i32
    %123 = arith.index_cast %c3_i32 : i32 to index
    %c0_44 = arith.constant 0 : index
    %c0_45 = arith.constant 0 : index
    %124 = vector.load %arg11[%123, %c0_44, %c0_45] : memref<8x2x128xf32, #tpu.memory_space<vmem>>, vector<1x2x128xf32>
    %125 = vector.shape_cast %124 : vector<1x2x128xf32> to vector<2x128xf32>
    %126 = arith.truncf %117 : vector<2x32xf32> to vector<2x32xbf16>
    %c0_46 = arith.constant 0 : index
    %c0_47 = arith.constant 0 : index
    %127 = vector.load %arg3[%c0_46, %c0_47] : memref<32x128xbf16, #tpu.memory_space<vmem>>, vector<32x128xbf16>
    %cst_48 = arith.constant dense<0.000000e+00> : vector<2x128xf32>
    %128 = tpu.matmul %126, %127, %cst_48 {dimension_numbers = #tpu.dot_dimension_numbers<[1], [0], [0], [1], [0, 0, 1, 1], [], []>} : vector<2x32xbf16>, vector<32x128xbf16>, vector<2x128xf32> -> vector<2x128xf32>
    %129 = arith.addf %125, %128 : vector<2x128xf32>
    %130 = vector.extract_strided_slice %129 {offsets = [0, 0], sizes = [2, 32], strides = [1, 1]} : vector<2x128xf32> to vector<2x32xf32>
    %131 = arith.negf %130 : vector<2x32xf32>
    %132 = math.exp %131 : vector<2x32xf32>
    %cst_49 = arith.constant 1.000000e+00 : f32
    %133 = vector.broadcast %cst_49 : f32 to vector<2x32xf32>
    %134 = arith.addf %133, %132 : vector<2x32xf32>
    %135 = arith.divf %133, %134 : vector<2x32xf32>
    %136 = vector.extract_strided_slice %129 {offsets = [0, 32], sizes = [2, 32], strides = [1, 1]} : vector<2x128xf32> to vector<2x32xf32>
    %137 = arith.negf %136 : vector<2x32xf32>
    %138 = math.exp %137 : vector<2x32xf32>
    %cst_50 = arith.constant 1.000000e+00 : f32
    %139 = vector.broadcast %cst_50 : f32 to vector<2x32xf32>
    %140 = arith.addf %139, %138 : vector<2x32xf32>
    %141 = arith.divf %139, %140 : vector<2x32xf32>
    %142 = vector.extract_strided_slice %129 {offsets = [0, 64], sizes = [2, 32], strides = [1, 1]} : vector<2x128xf32> to vector<2x32xf32>
    %143 = math.tanh %142 : vector<2x32xf32>
    %144 = vector.extract_strided_slice %129 {offsets = [0, 96], sizes = [2, 32], strides = [1, 1]} : vector<2x128xf32> to vector<2x32xf32>
    %145 = arith.negf %144 : vector<2x32xf32>
    %146 = math.exp %145 : vector<2x32xf32>
    %cst_51 = arith.constant 1.000000e+00 : f32
    %147 = vector.broadcast %cst_51 : f32 to vector<2x32xf32>
    %148 = arith.addf %147, %146 : vector<2x32xf32>
    %149 = arith.divf %147, %148 : vector<2x32xf32>
    %150 = arith.mulf %141, %115 : vector<2x32xf32>
    %151 = arith.mulf %135, %143 : vector<2x32xf32>
    %152 = arith.addf %150, %151 : vector<2x32xf32>
    %153 = math.tanh %152 : vector<2x32xf32>
    %154 = arith.mulf %149, %153 : vector<2x32xf32>
    %c0_i32_52 = arith.constant 0 : i32
    %155 = arith.addi %c0_i32_52, %c3_i32 : i32
    %156 = arith.index_cast %155 : i32 to index
    %c0_53 = arith.constant 0 : index
    %c0_54 = arith.constant 0 : index
    %157 = vector.load %arg12[%156, %c0_53, %c0_54] : memref<8x2x32xf32, #tpu.memory_space<vmem>>, vector<1x2x32xf32>
    %158 = vector.shape_cast %157 : vector<1x2x32xf32> to vector<2x32xf32>
    %159 = vector.shape_cast %154 : vector<2x32xf32> to vector<1x2x32xf32>
    tpu.vector_store %arg12[%156, %c0_53, %c0_54], %159 {strides = array<i32>} : memref<8x2x32xf32, #tpu.memory_space<vmem>>, vector<1x2x32xf32>,
    %c4_i32 = arith.constant 4 : i32
    %160 = arith.index_cast %c4_i32 : i32 to index
    %c0_55 = arith.constant 0 : index
    %c0_56 = arith.constant 0 : index
    %161 = vector.load %arg11[%160, %c0_55, %c0_56] : memref<8x2x128xf32, #tpu.memory_space<vmem>>, vector<1x2x128xf32>
    %162 = vector.shape_cast %161 : vector<1x2x128xf32> to vector<2x128xf32>
    %163 = arith.truncf %154 : vector<2x32xf32> to vector<2x32xbf16>
    %c0_57 = arith.constant 0 : index
    %c0_58 = arith.constant 0 : index
    %164 = vector.load %arg3[%c0_57, %c0_58] : memref<32x128xbf16, #tpu.memory_space<vmem>>, vector<32x128xbf16>
    %cst_59 = arith.constant dense<0.000000e+00> : vector<2x128xf32>
    %165 = tpu.matmul %163, %164, %cst_59 {dimension_numbers = #tpu.dot_dimension_numbers<[1], [0], [0], [1], [0, 0, 1, 1], [], []>} : vector<2x32xbf16>, vector<32x128xbf16>, vector<2x128xf32> -> vector<2x128xf32>
    %166 = arith.addf %162, %165 : vector<2x128xf32>
    %167 = vector.extract_strided_slice %166 {offsets = [0, 0], sizes = [2, 32], strides = [1, 1]} : vector<2x128xf32> to vector<2x32xf32>
    %168 = arith.negf %167 : vector<2x32xf32>
    %169 = math.exp %168 : vector<2x32xf32>
    %cst_60 = arith.constant 1.000000e+00 : f32
    %170 = vector.broadcast %cst_60 : f32 to vector<2x32xf32>
    %171 = arith.addf %170, %169 : vector<2x32xf32>
    %172 = arith.divf %170, %171 : vector<2x32xf32>
    %173 = vector.extract_strided_slice %166 {offsets = [0, 32], sizes = [2, 32], strides = [1, 1]} : vector<2x128xf32> to vector<2x32xf32>
    %174 = arith.negf %173 : vector<2x32xf32>
    %175 = math.exp %174 : vector<2x32xf32>
    %cst_61 = arith.constant 1.000000e+00 : f32
    %176 = vector.broadcast %cst_61 : f32 to vector<2x32xf32>
    %177 = arith.addf %176, %175 : vector<2x32xf32>
    %178 = arith.divf %176, %177 : vector<2x32xf32>
    %179 = vector.extract_strided_slice %166 {offsets = [0, 64], sizes = [2, 32], strides = [1, 1]} : vector<2x128xf32> to vector<2x32xf32>
    %180 = math.tanh %179 : vector<2x32xf32>
    %181 = vector.extract_strided_slice %166 {offsets = [0, 96], sizes = [2, 32], strides = [1, 1]} : vector<2x128xf32> to vector<2x32xf32>
    %182 = arith.negf %181 : vector<2x32xf32>
    %183 = math.exp %182 : vector<2x32xf32>
    %cst_62 = arith.constant 1.000000e+00 : f32
    %184 = vector.broadcast %cst_62 : f32 to vector<2x32xf32>
    %185 = arith.addf %184, %183 : vector<2x32xf32>
    %186 = arith.divf %184, %185 : vector<2x32xf32>
    %187 = arith.mulf %178, %152 : vector<2x32xf32>
    %188 = arith.mulf %172, %180 : vector<2x32xf32>
    %189 = arith.addf %187, %188 : vector<2x32xf32>
    %190 = math.tanh %189 : vector<2x32xf32>
    %191 = arith.mulf %186, %190 : vector<2x32xf32>
    %c0_i32_63 = arith.constant 0 : i32
    %192 = arith.addi %c0_i32_63, %c4_i32 : i32
    %193 = arith.index_cast %192 : i32 to index
    %c0_64 = arith.constant 0 : index
    %c0_65 = arith.constant 0 : index
    %194 = vector.load %arg12[%193, %c0_64, %c0_65] : memref<8x2x32xf32, #tpu.memory_space<vmem>>, vector<1x2x32xf32>
    %195 = vector.shape_cast %194 : vector<1x2x32xf32> to vector<2x32xf32>
    %196 = vector.shape_cast %191 : vector<2x32xf32> to vector<1x2x32xf32>
    tpu.vector_store %arg12[%193, %c0_64, %c0_65], %196 {strides = array<i32>} : memref<8x2x32xf32, #tpu.memory_space<vmem>>, vector<1x2x32xf32>,
    %c5_i32 = arith.constant 5 : i32
    %197 = arith.index_cast %c5_i32 : i32 to index
    %c0_66 = arith.constant 0 : index
    %c0_67 = arith.constant 0 : index
    %198 = vector.load %arg11[%197, %c0_66, %c0_67] : memref<8x2x128xf32, #tpu.memory_space<vmem>>, vector<1x2x128xf32>
    %199 = vector.shape_cast %198 : vector<1x2x128xf32> to vector<2x128xf32>
    %200 = arith.truncf %191 : vector<2x32xf32> to vector<2x32xbf16>
    %c0_68 = arith.constant 0 : index
    %c0_69 = arith.constant 0 : index
    %201 = vector.load %arg3[%c0_68, %c0_69] : memref<32x128xbf16, #tpu.memory_space<vmem>>, vector<32x128xbf16>
    %cst_70 = arith.constant dense<0.000000e+00> : vector<2x128xf32>
    %202 = tpu.matmul %200, %201, %cst_70 {dimension_numbers = #tpu.dot_dimension_numbers<[1], [0], [0], [1], [0, 0, 1, 1], [], []>} : vector<2x32xbf16>, vector<32x128xbf16>, vector<2x128xf32> -> vector<2x128xf32>
    %203 = arith.addf %199, %202 : vector<2x128xf32>
    %204 = vector.extract_strided_slice %203 {offsets = [0, 0], sizes = [2, 32], strides = [1, 1]} : vector<2x128xf32> to vector<2x32xf32>
    %205 = arith.negf %204 : vector<2x32xf32>
    %206 = math.exp %205 : vector<2x32xf32>
    %cst_71 = arith.constant 1.000000e+00 : f32
    %207 = vector.broadcast %cst_71 : f32 to vector<2x32xf32>
    %208 = arith.addf %207, %206 : vector<2x32xf32>
    %209 = arith.divf %207, %208 : vector<2x32xf32>
    %210 = vector.extract_strided_slice %203 {offsets = [0, 32], sizes = [2, 32], strides = [1, 1]} : vector<2x128xf32> to vector<2x32xf32>
    %211 = arith.negf %210 : vector<2x32xf32>
    %212 = math.exp %211 : vector<2x32xf32>
    %cst_72 = arith.constant 1.000000e+00 : f32
    %213 = vector.broadcast %cst_72 : f32 to vector<2x32xf32>
    %214 = arith.addf %213, %212 : vector<2x32xf32>
    %215 = arith.divf %213, %214 : vector<2x32xf32>
    %216 = vector.extract_strided_slice %203 {offsets = [0, 64], sizes = [2, 32], strides = [1, 1]} : vector<2x128xf32> to vector<2x32xf32>
    %217 = math.tanh %216 : vector<2x32xf32>
    %218 = vector.extract_strided_slice %203 {offsets = [0, 96], sizes = [2, 32], strides = [1, 1]} : vector<2x128xf32> to vector<2x32xf32>
    %219 = arith.negf %218 : vector<2x32xf32>
    %220 = math.exp %219 : vector<2x32xf32>
    %cst_73 = arith.constant 1.000000e+00 : f32
    %221 = vector.broadcast %cst_73 : f32 to vector<2x32xf32>
    %222 = arith.addf %221, %220 : vector<2x32xf32>
    %223 = arith.divf %221, %222 : vector<2x32xf32>
    %224 = arith.mulf %215, %189 : vector<2x32xf32>
    %225 = arith.mulf %209, %217 : vector<2x32xf32>
    %226 = arith.addf %224, %225 : vector<2x32xf32>
    %227 = math.tanh %226 : vector<2x32xf32>
    %228 = arith.mulf %223, %227 : vector<2x32xf32>
    %c0_i32_74 = arith.constant 0 : i32
    %229 = arith.addi %c0_i32_74, %c5_i32 : i32
    %230 = arith.index_cast %229 : i32 to index
    %c0_75 = arith.constant 0 : index
    %c0_76 = arith.constant 0 : index
    %231 = vector.load %arg12[%230, %c0_75, %c0_76] : memref<8x2x32xf32, #tpu.memory_space<vmem>>, vector<1x2x32xf32>
    %232 = vector.shape_cast %231 : vector<1x2x32xf32> to vector<2x32xf32>
    %233 = vector.shape_cast %228 : vector<2x32xf32> to vector<1x2x32xf32>
    tpu.vector_store %arg12[%230, %c0_75, %c0_76], %233 {strides = array<i32>} : memref<8x2x32xf32, #tpu.memory_space<vmem>>, vector<1x2x32xf32>,
    %c6_i32 = arith.constant 6 : i32
    %234 = arith.index_cast %c6_i32 : i32 to index
    %c0_77 = arith.constant 0 : index
    %c0_78 = arith.constant 0 : index
    %235 = vector.load %arg11[%234, %c0_77, %c0_78] : memref<8x2x128xf32, #tpu.memory_space<vmem>>, vector<1x2x128xf32>
    %236 = vector.shape_cast %235 : vector<1x2x128xf32> to vector<2x128xf32>
    %237 = arith.truncf %228 : vector<2x32xf32> to vector<2x32xbf16>
    %c0_79 = arith.constant 0 : index
    %c0_80 = arith.constant 0 : index
    %238 = vector.load %arg3[%c0_79, %c0_80] : memref<32x128xbf16, #tpu.memory_space<vmem>>, vector<32x128xbf16>
    %cst_81 = arith.constant dense<0.000000e+00> : vector<2x128xf32>
    %239 = tpu.matmul %237, %238, %cst_81 {dimension_numbers = #tpu.dot_dimension_numbers<[1], [0], [0], [1], [0, 0, 1, 1], [], []>} : vector<2x32xbf16>, vector<32x128xbf16>, vector<2x128xf32> -> vector<2x128xf32>
    %240 = arith.addf %236, %239 : vector<2x128xf32>
    %241 = vector.extract_strided_slice %240 {offsets = [0, 0], sizes = [2, 32], strides = [1, 1]} : vector<2x128xf32> to vector<2x32xf32>
    %242 = arith.negf %241 : vector<2x32xf32>
    %243 = math.exp %242 : vector<2x32xf32>
    %cst_82 = arith.constant 1.000000e+00 : f32
    %244 = vector.broadcast %cst_82 : f32 to vector<2x32xf32>
    %245 = arith.addf %244, %243 : vector<2x32xf32>
    %246 = arith.divf %244, %245 : vector<2x32xf32>
    %247 = vector.extract_strided_slice %240 {offsets = [0, 32], sizes = [2, 32], strides = [1, 1]} : vector<2x128xf32> to vector<2x32xf32>
    %248 = arith.negf %247 : vector<2x32xf32>
    %249 = math.exp %248 : vector<2x32xf32>
    %cst_83 = arith.constant 1.000000e+00 : f32
    %250 = vector.broadcast %cst_83 : f32 to vector<2x32xf32>
    %251 = arith.addf %250, %249 : vector<2x32xf32>
    %252 = arith.divf %250, %251 : vector<2x32xf32>
    %253 = vector.extract_strided_slice %240 {offsets = [0, 64], sizes = [2, 32], strides = [1, 1]} : vector<2x128xf32> to vector<2x32xf32>
    %254 = math.tanh %253 : vector<2x32xf32>
    %255 = vector.extract_strided_slice %240 {offsets = [0, 96], sizes = [2, 32], strides = [1, 1]} : vector<2x128xf32> to vector<2x32xf32>
    %256 = arith.negf %255 : vector<2x32xf32>
    %257 = math.exp %256 : vector<2x32xf32>
    %cst_84 = arith.constant 1.000000e+00 : f32
    %258 = vector.broadcast %cst_84 : f32 to vector<2x32xf32>
    %259 = arith.addf %258, %257 : vector<2x32xf32>
    %260 = arith.divf %258, %259 : vector<2x32xf32>
    %261 = arith.mulf %252, %226 : vector<2x32xf32>
    %262 = arith.mulf %246, %254 : vector<2x32xf32>
    %263 = arith.addf %261, %262 : vector<2x32xf32>
    %264 = math.tanh %263 : vector<2x32xf32>
    %265 = arith.mulf %260, %264 : vector<2x32xf32>
    %c0_i32_85 = arith.constant 0 : i32
    %266 = arith.addi %c0_i32_85, %c6_i32 : i32
    %267 = arith.index_cast %266 : i32 to index
    %c0_86 = arith.constant 0 : index
    %c0_87 = arith.constant 0 : index
    %268 = vector.load %arg12[%267, %c0_86, %c0_87] : memref<8x2x32xf32, #tpu.memory_space<vmem>>, vector<1x2x32xf32>
    %269 = vector.shape_cast %268 : vector<1x2x32xf32> to vector<2x32xf32>
    %270 = vector.shape_cast %265 : vector<2x32xf32> to vector<1x2x32xf32>
    tpu.vector_store %arg12[%267, %c0_86, %c0_87], %270 {strides = array<i32>} : memref<8x2x32xf32, #tpu.memory_space<vmem>>, vector<1x2x32xf32>,
    %c7_i32 = arith.constant 7 : i32
    %271 = arith.index_cast %c7_i32 : i32 to index
    %c0_88 = arith.constant 0 : index
    %c0_89 = arith.constant 0 : index
    %272 = vector.load %arg11[%271, %c0_88, %c0_89] : memref<8x2x128xf32, #tpu.memory_space<vmem>>, vector<1x2x128xf32>
    %273 = vector.shape_cast %272 : vector<1x2x128xf32> to vector<2x128xf32>
    %274 = arith.truncf %265 : vector<2x32xf32> to vector<2x32xbf16>
    %c0_90 = arith.constant 0 : index
    %c0_91 = arith.constant 0 : index
    %275 = vector.load %arg3[%c0_90, %c0_91] : memref<32x128xbf16, #tpu.memory_space<vmem>>, vector<32x128xbf16>
    %cst_92 = arith.constant dense<0.000000e+00> : vector<2x128xf32>
    %276 = tpu.matmul %274, %275, %cst_92 {dimension_numbers = #tpu.dot_dimension_numbers<[1], [0], [0], [1], [0, 0, 1, 1], [], []>} : vector<2x32xbf16>, vector<32x128xbf16>, vector<2x128xf32> -> vector<2x128xf32>
    %277 = arith.addf %273, %276 : vector<2x128xf32>
    %278 = vector.extract_strided_slice %277 {offsets = [0, 0], sizes = [2, 32], strides = [1, 1]} : vector<2x128xf32> to vector<2x32xf32>
    %279 = arith.negf %278 : vector<2x32xf32>
    %280 = math.exp %279 : vector<2x32xf32>
    %cst_93 = arith.constant 1.000000e+00 : f32
    %281 = vector.broadcast %cst_93 : f32 to vector<2x32xf32>
    %282 = arith.addf %281, %280 : vector<2x32xf32>
    %283 = arith.divf %281, %282 : vector<2x32xf32>
    %284 = vector.extract_strided_slice %277 {offsets = [0, 32], sizes = [2, 32], strides = [1, 1]} : vector<2x128xf32> to vector<2x32xf32>
    %285 = arith.negf %284 : vector<2x32xf32>
    %286 = math.exp %285 : vector<2x32xf32>
    %cst_94 = arith.constant 1.000000e+00 : f32
    %287 = vector.broadcast %cst_94 : f32 to vector<2x32xf32>
    %288 = arith.addf %287, %286 : vector<2x32xf32>
    %289 = arith.divf %287, %288 : vector<2x32xf32>
    %290 = vector.extract_strided_slice %277 {offsets = [0, 64], sizes = [2, 32], strides = [1, 1]} : vector<2x128xf32> to vector<2x32xf32>
    %291 = math.tanh %290 : vector<2x32xf32>
    %292 = vector.extract_strided_slice %277 {offsets = [0, 96], sizes = [2, 32], strides = [1, 1]} : vector<2x128xf32> to vector<2x32xf32>
    %293 = arith.negf %292 : vector<2x32xf32>
    %294 = math.exp %293 : vector<2x32xf32>
    %cst_95 = arith.constant 1.000000e+00 : f32
    %295 = vector.broadcast %cst_95 : f32 to vector<2x32xf32>
    %296 = arith.addf %295, %294 : vector<2x32xf32>
    %297 = arith.divf %295, %296 : vector<2x32xf32>
    %298 = arith.mulf %289, %263 : vector<2x32xf32>
    %299 = arith.mulf %283, %291 : vector<2x32xf32>
    %300 = arith.addf %298, %299 : vector<2x32xf32>
    %301 = math.tanh %300 : vector<2x32xf32>
    %302 = arith.mulf %297, %301 : vector<2x32xf32>
    %c0_i32_96 = arith.constant 0 : i32
    %303 = arith.addi %c0_i32_96, %c7_i32 : i32
    %304 = arith.index_cast %303 : i32 to index
    %c0_97 = arith.constant 0 : index
    %c0_98 = arith.constant 0 : index
    %305 = vector.load %arg12[%304, %c0_97, %c0_98] : memref<8x2x32xf32, #tpu.memory_space<vmem>>, vector<1x2x32xf32>
    %306 = vector.shape_cast %305 : vector<1x2x32xf32> to vector<2x32xf32>
    %307 = vector.shape_cast %302 : vector<2x32xf32> to vector<1x2x32xf32>
    tpu.vector_store %arg12[%304, %c0_97, %c0_98], %307 {strides = array<i32>} : memref<8x2x32xf32, #tpu.memory_space<vmem>>, vector<1x2x32xf32>,
    %c8_i32 = arith.constant 8 : i32
    %cst_99 = arith.constant 0.000000e+00 : f32
    %308 = vector.broadcast %cst_99 : f32 to vector<2x32xf32>
    %cst_100 = arith.constant 0.000000e+00 : f32
    %309 = vector.broadcast %cst_100 : f32 to vector<2x32xf32>
    %c0_101 = arith.constant 0 : index
    %c0_102 = arith.constant 0 : index
    %c0_103 = arith.constant 0 : index
    %310 = vector.load %arg12[%c0_101, %c0_102, %c0_103] : memref<8x2x32xf32, #tpu.memory_space<vmem>>, vector<8x2x32xf32>
    %311 = vector.shape_cast %310 : vector<8x2x32xf32> to vector<16x32xf32>
    %312 = arith.truncf %311 : vector<16x32xf32> to vector<16x32xbf16>
    %c0_104 = arith.constant 0 : index
    %c0_105 = arith.constant 0 : index
    %313 = vector.load %arg5[%c0_104, %c0_105] : memref<32x128xbf16, #tpu.memory_space<vmem>>, vector<32x128xbf16>
    %cst_106 = arith.constant dense<0.000000e+00> : vector<16x128xf32>
    %314 = tpu.matmul %312, %313, %cst_106 {dimension_numbers = #tpu.dot_dimension_numbers<[1], [0], [0], [1], [0, 0, 1, 1], [], []>} : vector<16x32xbf16>, vector<32x128xbf16>, vector<16x128xf32> -> vector<16x128xf32>
    %c0_107 = arith.constant 0 : index
    %c0_108 = arith.constant 0 : index
    %315 = vector.load %arg7[%c0_107, %c0_108] : memref<1x128xf32, #tpu.memory_space<vmem>>, vector<1x128xf32>
    %316 = vector.broadcast %315 : vector<1x128xf32> to vector<16x128xf32>
    %317 = arith.addf %314, %316 : vector<16x128xf32>
    %318 = vector.shape_cast %317 : vector<16x128xf32> to vector<8x2x128xf32>
    %c0_109 = arith.constant 0 : index
    %c0_110 = arith.constant 0 : index
    %c0_111 = arith.constant 0 : index
    %319 = vector.load %arg11[%c0_109, %c0_110, %c0_111] : memref<8x2x128xf32, #tpu.memory_space<vmem>>, vector<8x2x128xf32>
    tpu.vector_store %arg11[%c0_109, %c0_110, %c0_111], %318 {strides = array<i32>} : memref<8x2x128xf32, #tpu.memory_space<vmem>>, vector<8x2x128xf32>,
    %c0_i32_112 = arith.constant 0 : i32
    %320 = arith.index_cast %c0_i32_112 : i32 to index
    %c0_113 = arith.constant 0 : index
    %c0_114 = arith.constant 0 : index
    %321 = vector.load %arg11[%320, %c0_113, %c0_114] : memref<8x2x128xf32, #tpu.memory_space<vmem>>, vector<1x2x128xf32>
    %322 = vector.shape_cast %321 : vector<1x2x128xf32> to vector<2x128xf32>
    %323 = arith.truncf %308 : vector<2x32xf32> to vector<2x32xbf16>
    %c0_115 = arith.constant 0 : index
    %c0_116 = arith.constant 0 : index
    %324 = vector.load %arg6[%c0_115, %c0_116] : memref<32x128xbf16, #tpu.memory_space<vmem>>, vector<32x128xbf16>
    %cst_117 = arith.constant dense<0.000000e+00> : vector<2x128xf32>
    %325 = tpu.matmul %323, %324, %cst_117 {dimension_numbers = #tpu.dot_dimension_numbers<[1], [0], [0], [1], [0, 0, 1, 1], [], []>} : vector<2x32xbf16>, vector<32x128xbf16>, vector<2x128xf32> -> vector<2x128xf32>
    %326 = arith.addf %322, %325 : vector<2x128xf32>
    %327 = vector.extract_strided_slice %326 {offsets = [0, 0], sizes = [2, 32], strides = [1, 1]} : vector<2x128xf32> to vector<2x32xf32>
    %328 = arith.negf %327 : vector<2x32xf32>
    %329 = math.exp %328 : vector<2x32xf32>
    %cst_118 = arith.constant 1.000000e+00 : f32
    %330 = vector.broadcast %cst_118 : f32 to vector<2x32xf32>
    %331 = arith.addf %330, %329 : vector<2x32xf32>
    %332 = arith.divf %330, %331 : vector<2x32xf32>
    %333 = vector.extract_strided_slice %326 {offsets = [0, 32], sizes = [2, 32], strides = [1, 1]} : vector<2x128xf32> to vector<2x32xf32>
    %334 = arith.negf %333 : vector<2x32xf32>
    %335 = math.exp %334 : vector<2x32xf32>
    %cst_119 = arith.constant 1.000000e+00 : f32
    %336 = vector.broadcast %cst_119 : f32 to vector<2x32xf32>
    %337 = arith.addf %336, %335 : vector<2x32xf32>
    %338 = arith.divf %336, %337 : vector<2x32xf32>
    %339 = vector.extract_strided_slice %326 {offsets = [0, 64], sizes = [2, 32], strides = [1, 1]} : vector<2x128xf32> to vector<2x32xf32>
    %340 = math.tanh %339 : vector<2x32xf32>
    %341 = vector.extract_strided_slice %326 {offsets = [0, 96], sizes = [2, 32], strides = [1, 1]} : vector<2x128xf32> to vector<2x32xf32>
    %342 = arith.negf %341 : vector<2x32xf32>
    %343 = math.exp %342 : vector<2x32xf32>
    %cst_120 = arith.constant 1.000000e+00 : f32
    %344 = vector.broadcast %cst_120 : f32 to vector<2x32xf32>
    %345 = arith.addf %344, %343 : vector<2x32xf32>
    %346 = arith.divf %344, %345 : vector<2x32xf32>
    %347 = arith.mulf %338, %309 : vector<2x32xf32>
    %348 = arith.mulf %332, %340 : vector<2x32xf32>
    %349 = arith.addf %347, %348 : vector<2x32xf32>
    %350 = math.tanh %349 : vector<2x32xf32>
    %351 = arith.mulf %346, %350 : vector<2x32xf32>
    %c1_i32_121 = arith.constant 1 : i32
    %352 = arith.index_cast %c1_i32_121 : i32 to index
    %c0_122 = arith.constant 0 : index
    %c0_123 = arith.constant 0 : index
    %353 = vector.load %arg11[%352, %c0_122, %c0_123] : memref<8x2x128xf32, #tpu.memory_space<vmem>>, vector<1x2x128xf32>
    %354 = vector.shape_cast %353 : vector<1x2x128xf32> to vector<2x128xf32>
    %355 = arith.truncf %351 : vector<2x32xf32> to vector<2x32xbf16>
    %c0_124 = arith.constant 0 : index
    %c0_125 = arith.constant 0 : index
    %356 = vector.load %arg6[%c0_124, %c0_125] : memref<32x128xbf16, #tpu.memory_space<vmem>>, vector<32x128xbf16>
    %cst_126 = arith.constant dense<0.000000e+00> : vector<2x128xf32>
    %357 = tpu.matmul %355, %356, %cst_126 {dimension_numbers = #tpu.dot_dimension_numbers<[1], [0], [0], [1], [0, 0, 1, 1], [], []>} : vector<2x32xbf16>, vector<32x128xbf16>, vector<2x128xf32> -> vector<2x128xf32>
    %358 = arith.addf %354, %357 : vector<2x128xf32>
    %359 = vector.extract_strided_slice %358 {offsets = [0, 0], sizes = [2, 32], strides = [1, 1]} : vector<2x128xf32> to vector<2x32xf32>
    %360 = arith.negf %359 : vector<2x32xf32>
    %361 = math.exp %360 : vector<2x32xf32>
    %cst_127 = arith.constant 1.000000e+00 : f32
    %362 = vector.broadcast %cst_127 : f32 to vector<2x32xf32>
    %363 = arith.addf %362, %361 : vector<2x32xf32>
    %364 = arith.divf %362, %363 : vector<2x32xf32>
    %365 = vector.extract_strided_slice %358 {offsets = [0, 32], sizes = [2, 32], strides = [1, 1]} : vector<2x128xf32> to vector<2x32xf32>
    %366 = arith.negf %365 : vector<2x32xf32>
    %367 = math.exp %366 : vector<2x32xf32>
    %cst_128 = arith.constant 1.000000e+00 : f32
    %368 = vector.broadcast %cst_128 : f32 to vector<2x32xf32>
    %369 = arith.addf %368, %367 : vector<2x32xf32>
    %370 = arith.divf %368, %369 : vector<2x32xf32>
    %371 = vector.extract_strided_slice %358 {offsets = [0, 64], sizes = [2, 32], strides = [1, 1]} : vector<2x128xf32> to vector<2x32xf32>
    %372 = math.tanh %371 : vector<2x32xf32>
    %373 = vector.extract_strided_slice %358 {offsets = [0, 96], sizes = [2, 32], strides = [1, 1]} : vector<2x128xf32> to vector<2x32xf32>
    %374 = arith.negf %373 : vector<2x32xf32>
    %375 = math.exp %374 : vector<2x32xf32>
    %cst_129 = arith.constant 1.000000e+00 : f32
    %376 = vector.broadcast %cst_129 : f32 to vector<2x32xf32>
    %377 = arith.addf %376, %375 : vector<2x32xf32>
    %378 = arith.divf %376, %377 : vector<2x32xf32>
    %379 = arith.mulf %370, %349 : vector<2x32xf32>
    %380 = arith.mulf %364, %372 : vector<2x32xf32>
    %381 = arith.addf %379, %380 : vector<2x32xf32>
    %382 = math.tanh %381 : vector<2x32xf32>
    %383 = arith.mulf %378, %382 : vector<2x32xf32>
    %c2_i32_130 = arith.constant 2 : i32
    %384 = arith.index_cast %c2_i32_130 : i32 to index
    %c0_131 = arith.constant 0 : index
    %c0_132 = arith.constant 0 : index
    %385 = vector.load %arg11[%384, %c0_131, %c0_132] : memref<8x2x128xf32, #tpu.memory_space<vmem>>, vector<1x2x128xf32>
    %386 = vector.shape_cast %385 : vector<1x2x128xf32> to vector<2x128xf32>
    %387 = arith.truncf %383 : vector<2x32xf32> to vector<2x32xbf16>
    %c0_133 = arith.constant 0 : index
    %c0_134 = arith.constant 0 : index
    %388 = vector.load %arg6[%c0_133, %c0_134] : memref<32x128xbf16, #tpu.memory_space<vmem>>, vector<32x128xbf16>
    %cst_135 = arith.constant dense<0.000000e+00> : vector<2x128xf32>
    %389 = tpu.matmul %387, %388, %cst_135 {dimension_numbers = #tpu.dot_dimension_numbers<[1], [0], [0], [1], [0, 0, 1, 1], [], []>} : vector<2x32xbf16>, vector<32x128xbf16>, vector<2x128xf32> -> vector<2x128xf32>
    %390 = arith.addf %386, %389 : vector<2x128xf32>
    %391 = vector.extract_strided_slice %390 {offsets = [0, 0], sizes = [2, 32], strides = [1, 1]} : vector<2x128xf32> to vector<2x32xf32>
    %392 = arith.negf %391 : vector<2x32xf32>
    %393 = math.exp %392 : vector<2x32xf32>
    %cst_136 = arith.constant 1.000000e+00 : f32
    %394 = vector.broadcast %cst_136 : f32 to vector<2x32xf32>
    %395 = arith.addf %394, %393 : vector<2x32xf32>
    %396 = arith.divf %394, %395 : vector<2x32xf32>
    %397 = vector.extract_strided_slice %390 {offsets = [0, 32], sizes = [2, 32], strides = [1, 1]} : vector<2x128xf32> to vector<2x32xf32>
    %398 = arith.negf %397 : vector<2x32xf32>
    %399 = math.exp %398 : vector<2x32xf32>
    %cst_137 = arith.constant 1.000000e+00 : f32
    %400 = vector.broadcast %cst_137 : f32 to vector<2x32xf32>
    %401 = arith.addf %400, %399 : vector<2x32xf32>
    %402 = arith.divf %400, %401 : vector<2x32xf32>
    %403 = vector.extract_strided_slice %390 {offsets = [0, 64], sizes = [2, 32], strides = [1, 1]} : vector<2x128xf32> to vector<2x32xf32>
    %404 = math.tanh %403 : vector<2x32xf32>
    %405 = vector.extract_strided_slice %390 {offsets = [0, 96], sizes = [2, 32], strides = [1, 1]} : vector<2x128xf32> to vector<2x32xf32>
    %406 = arith.negf %405 : vector<2x32xf32>
    %407 = math.exp %406 : vector<2x32xf32>
    %cst_138 = arith.constant 1.000000e+00 : f32
    %408 = vector.broadcast %cst_138 : f32 to vector<2x32xf32>
    %409 = arith.addf %408, %407 : vector<2x32xf32>
    %410 = arith.divf %408, %409 : vector<2x32xf32>
    %411 = arith.mulf %402, %381 : vector<2x32xf32>
    %412 = arith.mulf %396, %404 : vector<2x32xf32>
    %413 = arith.addf %411, %412 : vector<2x32xf32>
    %414 = math.tanh %413 : vector<2x32xf32>
    %415 = arith.mulf %410, %414 : vector<2x32xf32>
    %c3_i32_139 = arith.constant 3 : i32
    %416 = arith.index_cast %c3_i32_139 : i32 to index
    %c0_140 = arith.constant 0 : index
    %c0_141 = arith.constant 0 : index
    %417 = vector.load %arg11[%416, %c0_140, %c0_141] : memref<8x2x128xf32, #tpu.memory_space<vmem>>, vector<1x2x128xf32>
    %418 = vector.shape_cast %417 : vector<1x2x128xf32> to vector<2x128xf32>
    %419 = arith.truncf %415 : vector<2x32xf32> to vector<2x32xbf16>
    %c0_142 = arith.constant 0 : index
    %c0_143 = arith.constant 0 : index
    %420 = vector.load %arg6[%c0_142, %c0_143] : memref<32x128xbf16, #tpu.memory_space<vmem>>, vector<32x128xbf16>
    %cst_144 = arith.constant dense<0.000000e+00> : vector<2x128xf32>
    %421 = tpu.matmul %419, %420, %cst_144 {dimension_numbers = #tpu.dot_dimension_numbers<[1], [0], [0], [1], [0, 0, 1, 1], [], []>} : vector<2x32xbf16>, vector<32x128xbf16>, vector<2x128xf32> -> vector<2x128xf32>
    %422 = arith.addf %418, %421 : vector<2x128xf32>
    %423 = vector.extract_strided_slice %422 {offsets = [0, 0], sizes = [2, 32], strides = [1, 1]} : vector<2x128xf32> to vector<2x32xf32>
    %424 = arith.negf %423 : vector<2x32xf32>
    %425 = math.exp %424 : vector<2x32xf32>
    %cst_145 = arith.constant 1.000000e+00 : f32
    %426 = vector.broadcast %cst_145 : f32 to vector<2x32xf32>
    %427 = arith.addf %426, %425 : vector<2x32xf32>
    %428 = arith.divf %426, %427 : vector<2x32xf32>
    %429 = vector.extract_strided_slice %422 {offsets = [0, 32], sizes = [2, 32], strides = [1, 1]} : vector<2x128xf32> to vector<2x32xf32>
    %430 = arith.negf %429 : vector<2x32xf32>
    %431 = math.exp %430 : vector<2x32xf32>
    %cst_146 = arith.constant 1.000000e+00 : f32
    %432 = vector.broadcast %cst_146 : f32 to vector<2x32xf32>
    %433 = arith.addf %432, %431 : vector<2x32xf32>
    %434 = arith.divf %432, %433 : vector<2x32xf32>
    %435 = vector.extract_strided_slice %422 {offsets = [0, 64], sizes = [2, 32], strides = [1, 1]} : vector<2x128xf32> to vector<2x32xf32>
    %436 = math.tanh %435 : vector<2x32xf32>
    %437 = vector.extract_strided_slice %422 {offsets = [0, 96], sizes = [2, 32], strides = [1, 1]} : vector<2x128xf32> to vector<2x32xf32>
    %438 = arith.negf %437 : vector<2x32xf32>
    %439 = math.exp %438 : vector<2x32xf32>
    %cst_147 = arith.constant 1.000000e+00 : f32
    %440 = vector.broadcast %cst_147 : f32 to vector<2x32xf32>
    %441 = arith.addf %440, %439 : vector<2x32xf32>
    %442 = arith.divf %440, %441 : vector<2x32xf32>
    %443 = arith.mulf %434, %413 : vector<2x32xf32>
    %444 = arith.mulf %428, %436 : vector<2x32xf32>
    %445 = arith.addf %443, %444 : vector<2x32xf32>
    %446 = math.tanh %445 : vector<2x32xf32>
    %447 = arith.mulf %442, %446 : vector<2x32xf32>
    %c4_i32_148 = arith.constant 4 : i32
    %448 = arith.index_cast %c4_i32_148 : i32 to index
    %c0_149 = arith.constant 0 : index
    %c0_150 = arith.constant 0 : index
    %449 = vector.load %arg11[%448, %c0_149, %c0_150] : memref<8x2x128xf32, #tpu.memory_space<vmem>>, vector<1x2x128xf32>
    %450 = vector.shape_cast %449 : vector<1x2x128xf32> to vector<2x128xf32>
    %451 = arith.truncf %447 : vector<2x32xf32> to vector<2x32xbf16>
    %c0_151 = arith.constant 0 : index
    %c0_152 = arith.constant 0 : index
    %452 = vector.load %arg6[%c0_151, %c0_152] : memref<32x128xbf16, #tpu.memory_space<vmem>>, vector<32x128xbf16>
    %cst_153 = arith.constant dense<0.000000e+00> : vector<2x128xf32>
    %453 = tpu.matmul %451, %452, %cst_153 {dimension_numbers = #tpu.dot_dimension_numbers<[1], [0], [0], [1], [0, 0, 1, 1], [], []>} : vector<2x32xbf16>, vector<32x128xbf16>, vector<2x128xf32> -> vector<2x128xf32>
    %454 = arith.addf %450, %453 : vector<2x128xf32>
    %455 = vector.extract_strided_slice %454 {offsets = [0, 0], sizes = [2, 32], strides = [1, 1]} : vector<2x128xf32> to vector<2x32xf32>
    %456 = arith.negf %455 : vector<2x32xf32>
    %457 = math.exp %456 : vector<2x32xf32>
    %cst_154 = arith.constant 1.000000e+00 : f32
    %458 = vector.broadcast %cst_154 : f32 to vector<2x32xf32>
    %459 = arith.addf %458, %457 : vector<2x32xf32>
    %460 = arith.divf %458, %459 : vector<2x32xf32>
    %461 = vector.extract_strided_slice %454 {offsets = [0, 32], sizes = [2, 32], strides = [1, 1]} : vector<2x128xf32> to vector<2x32xf32>
    %462 = arith.negf %461 : vector<2x32xf32>
    %463 = math.exp %462 : vector<2x32xf32>
    %cst_155 = arith.constant 1.000000e+00 : f32
    %464 = vector.broadcast %cst_155 : f32 to vector<2x32xf32>
    %465 = arith.addf %464, %463 : vector<2x32xf32>
    %466 = arith.divf %464, %465 : vector<2x32xf32>
    %467 = vector.extract_strided_slice %454 {offsets = [0, 64], sizes = [2, 32], strides = [1, 1]} : vector<2x128xf32> to vector<2x32xf32>
    %468 = math.tanh %467 : vector<2x32xf32>
    %469 = vector.extract_strided_slice %454 {offsets = [0, 96], sizes = [2, 32], strides = [1, 1]} : vector<2x128xf32> to vector<2x32xf32>
    %470 = arith.negf %469 : vector<2x32xf32>
    %471 = math.exp %470 : vector<2x32xf32>
    %cst_156 = arith.constant 1.000000e+00 : f32
    %472 = vector.broadcast %cst_156 : f32 to vector<2x32xf32>
    %473 = arith.addf %472, %471 : vector<2x32xf32>
    %474 = arith.divf %472, %473 : vector<2x32xf32>
    %475 = arith.mulf %466, %445 : vector<2x32xf32>
    %476 = arith.mulf %460, %468 : vector<2x32xf32>
    %477 = arith.addf %475, %476 : vector<2x32xf32>
    %478 = math.tanh %477 : vector<2x32xf32>
    %479 = arith.mulf %474, %478 : vector<2x32xf32>
    %c5_i32_157 = arith.constant 5 : i32
    %480 = arith.index_cast %c5_i32_157 : i32 to index
    %c0_158 = arith.constant 0 : index
    %c0_159 = arith.constant 0 : index
    %481 = vector.load %arg11[%480, %c0_158, %c0_159] : memref<8x2x128xf32, #tpu.memory_space<vmem>>, vector<1x2x128xf32>
    %482 = vector.shape_cast %481 : vector<1x2x128xf32> to vector<2x128xf32>
    %483 = arith.truncf %479 : vector<2x32xf32> to vector<2x32xbf16>
    %c0_160 = arith.constant 0 : index
    %c0_161 = arith.constant 0 : index
    %484 = vector.load %arg6[%c0_160, %c0_161] : memref<32x128xbf16, #tpu.memory_space<vmem>>, vector<32x128xbf16>
    %cst_162 = arith.constant dense<0.000000e+00> : vector<2x128xf32>
    %485 = tpu.matmul %483, %484, %cst_162 {dimension_numbers = #tpu.dot_dimension_numbers<[1], [0], [0], [1], [0, 0, 1, 1], [], []>} : vector<2x32xbf16>, vector<32x128xbf16>, vector<2x128xf32> -> vector<2x128xf32>
    %486 = arith.addf %482, %485 : vector<2x128xf32>
    %487 = vector.extract_strided_slice %486 {offsets = [0, 0], sizes = [2, 32], strides = [1, 1]} : vector<2x128xf32> to vector<2x32xf32>
    %488 = arith.negf %487 : vector<2x32xf32>
    %489 = math.exp %488 : vector<2x32xf32>
    %cst_163 = arith.constant 1.000000e+00 : f32
    %490 = vector.broadcast %cst_163 : f32 to vector<2x32xf32>
    %491 = arith.addf %490, %489 : vector<2x32xf32>
    %492 = arith.divf %490, %491 : vector<2x32xf32>
    %493 = vector.extract_strided_slice %486 {offsets = [0, 32], sizes = [2, 32], strides = [1, 1]} : vector<2x128xf32> to vector<2x32xf32>
    %494 = arith.negf %493 : vector<2x32xf32>
    %495 = math.exp %494 : vector<2x32xf32>
    %cst_164 = arith.constant 1.000000e+00 : f32
    %496 = vector.broadcast %cst_164 : f32 to vector<2x32xf32>
    %497 = arith.addf %496, %495 : vector<2x32xf32>
    %498 = arith.divf %496, %497 : vector<2x32xf32>
    %499 = vector.extract_strided_slice %486 {offsets = [0, 64], sizes = [2, 32], strides = [1, 1]} : vector<2x128xf32> to vector<2x32xf32>
    %500 = math.tanh %499 : vector<2x32xf32>
    %501 = vector.extract_strided_slice %486 {offsets = [0, 96], sizes = [2, 32], strides = [1, 1]} : vector<2x128xf32> to vector<2x32xf32>
    %502 = arith.negf %501 : vector<2x32xf32>
    %503 = math.exp %502 : vector<2x32xf32>
    %cst_165 = arith.constant 1.000000e+00 : f32
    %504 = vector.broadcast %cst_165 : f32 to vector<2x32xf32>
    %505 = arith.addf %504, %503 : vector<2x32xf32>
    %506 = arith.divf %504, %505 : vector<2x32xf32>
    %507 = arith.mulf %498, %477 : vector<2x32xf32>
    %508 = arith.mulf %492, %500 : vector<2x32xf32>
    %509 = arith.addf %507, %508 : vector<2x32xf32>
    %510 = math.tanh %509 : vector<2x32xf32>
    %511 = arith.mulf %506, %510 : vector<2x32xf32>
    %c6_i32_166 = arith.constant 6 : i32
    %512 = arith.index_cast %c6_i32_166 : i32 to index
    %c0_167 = arith.constant 0 : index
    %c0_168 = arith.constant 0 : index
    %513 = vector.load %arg11[%512, %c0_167, %c0_168] : memref<8x2x128xf32, #tpu.memory_space<vmem>>, vector<1x2x128xf32>
    %514 = vector.shape_cast %513 : vector<1x2x128xf32> to vector<2x128xf32>
    %515 = arith.truncf %511 : vector<2x32xf32> to vector<2x32xbf16>
    %c0_169 = arith.constant 0 : index
    %c0_170 = arith.constant 0 : index
    %516 = vector.load %arg6[%c0_169, %c0_170] : memref<32x128xbf16, #tpu.memory_space<vmem>>, vector<32x128xbf16>
    %cst_171 = arith.constant dense<0.000000e+00> : vector<2x128xf32>
    %517 = tpu.matmul %515, %516, %cst_171 {dimension_numbers = #tpu.dot_dimension_numbers<[1], [0], [0], [1], [0, 0, 1, 1], [], []>} : vector<2x32xbf16>, vector<32x128xbf16>, vector<2x128xf32> -> vector<2x128xf32>
    %518 = arith.addf %514, %517 : vector<2x128xf32>
    %519 = vector.extract_strided_slice %518 {offsets = [0, 0], sizes = [2, 32], strides = [1, 1]} : vector<2x128xf32> to vector<2x32xf32>
    %520 = arith.negf %519 : vector<2x32xf32>
    %521 = math.exp %520 : vector<2x32xf32>
    %cst_172 = arith.constant 1.000000e+00 : f32
    %522 = vector.broadcast %cst_172 : f32 to vector<2x32xf32>
    %523 = arith.addf %522, %521 : vector<2x32xf32>
    %524 = arith.divf %522, %523 : vector<2x32xf32>
    %525 = vector.extract_strided_slice %518 {offsets = [0, 32], sizes = [2, 32], strides = [1, 1]} : vector<2x128xf32> to vector<2x32xf32>
    %526 = arith.negf %525 : vector<2x32xf32>
    %527 = math.exp %526 : vector<2x32xf32>
    %cst_173 = arith.constant 1.000000e+00 : f32
    %528 = vector.broadcast %cst_173 : f32 to vector<2x32xf32>
    %529 = arith.addf %528, %527 : vector<2x32xf32>
    %530 = arith.divf %528, %529 : vector<2x32xf32>
    %531 = vector.extract_strided_slice %518 {offsets = [0, 64], sizes = [2, 32], strides = [1, 1]} : vector<2x128xf32> to vector<2x32xf32>
    %532 = math.tanh %531 : vector<2x32xf32>
    %533 = vector.extract_strided_slice %518 {offsets = [0, 96], sizes = [2, 32], strides = [1, 1]} : vector<2x128xf32> to vector<2x32xf32>
    %534 = arith.negf %533 : vector<2x32xf32>
    %535 = math.exp %534 : vector<2x32xf32>
    %cst_174 = arith.constant 1.000000e+00 : f32
    %536 = vector.broadcast %cst_174 : f32 to vector<2x32xf32>
    %537 = arith.addf %536, %535 : vector<2x32xf32>
    %538 = arith.divf %536, %537 : vector<2x32xf32>
    %539 = arith.mulf %530, %509 : vector<2x32xf32>
    %540 = arith.mulf %524, %532 : vector<2x32xf32>
    %541 = arith.addf %539, %540 : vector<2x32xf32>
    %542 = math.tanh %541 : vector<2x32xf32>
    %543 = arith.mulf %538, %542 : vector<2x32xf32>
    %c7_i32_175 = arith.constant 7 : i32
    %544 = arith.index_cast %c7_i32_175 : i32 to index
    %c0_176 = arith.constant 0 : index
    %c0_177 = arith.constant 0 : index
    %545 = vector.load %arg11[%544, %c0_176, %c0_177] : memref<8x2x128xf32, #tpu.memory_space<vmem>>, vector<1x2x128xf32>
    %546 = vector.shape_cast %545 : vector<1x2x128xf32> to vector<2x128xf32>
    %547 = arith.truncf %543 : vector<2x32xf32> to vector<2x32xbf16>
    %c0_178 = arith.constant 0 : index
    %c0_179 = arith.constant 0 : index
    %548 = vector.load %arg6[%c0_178, %c0_179] : memref<32x128xbf16, #tpu.memory_space<vmem>>, vector<32x128xbf16>
    %cst_180 = arith.constant dense<0.000000e+00> : vector<2x128xf32>
    %549 = tpu.matmul %547, %548, %cst_180 {dimension_numbers = #tpu.dot_dimension_numbers<[1], [0], [0], [1], [0, 0, 1, 1], [], []>} : vector<2x32xbf16>, vector<32x128xbf16>, vector<2x128xf32> -> vector<2x128xf32>
    %550 = arith.addf %546, %549 : vector<2x128xf32>
    %551 = vector.extract_strided_slice %550 {offsets = [0, 0], sizes = [2, 32], strides = [1, 1]} : vector<2x128xf32> to vector<2x32xf32>
    %552 = arith.negf %551 : vector<2x32xf32>
    %553 = math.exp %552 : vector<2x32xf32>
    %cst_181 = arith.constant 1.000000e+00 : f32
    %554 = vector.broadcast %cst_181 : f32 to vector<2x32xf32>
    %555 = arith.addf %554, %553 : vector<2x32xf32>
    %556 = arith.divf %554, %555 : vector<2x32xf32>
    %557 = vector.extract_strided_slice %550 {offsets = [0, 32], sizes = [2, 32], strides = [1, 1]} : vector<2x128xf32> to vector<2x32xf32>
    %558 = arith.negf %557 : vector<2x32xf32>
    %559 = math.exp %558 : vector<2x32xf32>
    %cst_182 = arith.constant 1.000000e+00 : f32
    %560 = vector.broadcast %cst_182 : f32 to vector<2x32xf32>
    %561 = arith.addf %560, %559 : vector<2x32xf32>
    %562 = arith.divf %560, %561 : vector<2x32xf32>
    %563 = vector.extract_strided_slice %550 {offsets = [0, 64], sizes = [2, 32], strides = [1, 1]} : vector<2x128xf32> to vector<2x32xf32>
    %564 = math.tanh %563 : vector<2x32xf32>
    %565 = vector.extract_strided_slice %550 {offsets = [0, 96], sizes = [2, 32], strides = [1, 1]} : vector<2x128xf32> to vector<2x32xf32>
    %566 = arith.negf %565 : vector<2x32xf32>
    %567 = math.exp %566 : vector<2x32xf32>
    %cst_183 = arith.constant 1.000000e+00 : f32
    %568 = vector.broadcast %cst_183 : f32 to vector<2x32xf32>
    %569 = arith.addf %568, %567 : vector<2x32xf32>
    %570 = arith.divf %568, %569 : vector<2x32xf32>
    %571 = arith.mulf %562, %541 : vector<2x32xf32>
    %572 = arith.mulf %556, %564 : vector<2x32xf32>
    %573 = arith.addf %571, %572 : vector<2x32xf32>
    %574 = math.tanh %573 : vector<2x32xf32>
    %575 = arith.mulf %570, %574 : vector<2x32xf32>
    %c8_i32_184 = arith.constant 8 : i32
    %576 = arith.truncf %575 : vector<2x32xf32> to vector<2x32xbf16>
    %c0_185 = arith.constant 0 : index
    %c0_186 = arith.constant 0 : index
    %577 = vector.load %arg8[%c0_185, %c0_186] : memref<32x5xbf16, #tpu.memory_space<vmem>>, vector<32x5xbf16>
    %cst_187 = arith.constant dense<0.000000e+00> : vector<2x5xf32>
    %578 = tpu.matmul %576, %577, %cst_187 {dimension_numbers = #tpu.dot_dimension_numbers<[1], [0], [0], [1], [0, 0, 1, 1], [], []>} : vector<2x32xbf16>, vector<32x5xbf16>, vector<2x5xf32> -> vector<2x5xf32>
    %c0_188 = arith.constant 0 : index
    %c0_189 = arith.constant 0 : index
    %579 = vector.load %arg9[%c0_188, %c0_189] : memref<1x5xf32, #tpu.memory_space<vmem>>, vector<1x5xf32>
    %580 = vector.broadcast %579 : vector<1x5xf32> to vector<2x5xf32>
    %581 = arith.addf %578, %580 : vector<2x5xf32>
    %582 = tpu.iota {dimensions = array<i32: 1>} : vector<2x5xi32>
    %c4_i32_190 = arith.constant 4 : i32
    %583 = vector.broadcast %c4_i32_190 : i32 to vector<2x5xi32>
    %584 = arith.cmpi slt, %582, %583 : vector<2x5xi32>
    %cst_191 = arith.constant -1.000000e+30 : f32
    %585 = vector.broadcast %cst_191 : f32 to vector<2x5xf32>
    %586 = arith.select %584, %581, %585 : vector<2x5xi1>, vector<2x5xf32>
    %cst_192 = arith.constant dense<0xFF800000> : vector<2xf32>
    %587 = vector.multi_reduction <maximumf>, %586, %cst_192 [1] : vector<2x5xf32> to vector<2xf32>
    %588 = vector.shape_cast %587 : vector<2xf32> to vector<2x1xf32>
    %589 = vector.broadcast %588 : vector<2x1xf32> to vector<2x5xf32>
    %590 = arith.subf %586, %589 : vector<2x5xf32>
    %591 = math.exp %590 : vector<2x5xf32>
    %cst_193 = arith.constant dense<0.000000e+00> : vector<2xf32>
    %592 = vector.multi_reduction <add>, %591, %cst_193 [1] : vector<2x5xf32> to vector<2xf32>
    %593 = vector.shape_cast %592 : vector<2xf32> to vector<2x1xf32>
    %594 = tpu.reciprocal %593 {approx = true} : vector<2x1xf32> -> vector<2x1xf32>
    %595 = arith.mulf %593, %594 : vector<2x1xf32>
    %cst_194 = arith.constant 2.000000e+00 : f32
    %596 = vector.broadcast %cst_194 : f32 to vector<2x1xf32>
    %597 = arith.subf %596, %595 : vector<2x1xf32>
    %598 = arith.mulf %594, %597 : vector<2x1xf32>
    %599 = vector.broadcast %598 : vector<2x1xf32> to vector<2x5xf32>
    %600 = arith.mulf %591, %599 : vector<2x5xf32>
    %601 = arith.select %584, %600, %581 : vector<2x5xi1>, vector<2x5xf32>
    %c0_195 = arith.constant 0 : index
    %c0_196 = arith.constant 0 : index
    %602 = vector.load %arg10[%c0_195, %c0_196] : memref<2x5xf32, #tpu.memory_space<vmem>>, vector<2x5xf32>
    tpu.vector_store %arg10[%c0_195, %c0_196], %601 {strides = array<i32>} : memref<2x5xf32, #tpu.memory_space<vmem>>, vector<2x5xf32>,
    return
  }
  func.func @transform_0(%arg0: i32) -> (i32, i32, i32) {
    %c0_i32 = arith.constant 0 : i32
    %c0_i32_0 = arith.constant 0 : i32
    %c0_i32_1 = arith.constant 0 : i32
    return %c0_i32, %arg0, %c0_i32_0 : i32, i32, i32
  }
  func.func @transform_1(%arg0: i32) -> (i32, i32) {
    %c0_i32 = arith.constant 0 : i32
    %c0_i32_0 = arith.constant 0 : i32
    %c0_i32_1 = arith.constant 0 : i32
    return %c0_i32, %c0_i32_0 : i32, i32
  }
  func.func @transform_2(%arg0: i32) -> (i32, i32) {
    %c0_i32 = arith.constant 0 : i32
    %c0_i32_0 = arith.constant 0 : i32
    %c0_i32_1 = arith.constant 0 : i32
    return %c0_i32, %c0_i32_0 : i32, i32
  }
  func.func @transform_3(%arg0: i32) -> (i32, i32) {
    %c0_i32 = arith.constant 0 : i32
    %c0_i32_0 = arith.constant 0 : i32
    %c0_i32_1 = arith.constant 0 : i32
    return %c0_i32, %c0_i32_0 : i32, i32
  }
  func.func @transform_4(%arg0: i32) -> (i32, i32) {
    %c0_i32 = arith.constant 0 : i32
    %c0_i32_0 = arith.constant 0 : i32
    %c0_i32_1 = arith.constant 0 : i32
    return %c0_i32, %c0_i32_0 : i32, i32
  }
  func.func @transform_5(%arg0: i32) -> (i32, i32) {
    %c0_i32 = arith.constant 0 : i32
    %c0_i32_0 = arith.constant 0 : i32
    %c0_i32_1 = arith.constant 0 : i32
    return %c0_i32, %c0_i32_0 : i32, i32
  }
  func.func @transform_6(%arg0: i32) -> (i32, i32) {
    %c0_i32 = arith.constant 0 : i32
    %c0_i32_0 = arith.constant 0 : i32
    %c0_i32_1 = arith.constant 0 : i32
    return %c0_i32, %c0_i32_0 : i32, i32
  }
  func.func @transform_7(%arg0: i32) -> (i32, i32) {
    %c0_i32 = arith.constant 0 : i32
    %c0_i32_0 = arith.constant 0 : i32
    %c0_i32_1 = arith.constant 0 : i32
    return %c0_i32, %c0_i32_0 : i32, i32
  }
  func.func @transform_8(%arg0: i32) -> (i32, i32) {
    %c0_i32 = arith.constant 0 : i32
    %c0_i32_0 = arith.constant 0 : i32
    %c0_i32_1 = arith.constant 0 : i32
    return %c0_i32, %c0_i32_0 : i32, i32
  }
  func.func @transform_9(%arg0: i32) -> (i32, i32) {
    %c0_i32 = arith.constant 0 : i32
    %c0_i32_0 = arith.constant 0 : i32
    return %arg0, %c0_i32 : i32, i32
  }
}

module attributes {stable_mosaic.version = 11 : i64} {
  func.func @_lstm_actor_critic_kernel(%arg0: i32, %arg1: memref<8x2x16xf32, #tpu.memory_space<vmem>>, %arg2: memref<16x128xbf16, #tpu.memory_space<vmem>>, %arg3: memref<32x128xbf16, #tpu.memory_space<vmem>>, %arg4: memref<1x128xf32, #tpu.memory_space<vmem>>, %arg5: memref<32x128xbf16, #tpu.memory_space<vmem>>, %arg6: memref<32x128xbf16, #tpu.memory_space<vmem>>, %arg7: memref<1x128xf32, #tpu.memory_space<vmem>>, %arg8: memref<32x5xbf16, #tpu.memory_space<vmem>>, %arg9: memref<1x5xf32, #tpu.memory_space<vmem>>, %arg10: memref<2x5xf32, #tpu.memory_space<vmem>>, %arg11: memref<8x2x128xf32, #tpu.memory_space<vmem>>, %arg12: memref<8x2x32xf32, #tpu.memory_space<vmem>>) attributes {dimension_semantics = [#tpu.dimension_semantics<parallel>], iteration_bounds = array<i64: 1>, scalar_prefetch = 0 : i64, scratch_operands = 2 : i64, tpu.core_type = #tpu.core_type<tc>, window_params = [{transform_indices = @transform_0, window_bounds = array<i64: 8, 2, 16>}, {pipeline_mode = #tpu.pipeline_mode<synchronous>, transform_indices = @transform_1, window_bounds = array<i64: 16, 128>}, {pipeline_mode = #tpu.pipeline_mode<synchronous>, transform_indices = @transform_2, window_bounds = array<i64: 32, 128>}, {pipeline_mode = #tpu.pipeline_mode<synchronous>, transform_indices = @transform_3, window_bounds = array<i64: 1, 128>}, {pipeline_mode = #tpu.pipeline_mode<synchronous>, transform_indices = @transform_4, window_bounds = array<i64: 32, 128>}, {pipeline_mode = #tpu.pipeline_mode<synchronous>, transform_indices = @transform_5, window_bounds = array<i64: 32, 128>}, {pipeline_mode = #tpu.pipeline_mode<synchronous>, transform_indices = @transform_6, window_bounds = array<i64: 1, 128>}, {pipeline_mode = #tpu.pipeline_mode<synchronous>, transform_indices = @transform_7, window_bounds = array<i64: 32, 5>}, {pipeline_mode = #tpu.pipeline_mode<synchronous>, transform_indices = @transform_8, window_bounds = array<i64: 1, 5>}, {transform_indices = @transform_9, window_bounds = array<i64: 2, 5>}]} {
    %cst = arith.constant 0.000000e+00 : f32
    %0 = vector.broadcast %cst : f32 to vector<2x32xf32>
    %cst_0 = arith.constant 0.000000e+00 : f32
    %1 = vector.broadcast %cst_0 : f32 to vector<2x32xf32>
    %c0 = arith.constant 0 : index
    %c0_1 = arith.constant 0 : index
    %c0_2 = arith.constant 0 : index
    %2 = vector.load %arg1[%c0, %c0_1, %c0_2] : memref<8x2x16xf32, #tpu.memory_space<vmem>>, vector<8x2x16xf32>
    %3 = vector.shape_cast %2 : vector<8x2x16xf32> to vector<16x16xf32>
    %4 = arith.truncf %3 : vector<16x16xf32> to vector<16x16xbf16>
    %c0_3 = arith.constant 0 : index
    %c0_4 = arith.constant 0 : index
    %5 = vector.load %arg2[%c0_3, %c0_4] : memref<16x128xbf16, #tpu.memory_space<vmem>>, vector<16x128xbf16>
    %cst_5 = arith.constant dense<0.000000e+00> : vector<16x128xf32>
    %6 = tpu.matmul %4, %5, %cst_5 {dimension_numbers = #tpu.dot_dimension_numbers<[1], [0], [0], [1], [0, 0, 1, 1], [], []>} : vector<16x16xbf16>, vector<16x128xbf16>, vector<16x128xf32> -> vector<16x128xf32>
    %c0_6 = arith.constant 0 : index
    %c0_7 = arith.constant 0 : index
    %7 = vector.load %arg4[%c0_6, %c0_7] : memref<1x128xf32, #tpu.memory_space<vmem>>, vector<1x128xf32>
    %8 = vector.broadcast %7 : vector<1x128xf32> to vector<16x128xf32>
    %9 = arith.addf %6, %8 : vector<16x128xf32>
    %10 = vector.shape_cast %9 : vector<16x128xf32> to vector<8x2x128xf32>
    %c0_8 = arith.constant 0 : index
    %c0_9 = arith.constant 0 : index
    %c0_10 = arith.constant 0 : index
    %11 = vector.load %arg11[%c0_8, %c0_9, %c0_10] : memref<8x2x128xf32, #tpu.memory_space<vmem>>, vector<8x2x128xf32>
    tpu.vector_store %arg11[%c0_8, %c0_9, %c0_10], %10 {strides = array<i32>} : memref<8x2x128xf32, #tpu.memory_space<vmem>>, vector<8x2x128xf32>,
    %c0_i32 = arith.constant 0 : i32
    %12 = arith.index_cast %c0_i32 : i32 to index
    %c0_11 = arith.constant 0 : index
    %c0_12 = arith.constant 0 : index
    %13 = vector.load %arg11[%12, %c0_11, %c0_12] : memref<8x2x128xf32, #tpu.memory_space<vmem>>, vector<1x2x128xf32>
    %14 = vector.shape_cast %13 : vector<1x2x128xf32> to vector<2x128xf32>
    %15 = arith.truncf %0 : vector<2x32xf32> to vector<2x32xbf16>
    %c0_13 = arith.constant 0 : index
    %c0_14 = arith.constant 0 : index
    %16 = vector.load %arg3[%c0_13, %c0_14] : memref<32x128xbf16, #tpu.memory_space<vmem>>, vector<32x128xbf16>
    %cst_15 = arith.constant dense<0.000000e+00> : vector<2x128xf32>
    %17 = tpu.matmul %15, %16, %cst_15 {dimension_numbers = #tpu.dot_dimension_numbers<[1], [0], [0], [1], [0, 0, 1, 1], [], []>} : vector<2x32xbf16>, vector<32x128xbf16>, vector<2x128xf32> -> vector<2x128xf32>
    %18 = arith.addf %14, %17 : vector<2x128xf32>
    %19 = vector.extract_strided_slice %18 {offsets = [0, 0], sizes = [2, 32], strides = [1, 1]} : vector<2x128xf32> to vector<2x32xf32>
    %20 = arith.negf %19 : vector<2x32xf32>
    %21 = math.exp %20 : vector<2x32xf32>
    %cst_16 = arith.constant 1.000000e+00 : f32
    %22 = vector.broadcast %cst_16 : f32 to vector<2x32xf32>
    %23 = arith.addf %22, %21 : vector<2x32xf32>
    %24 = arith.divf %22, %23 : vector<2x32xf32>
    %25 = vector.extract_strided_slice %18 {offsets = [0, 32], sizes = [2, 32], strides = [1, 1]} : vector<2x128xf32> to vector<2x32xf32>
    %26 = arith.negf %25 : vector<2x32xf32>
    %27 = math.exp %26 : vector<2x32xf32>
    %cst_17 = arith.constant 1.000000e+00 : f32
    %28 = vector.broadcast %cst_17 : f32 to vector<2x32xf32>
    %29 = arith.addf %28, %27 : vector<2x32xf32>
    %30 = arith.divf %28, %29 : vector<2x32xf32>
    %31 = vector.extract_strided_slice %18 {offsets = [0, 64], sizes = [2, 32], strides = [1, 1]} : vector<2x128xf32> to vector<2x32xf32>
    %32 = math.tanh %31 : vector<2x32xf32>
    %33 = vector.extract_strided_slice %18 {offsets = [0, 96], sizes = [2, 32], strides = [1, 1]} : vector<2x128xf32> to vector<2x32xf32>
    %34 = arith.negf %33 : vector<2x32xf32>
    %35 = math.exp %34 : vector<2x32xf32>
    %cst_18 = arith.constant 1.000000e+00 : f32
    %36 = vector.broadcast %cst_18 : f32 to vector<2x32xf32>
    %37 = arith.addf %36, %35 : vector<2x32xf32>
    %38 = arith.divf %36, %37 : vector<2x32xf32>
    %39 = arith.mulf %30, %1 : vector<2x32xf32>
    %40 = arith.mulf %24, %32 : vector<2x32xf32>
    %41 = arith.addf %39, %40 : vector<2x32xf32>
    %42 = math.tanh %41 : vector<2x32xf32>
    %43 = arith.mulf %38, %42 : vector<2x32xf32>
    %c0_i32_19 = arith.constant 0 : i32
    %44 = arith.addi %c0_i32_19, %c0_i32 : i32
    %45 = arith.index_cast %44 : i32 to index
    %c0_20 = arith.constant 0 : index
    %c0_21 = arith.constant 0 : index
    %46 = vector.load %arg12[%45, %c0_20, %c0_21] : memref<8x2x32xf32, #tpu.memory_space<vmem>>, vector<1x2x32xf32>
    %47 = vector.shape_cast %46 : vector<1x2x32xf32> to vector<2x32xf32>
    %48 = vector.shape_cast %43 : vector<2x32xf32> to vector<1x2x32xf32>
    tpu.vector_store %arg12[%45, %c0_20, %c0_21], %48 {strides = array<i32>} : memref<8x2x32xf32, #tpu.memory_space<vmem>>, vector<1x2x32xf32>,
    %c1_i32 = arith.constant 1 : i32
    %49 = arith.index_cast %c1_i32 : i32 to index
    %c0_22 = arith.constant 0 : index
    %c0_23 = arith.constant 0 : index
    %50 = vector.load %arg11[%49, %c0_22, %c0_23] : memref<8x2x128xf32, #tpu.memory_space<vmem>>, vector<1x2x128xf32>
    %51 = vector.shape_cast %50 : vector<1x2x128xf32> to vector<2x128xf32>
    %52 = arith.truncf %43 : vector<2x32xf32> to vector<2x32xbf16>
    %c0_24 = arith.constant 0 : index
    %c0_25 = arith.constant 0 : index
    %53 = vector.load %arg3[%c0_24, %c0_25] : memref<32x128xbf16, #tpu.memory_space<vmem>>, vector<32x128xbf16>
    %cst_26 = arith.constant dense<0.000000e+00> : vector<2x128xf32>
    %54 = tpu.matmul %52, %53, %cst_26 {dimension_numbers = #tpu.dot_dimension_numbers<[1], [0], [0], [1], [0, 0, 1, 1], [], []>} : vector<2x32xbf16>, vector<32x128xbf16>, vector<2x128xf32> -> vector<2x128xf32>
    %55 = arith.addf %51, %54 : vector<2x128xf32>
    %56 = vector.extract_strided_slice %55 {offsets = [0, 0], sizes = [2, 32], strides = [1, 1]} : vector<2x128xf32> to vector<2x32xf32>
    %57 = arith.negf %56 : vector<2x32xf32>
    %58 = math.exp %57 : vector<2x32xf32>
    %cst_27 = arith.constant 1.000000e+00 : f32
    %59 = vector.broadcast %cst_27 : f32 to vector<2x32xf32>
    %60 = arith.addf %59, %58 : vector<2x32xf32>
    %61 = arith.divf %59, %60 : vector<2x32xf32>
    %62 = vector.extract_strided_slice %55 {offsets = [0, 32], sizes = [2, 32], strides = [1, 1]} : vector<2x128xf32> to vector<2x32xf32>
    %63 = arith.negf %62 : vector<2x32xf32>
    %64 = math.exp %63 : vector<2x32xf32>
    %cst_28 = arith.constant 1.000000e+00 : f32
    %65 = vector.broadcast %cst_28 : f32 to vector<2x32xf32>
    %66 = arith.addf %65, %64 : vector<2x32xf32>
    %67 = arith.divf %65, %66 : vector<2x32xf32>
    %68 = vector.extract_strided_slice %55 {offsets = [0, 64], sizes = [2, 32], strides = [1, 1]} : vector<2x128xf32> to vector<2x32xf32>
    %69 = math.tanh %68 : vector<2x32xf32>
    %70 = vector.extract_strided_slice %55 {offsets = [0, 96], sizes = [2, 32], strides = [1, 1]} : vector<2x128xf32> to vector<2x32xf32>
    %71 = arith.negf %70 : vector<2x32xf32>
    %72 = math.exp %71 : vector<2x32xf32>
    %cst_29 = arith.constant 1.000000e+00 : f32
    %73 = vector.broadcast %cst_29 : f32 to vector<2x32xf32>
    %74 = arith.addf %73, %72 : vector<2x32xf32>
    %75 = arith.divf %73, %74 : vector<2x32xf32>
    %76 = arith.mulf %67, %41 : vector<2x32xf32>
    %77 = arith.mulf %61, %69 : vector<2x32xf32>
    %78 = arith.addf %76, %77 : vector<2x32xf32>
    %79 = math.tanh %78 : vector<2x32xf32>
    %80 = arith.mulf %75, %79 : vector<2x32xf32>
    %c0_i32_30 = arith.constant 0 : i32
    %81 = arith.addi %c0_i32_30, %c1_i32 : i32
    %82 = arith.index_cast %81 : i32 to index
    %c0_31 = arith.constant 0 : index
    %c0_32 = arith.constant 0 : index
    %83 = vector.load %arg12[%82, %c0_31, %c0_32] : memref<8x2x32xf32, #tpu.memory_space<vmem>>, vector<1x2x32xf32>
    %84 = vector.shape_cast %83 : vector<1x2x32xf32> to vector<2x32xf32>
    %85 = vector.shape_cast %80 : vector<2x32xf32> to vector<1x2x32xf32>
    tpu.vector_store %arg12[%82, %c0_31, %c0_32], %85 {strides = array<i32>} : memref<8x2x32xf32, #tpu.memory_space<vmem>>, vector<1x2x32xf32>,
    %c2_i32 = arith.constant 2 : i32
    %86 = arith.index_cast %c2_i32 : i32 to index
    %c0_33 = arith.constant 0 : index
    %c0_34 = arith.constant 0 : index
    %87 = vector.load %arg11[%86, %c0_33, %c0_34] : memref<8x2x128xf32, #tpu.memory_space<vmem>>, vector<1x2x128xf32>
    %88 = vector.shape_cast %87 : vector<1x2x128xf32> to vector<2x128xf32>
    %89 = arith.truncf %80 : vector<2x32xf32> to vector<2x32xbf16>
    %c0_35 = arith.constant 0 : index
    %c0_36 = arith.constant 0 : index
    %90 = vector.load %arg3[%c0_35, %c0_36] : memref<32x128xbf16, #tpu.memory_space<vmem>>, vector<32x128xbf16>
    %cst_37 = arith.constant dense<0.000000e+00> : vector<2x128xf32>
    %91 = tpu.matmul %89, %90, %cst_37 {dimension_numbers = #tpu.dot_dimension_numbers<[1], [0], [0], [1], [0, 0, 1, 1], [], []>} : vector<2x32xbf16>, vector<32x128xbf16>, vector<2x128xf32> -> vector<2x128xf32>
    %92 = arith.addf %88, %91 : vector<2x128xf32>
    %93 = vector.extract_strided_slice %92 {offsets = [0, 0], sizes = [2, 32], strides = [1, 1]} : vector<2x128xf32> to vector<2x32xf32>
    %94 = arith.negf %93 : vector<2x32xf32>
    %95 = math.exp %94 : vector<2x32xf32>
    %cst_38 = arith.constant 1.000000e+00 : f32
    %96 = vector.broadcast %cst_38 : f32 to vector<2x32xf32>
    %97 = arith.addf %96, %95 : vector<2x32xf32>
    %98 = arith.divf %96, %97 : vector<2x32xf32>
    %99 = vector.extract_strided_slice %92 {offsets = [0, 32], sizes = [2, 32], strides = [1, 1]} : vector<2x128xf32> to vector<2x32xf32>
    %100 = arith.negf %99 : vector<2x32xf32>
    %101 = math.exp %100 : vector<2x32xf32>
    %cst_39 = arith.constant 1.000000e+00 : f32
    %102 = vector.broadcast %cst_39 : f32 to vector<2x32xf32>
    %103 = arith.addf %102, %101 : vector<2x32xf32>
    %104 = arith.divf %102, %103 : vector<2x32xf32>
    %105 = vector.extract_strided_slice %92 {offsets = [0, 64], sizes = [2, 32], strides = [1, 1]} : vector<2x128xf32> to vector<2x32xf32>
    %106 = math.tanh %105 : vector<2x32xf32>
    %107 = vector.extract_strided_slice %92 {offsets = [0, 96], sizes = [2, 32], strides = [1, 1]} : vector<2x128xf32> to vector<2x32xf32>
    %108 = arith.negf %107 : vector<2x32xf32>
    %109 = math.exp %108 : vector<2x32xf32>
    %cst_40 = arith.constant 1.000000e+00 : f32
    %110 = vector.broadcast %cst_40 : f32 to vector<2x32xf32>
    %111 = arith.addf %110, %109 : vector<2x32xf32>
    %112 = arith.divf %110, %111 : vector<2x32xf32>
    %113 = arith.mulf %104, %78 : vector<2x32xf32>
    %114 = arith.mulf %98, %106 : vector<2x32xf32>
    %115 = arith.addf %113, %114 : vector<2x32xf32>
    %116 = math.tanh %115 : vector<2x32xf32>
    %117 = arith.mulf %112, %116 : vector<2x32xf32>
    %c0_i32_41 = arith.constant 0 : i32
    %118 = arith.addi %c0_i32_41, %c2_i32 : i32
    %119 = arith.index_cast %118 : i32 to index
    %c0_42 = arith.constant 0 : index
    %c0_43 = arith.constant 0 : index
    %120 = vector.load %arg12[%119, %c0_42, %c0_43] : memref<8x2x32xf32, #tpu.memory_space<vmem>>, vector<1x2x32xf32>
    %121 = vector.shape_cast %120 : vector<1x2x32xf32> to vector<2x32xf32>
    %122 = vector.shape_cast %117 : vector<2x32xf32> to vector<1x2x32xf32>
    tpu.vector_store %arg12[%119, %c0_42, %c0_43], %122 {strides = array<i32>} : memref<8x2x32xf32, #tpu.memory_space<vmem>>, vector<1x2x32xf32>,
    %c3_i32 = arith.constant 3 : i32
    %123 = arith.index_cast %c3_i32 : i32 to index
    %c0_44 = arith.constant 0 : index
    %c0_45 = arith.constant 0 : index
    %124 = vector.load %arg11[%123, %c0_44, %c0_45] : memref<8x2x128xf32, #tpu.memory_space<vmem>>, vector<1x2x128xf32>
    %125 = vector.shape_cast %124 : vector<1x2x128xf32> to vector<2x128xf32>
    %126 = arith.truncf %117 : vector<2x32xf32> to vector<2x32xbf16>
    %c0_46 = arith.constant 0 : index
    %c0_47 = arith.constant 0 : index
    %127 = vector.load %arg3[%c0_46, %c0_47] : memref<32x128xbf16, #tpu.memory_space<vmem>>, vector<32x128xbf16>
    %cst_48 = arith.constant dense<0.000000e+00> : vector<2x128xf32>
    %128 = tpu.matmul %126, %127, %cst_48 {dimension_numbers = #tpu.dot_dimension_numbers<[1], [0], [0], [1], [0, 0, 1, 1], [], []>} : vector<2x32xbf16>, vector<32x128xbf16>, vector<2x128xf32> -> vector<2x128xf32>
    %129 = arith.addf %125, %128 : vector<2x128xf32>
    %130 = vector.extract_strided_slice %129 {offsets = [0, 0], sizes = [2, 32], strides = [1, 1]} : vector<2x128xf32> to vector<2x32xf32>
    %131 = arith.negf %130 : vector<2x32xf32>
    %132 = math.exp %131 : vector<2x32xf32>
    %cst_49 = arith.constant 1.000000e+00 : f32
    %133 = vector.broadcast %cst_49 : f32 to vector<2x32xf32>
    %134 = arith.addf %133, %132 : vector<2x32xf32>
    %135 = arith.divf %133, %134 : vector<2x32xf32>
    %136 = vector.extract_strided_slice %129 {offsets = [0, 32], sizes = [2, 32], strides = [1, 1]} : vector<2x128xf32> to vector<2x32xf32>
    %137 = arith.negf %136 : vector<2x32xf32>
    %138 = math.exp %137 : vector<2x32xf32>
    %cst_50 = arith.constant 1.000000e+00 : f32
    %139 = vector.broadcast %cst_50 : f32 to vector<2x32xf32>
    %140 = arith.addf %139, %138 : vector<2x32xf32>
    %141 = arith.divf %139, %140 : vector<2x32xf32>
    %142 = vector.extract_strided_slice %129 {offsets = [0, 64], sizes = [2, 32], strides = [1, 1]} : vector<2x128xf32> to vector<2x32xf32>
    %143 = math.tanh %142 : vector<2x32xf32>
    %144 = vector.extract_strided_slice %129 {offsets = [0, 96], sizes = [2, 32], strides = [1, 1]} : vector<2x128xf32> to vector<2x32xf32>
    %145 = arith.negf %144 : vector<2x32xf32>
    %146 = math.exp %145 : vector<2x32xf32>
    %cst_51 = arith.constant 1.000000e+00 : f32
    %147 = vector.broadcast %cst_51 : f32 to vector<2x32xf32>
    %148 = arith.addf %147, %146 : vector<2x32xf32>
    %149 = arith.divf %147, %148 : vector<2x32xf32>
    %150 = arith.mulf %141, %115 : vector<2x32xf32>
    %151 = arith.mulf %135, %143 : vector<2x32xf32>
    %152 = arith.addf %150, %151 : vector<2x32xf32>
    %153 = math.tanh %152 : vector<2x32xf32>
    %154 = arith.mulf %149, %153 : vector<2x32xf32>
    %c0_i32_52 = arith.constant 0 : i32
    %155 = arith.addi %c0_i32_52, %c3_i32 : i32
    %156 = arith.index_cast %155 : i32 to index
    %c0_53 = arith.constant 0 : index
    %c0_54 = arith.constant 0 : index
    %157 = vector.load %arg12[%156, %c0_53, %c0_54] : memref<8x2x32xf32, #tpu.memory_space<vmem>>, vector<1x2x32xf32>
    %158 = vector.shape_cast %157 : vector<1x2x32xf32> to vector<2x32xf32>
    %159 = vector.shape_cast %154 : vector<2x32xf32> to vector<1x2x32xf32>
    tpu.vector_store %arg12[%156, %c0_53, %c0_54], %159 {strides = array<i32>} : memref<8x2x32xf32, #tpu.memory_space<vmem>>, vector<1x2x32xf32>,
    %c4_i32 = arith.constant 4 : i32
    %160 = arith.index_cast %c4_i32 : i32 to index
    %c0_55 = arith.constant 0 : index
    %c0_56 = arith.constant 0 : index
    %161 = vector.load %arg11[%160, %c0_55, %c0_56] : memref<8x2x128xf32, #tpu.memory_space<vmem>>, vector<1x2x128xf32>
    %162 = vector.shape_cast %161 : vector<1x2x128xf32> to vector<2x128xf32>
    %163 = arith.truncf %154 : vector<2x32xf32> to vector<2x32xbf16>
    %c0_57 = arith.constant 0 : index
    %c0_58 = arith.constant 0 : index
    %164 = vector.load %arg3[%c0_57, %c0_58] : memref<32x128xbf16, #tpu.memory_space<vmem>>, vector<32x128xbf16>
    %cst_59 = arith.constant dense<0.000000e+00> : vector<2x128xf32>
    %165 = tpu.matmul %163, %164, %cst_59 {dimension_numbers = #tpu.dot_dimension_numbers<[1], [0], [0], [1], [0, 0, 1, 1], [], []>} : vector<2x32xbf16>, vector<32x128xbf16>, vector<2x128xf32> -> vector<2x128xf32>
    %166 = arith.addf %162, %165 : vector<2x128xf32>
    %167 = vector.extract_strided_slice %166 {offsets = [0, 0], sizes = [2, 32], strides = [1, 1]} : vector<2x128xf32> to vector<2x32xf32>
    %168 = arith.negf %167 : vector<2x32xf32>
    %169 = math.exp %168 : vector<2x32xf32>
    %cst_60 = arith.constant 1.000000e+00 : f32
    %170 = vector.broadcast %cst_60 : f32 to vector<2x32xf32>
    %171 = arith.addf %170, %169 : vector<2x32xf32>
    %172 = arith.divf %170, %171 : vector<2x32xf32>
    %173 = vector.extract_strided_slice %166 {offsets = [0, 32], sizes = [2, 32], strides = [1, 1]} : vector<2x128xf32> to vector<2x32xf32>
    %174 = arith.negf %173 : vector<2x32xf32>
    %175 = math.exp %174 : vector<2x32xf32>
    %cst_61 = arith.constant 1.000000e+00 : f32
    %176 = vector.broadcast %cst_61 : f32 to vector<2x32xf32>
    %177 = arith.addf %176, %175 : vector<2x32xf32>
    %178 = arith.divf %176, %177 : vector<2x32xf32>
    %179 = vector.extract_strided_slice %166 {offsets = [0, 64], sizes = [2, 32], strides = [1, 1]} : vector<2x128xf32> to vector<2x32xf32>
    %180 = math.tanh %179 : vector<2x32xf32>
    %181 = vector.extract_strided_slice %166 {offsets = [0, 96], sizes = [2, 32], strides = [1, 1]} : vector<2x128xf32> to vector<2x32xf32>
    %182 = arith.negf %181 : vector<2x32xf32>
    %183 = math.exp %182 : vector<2x32xf32>
    %cst_62 = arith.constant 1.000000e+00 : f32
    %184 = vector.broadcast %cst_62 : f32 to vector<2x32xf32>
    %185 = arith.addf %184, %183 : vector<2x32xf32>
    %186 = arith.divf %184, %185 : vector<2x32xf32>
    %187 = arith.mulf %178, %152 : vector<2x32xf32>
    %188 = arith.mulf %172, %180 : vector<2x32xf32>
    %189 = arith.addf %187, %188 : vector<2x32xf32>
    %190 = math.tanh %189 : vector<2x32xf32>
    %191 = arith.mulf %186, %190 : vector<2x32xf32>
    %c0_i32_63 = arith.constant 0 : i32
    %192 = arith.addi %c0_i32_63, %c4_i32 : i32
    %193 = arith.index_cast %192 : i32 to index
    %c0_64 = arith.constant 0 : index
    %c0_65 = arith.constant 0 : index
    %194 = vector.load %arg12[%193, %c0_64, %c0_65] : memref<8x2x32xf32, #tpu.memory_space<vmem>>, vector<1x2x32xf32>
    %195 = vector.shape_cast %194 : vector<1x2x32xf32> to vector<2x32xf32>
    %196 = vector.shape_cast %191 : vector<2x32xf32> to vector<1x2x32xf32>
    tpu.vector_store %arg12[%193, %c0_64, %c0_65], %196 {strides = array<i32>} : memref<8x2x32xf32, #tpu.memory_space<vmem>>, vector<1x2x32xf32>,
    %c5_i32 = arith.constant 5 : i32
    %197 = arith.index_cast %c5_i32 : i32 to index
    %c0_66 = arith.constant 0 : index
    %c0_67 = arith.constant 0 : index
    %198 = vector.load %arg11[%197, %c0_66, %c0_67] : memref<8x2x128xf32, #tpu.memory_space<vmem>>, vector<1x2x128xf32>
    %199 = vector.shape_cast %198 : vector<1x2x128xf32> to vector<2x128xf32>
    %200 = arith.truncf %191 : vector<2x32xf32> to vector<2x32xbf16>
    %c0_68 = arith.constant 0 : index
    %c0_69 = arith.constant 0 : index
    %201 = vector.load %arg3[%c0_68, %c0_69] : memref<32x128xbf16, #tpu.memory_space<vmem>>, vector<32x128xbf16>
    %cst_70 = arith.constant dense<0.000000e+00> : vector<2x128xf32>
    %202 = tpu.matmul %200, %201, %cst_70 {dimension_numbers = #tpu.dot_dimension_numbers<[1], [0], [0], [1], [0, 0, 1, 1], [], []>} : vector<2x32xbf16>, vector<32x128xbf16>, vector<2x128xf32> -> vector<2x128xf32>
    %203 = arith.addf %199, %202 : vector<2x128xf32>
    %204 = vector.extract_strided_slice %203 {offsets = [0, 0], sizes = [2, 32], strides = [1, 1]} : vector<2x128xf32> to vector<2x32xf32>
    %205 = arith.negf %204 : vector<2x32xf32>
    %206 = math.exp %205 : vector<2x32xf32>
    %cst_71 = arith.constant 1.000000e+00 : f32
    %207 = vector.broadcast %cst_71 : f32 to vector<2x32xf32>
    %208 = arith.addf %207, %206 : vector<2x32xf32>
    %209 = arith.divf %207, %208 : vector<2x32xf32>
    %210 = vector.extract_strided_slice %203 {offsets = [0, 32], sizes = [2, 32], strides = [1, 1]} : vector<2x128xf32> to vector<2x32xf32>
    %211 = arith.negf %210 : vector<2x32xf32>
    %212 = math.exp %211 : vector<2x32xf32>
    %cst_72 = arith.constant 1.000000e+00 : f32
    %213 = vector.broadcast %cst_72 : f32 to vector<2x32xf32>
    %214 = arith.addf %213, %212 : vector<2x32xf32>
    %215 = arith.divf %213, %214 : vector<2x32xf32>
    %216 = vector.extract_strided_slice %203 {offsets = [0, 64], sizes = [2, 32], strides = [1, 1]} : vector<2x128xf32> to vector<2x32xf32>
    %217 = math.tanh %216 : vector<2x32xf32>
    %218 = vector.extract_strided_slice %203 {offsets = [0, 96], sizes = [2, 32], strides = [1, 1]} : vector<2x128xf32> to vector<2x32xf32>
    %219 = arith.negf %218 : vector<2x32xf32>
    %220 = math.exp %219 : vector<2x32xf32>
    %cst_73 = arith.constant 1.000000e+00 : f32
    %221 = vector.broadcast %cst_73 : f32 to vector<2x32xf32>
    %222 = arith.addf %221, %220 : vector<2x32xf32>
    %223 = arith.divf %221, %222 : vector<2x32xf32>
    %224 = arith.mulf %215, %189 : vector<2x32xf32>
    %225 = arith.mulf %209, %217 : vector<2x32xf32>
    %226 = arith.addf %224, %225 : vector<2x32xf32>
    %227 = math.tanh %226 : vector<2x32xf32>
    %228 = arith.mulf %223, %227 : vector<2x32xf32>
    %c0_i32_74 = arith.constant 0 : i32
    %229 = arith.addi %c0_i32_74, %c5_i32 : i32
    %230 = arith.index_cast %229 : i32 to index
    %c0_75 = arith.constant 0 : index
    %c0_76 = arith.constant 0 : index
    %231 = vector.load %arg12[%230, %c0_75, %c0_76] : memref<8x2x32xf32, #tpu.memory_space<vmem>>, vector<1x2x32xf32>
    %232 = vector.shape_cast %231 : vector<1x2x32xf32> to vector<2x32xf32>
    %233 = vector.shape_cast %228 : vector<2x32xf32> to vector<1x2x32xf32>
    tpu.vector_store %arg12[%230, %c0_75, %c0_76], %233 {strides = array<i32>} : memref<8x2x32xf32, #tpu.memory_space<vmem>>, vector<1x2x32xf32>,
    %c6_i32 = arith.constant 6 : i32
    %234 = arith.index_cast %c6_i32 : i32 to index
    %c0_77 = arith.constant 0 : index
    %c0_78 = arith.constant 0 : index
    %235 = vector.load %arg11[%234, %c0_77, %c0_78] : memref<8x2x128xf32, #tpu.memory_space<vmem>>, vector<1x2x128xf32>
    %236 = vector.shape_cast %235 : vector<1x2x128xf32> to vector<2x128xf32>
    %237 = arith.truncf %228 : vector<2x32xf32> to vector<2x32xbf16>
    %c0_79 = arith.constant 0 : index
    %c0_80 = arith.constant 0 : index
    %238 = vector.load %arg3[%c0_79, %c0_80] : memref<32x128xbf16, #tpu.memory_space<vmem>>, vector<32x128xbf16>
    %cst_81 = arith.constant dense<0.000000e+00> : vector<2x128xf32>
    %239 = tpu.matmul %237, %238, %cst_81 {dimension_numbers = #tpu.dot_dimension_numbers<[1], [0], [0], [1], [0, 0, 1, 1], [], []>} : vector<2x32xbf16>, vector<32x128xbf16>, vector<2x128xf32> -> vector<2x128xf32>
    %240 = arith.addf %236, %239 : vector<2x128xf32>
    %241 = vector.extract_strided_slice %240 {offsets = [0, 0], sizes = [2, 32], strides = [1, 1]} : vector<2x128xf32> to vector<2x32xf32>
    %242 = arith.negf %241 : vector<2x32xf32>
    %243 = math.exp %242 : vector<2x32xf32>
    %cst_82 = arith.constant 1.000000e+00 : f32
    %244 = vector.broadcast %cst_82 : f32 to vector<2x32xf32>
    %245 = arith.addf %244, %243 : vector<2x32xf32>
    %246 = arith.divf %244, %245 : vector<2x32xf32>
    %247 = vector.extract_strided_slice %240 {offsets = [0, 32], sizes = [2, 32], strides = [1, 1]} : vector<2x128xf32> to vector<2x32xf32>
    %248 = arith.negf %247 : vector<2x32xf32>
    %249 = math.exp %248 : vector<2x32xf32>
    %cst_83 = arith.constant 1.000000e+00 : f32
    %250 = vector.broadcast %cst_83 : f32 to vector<2x32xf32>
    %251 = arith.addf %250, %249 : vector<2x32xf32>
    %252 = arith.divf %250, %251 : vector<2x32xf32>
    %253 = vector.extract_strided_slice %240 {offsets = [0, 64], sizes = [2, 32], strides = [1, 1]} : vector<2x128xf32> to vector<2x32xf32>
    %254 = math.tanh %253 : vector<2x32xf32>
    %255 = vector.extract_strided_slice %240 {offsets = [0, 96], sizes = [2, 32], strides = [1, 1]} : vector<2x128xf32> to vector<2x32xf32>
    %256 = arith.negf %255 : vector<2x32xf32>
    %257 = math.exp %256 : vector<2x32xf32>
    %cst_84 = arith.constant 1.000000e+00 : f32
    %258 = vector.broadcast %cst_84 : f32 to vector<2x32xf32>
    %259 = arith.addf %258, %257 : vector<2x32xf32>
    %260 = arith.divf %258, %259 : vector<2x32xf32>
    %261 = arith.mulf %252, %226 : vector<2x32xf32>
    %262 = arith.mulf %246, %254 : vector<2x32xf32>
    %263 = arith.addf %261, %262 : vector<2x32xf32>
    %264 = math.tanh %263 : vector<2x32xf32>
    %265 = arith.mulf %260, %264 : vector<2x32xf32>
    %c0_i32_85 = arith.constant 0 : i32
    %266 = arith.addi %c0_i32_85, %c6_i32 : i32
    %267 = arith.index_cast %266 : i32 to index
    %c0_86 = arith.constant 0 : index
    %c0_87 = arith.constant 0 : index
    %268 = vector.load %arg12[%267, %c0_86, %c0_87] : memref<8x2x32xf32, #tpu.memory_space<vmem>>, vector<1x2x32xf32>
    %269 = vector.shape_cast %268 : vector<1x2x32xf32> to vector<2x32xf32>
    %270 = vector.shape_cast %265 : vector<2x32xf32> to vector<1x2x32xf32>
    tpu.vector_store %arg12[%267, %c0_86, %c0_87], %270 {strides = array<i32>} : memref<8x2x32xf32, #tpu.memory_space<vmem>>, vector<1x2x32xf32>,
    %c7_i32 = arith.constant 7 : i32
    %271 = arith.index_cast %c7_i32 : i32 to index
    %c0_88 = arith.constant 0 : index
    %c0_89 = arith.constant 0 : index
    %272 = vector.load %arg11[%271, %c0_88, %c0_89] : memref<8x2x128xf32, #tpu.memory_space<vmem>>, vector<1x2x128xf32>
    %273 = vector.shape_cast %272 : vector<1x2x128xf32> to vector<2x128xf32>
    %274 = arith.truncf %265 : vector<2x32xf32> to vector<2x32xbf16>
    %c0_90 = arith.constant 0 : index
    %c0_91 = arith.constant 0 : index
    %275 = vector.load %arg3[%c0_90, %c0_91] : memref<32x128xbf16, #tpu.memory_space<vmem>>, vector<32x128xbf16>
    %cst_92 = arith.constant dense<0.000000e+00> : vector<2x128xf32>
    %276 = tpu.matmul %274, %275, %cst_92 {dimension_numbers = #tpu.dot_dimension_numbers<[1], [0], [0], [1], [0, 0, 1, 1], [], []>} : vector<2x32xbf16>, vector<32x128xbf16>, vector<2x128xf32> -> vector<2x128xf32>
    %277 = arith.addf %273, %276 : vector<2x128xf32>
    %278 = vector.extract_strided_slice %277 {offsets = [0, 0], sizes = [2, 32], strides = [1, 1]} : vector<2x128xf32> to vector<2x32xf32>
    %279 = arith.negf %278 : vector<2x32xf32>
    %280 = math.exp %279 : vector<2x32xf32>
    %cst_93 = arith.constant 1.000000e+00 : f32
    %281 = vector.broadcast %cst_93 : f32 to vector<2x32xf32>
    %282 = arith.addf %281, %280 : vector<2x32xf32>
    %283 = arith.divf %281, %282 : vector<2x32xf32>
    %284 = vector.extract_strided_slice %277 {offsets = [0, 32], sizes = [2, 32], strides = [1, 1]} : vector<2x128xf32> to vector<2x32xf32>
    %285 = arith.negf %284 : vector<2x32xf32>
    %286 = math.exp %285 : vector<2x32xf32>
    %cst_94 = arith.constant 1.000000e+00 : f32
    %287 = vector.broadcast %cst_94 : f32 to vector<2x32xf32>
    %288 = arith.addf %287, %286 : vector<2x32xf32>
    %289 = arith.divf %287, %288 : vector<2x32xf32>
    %290 = vector.extract_strided_slice %277 {offsets = [0, 64], sizes = [2, 32], strides = [1, 1]} : vector<2x128xf32> to vector<2x32xf32>
    %291 = math.tanh %290 : vector<2x32xf32>
    %292 = vector.extract_strided_slice %277 {offsets = [0, 96], sizes = [2, 32], strides = [1, 1]} : vector<2x128xf32> to vector<2x32xf32>
    %293 = arith.negf %292 : vector<2x32xf32>
    %294 = math.exp %293 : vector<2x32xf32>
    %cst_95 = arith.constant 1.000000e+00 : f32
    %295 = vector.broadcast %cst_95 : f32 to vector<2x32xf32>
    %296 = arith.addf %295, %294 : vector<2x32xf32>
    %297 = arith.divf %295, %296 : vector<2x32xf32>
    %298 = arith.mulf %289, %263 : vector<2x32xf32>
    %299 = arith.mulf %283, %291 : vector<2x32xf32>
    %300 = arith.addf %298, %299 : vector<2x32xf32>
    %301 = math.tanh %300 : vector<2x32xf32>
    %302 = arith.mulf %297, %301 : vector<2x32xf32>
    %c0_i32_96 = arith.constant 0 : i32
    %303 = arith.addi %c0_i32_96, %c7_i32 : i32
    %304 = arith.index_cast %303 : i32 to index
    %c0_97 = arith.constant 0 : index
    %c0_98 = arith.constant 0 : index
    %305 = vector.load %arg12[%304, %c0_97, %c0_98] : memref<8x2x32xf32, #tpu.memory_space<vmem>>, vector<1x2x32xf32>
    %306 = vector.shape_cast %305 : vector<1x2x32xf32> to vector<2x32xf32>
    %307 = vector.shape_cast %302 : vector<2x32xf32> to vector<1x2x32xf32>
    tpu.vector_store %arg12[%304, %c0_97, %c0_98], %307 {strides = array<i32>} : memref<8x2x32xf32, #tpu.memory_space<vmem>>, vector<1x2x32xf32>,
    %c8_i32 = arith.constant 8 : i32
    %cst_99 = arith.constant 0.000000e+00 : f32
    %308 = vector.broadcast %cst_99 : f32 to vector<2x32xf32>
    %cst_100 = arith.constant 0.000000e+00 : f32
    %309 = vector.broadcast %cst_100 : f32 to vector<2x32xf32>
    %c0_101 = arith.constant 0 : index
    %c0_102 = arith.constant 0 : index
    %c0_103 = arith.constant 0 : index
    %310 = vector.load %arg12[%c0_101, %c0_102, %c0_103] : memref<8x2x32xf32, #tpu.memory_space<vmem>>, vector<8x2x32xf32>
    %311 = vector.shape_cast %310 : vector<8x2x32xf32> to vector<16x32xf32>
    %312 = arith.truncf %311 : vector<16x32xf32> to vector<16x32xbf16>
    %c0_104 = arith.constant 0 : index
    %c0_105 = arith.constant 0 : index
    %313 = vector.load %arg5[%c0_104, %c0_105] : memref<32x128xbf16, #tpu.memory_space<vmem>>, vector<32x128xbf16>
    %cst_106 = arith.constant dense<0.000000e+00> : vector<16x128xf32>
    %314 = tpu.matmul %312, %313, %cst_106 {dimension_numbers = #tpu.dot_dimension_numbers<[1], [0], [0], [1], [0, 0, 1, 1], [], []>} : vector<16x32xbf16>, vector<32x128xbf16>, vector<16x128xf32> -> vector<16x128xf32>
    %c0_107 = arith.constant 0 : index
    %c0_108 = arith.constant 0 : index
    %315 = vector.load %arg7[%c0_107, %c0_108] : memref<1x128xf32, #tpu.memory_space<vmem>>, vector<1x128xf32>
    %316 = vector.broadcast %315 : vector<1x128xf32> to vector<16x128xf32>
    %317 = arith.addf %314, %316 : vector<16x128xf32>
    %318 = vector.shape_cast %317 : vector<16x128xf32> to vector<8x2x128xf32>
    %c0_109 = arith.constant 0 : index
    %c0_110 = arith.constant 0 : index
    %c0_111 = arith.constant 0 : index
    %319 = vector.load %arg11[%c0_109, %c0_110, %c0_111] : memref<8x2x128xf32, #tpu.memory_space<vmem>>, vector<8x2x128xf32>
    tpu.vector_store %arg11[%c0_109, %c0_110, %c0_111], %318 {strides = array<i32>} : memref<8x2x128xf32, #tpu.memory_space<vmem>>, vector<8x2x128xf32>,
    %c0_i32_112 = arith.constant 0 : i32
    %320 = arith.index_cast %c0_i32_112 : i32 to index
    %c0_113 = arith.constant 0 : index
    %c0_114 = arith.constant 0 : index
    %321 = vector.load %arg11[%320, %c0_113, %c0_114] : memref<8x2x128xf32, #tpu.memory_space<vmem>>, vector<1x2x128xf32>
    %322 = vector.shape_cast %321 : vector<1x2x128xf32> to vector<2x128xf32>
    %323 = arith.truncf %308 : vector<2x32xf32> to vector<2x32xbf16>
    %c0_115 = arith.constant 0 : index
    %c0_116 = arith.constant 0 : index
    %324 = vector.load %arg6[%c0_115, %c0_116] : memref<32x128xbf16, #tpu.memory_space<vmem>>, vector<32x128xbf16>
    %cst_117 = arith.constant dense<0.000000e+00> : vector<2x128xf32>
    %325 = tpu.matmul %323, %324, %cst_117 {dimension_numbers = #tpu.dot_dimension_numbers<[1], [0], [0], [1], [0, 0, 1, 1], [], []>} : vector<2x32xbf16>, vector<32x128xbf16>, vector<2x128xf32> -> vector<2x128xf32>
    %326 = arith.addf %322, %325 : vector<2x128xf32>
    %327 = vector.extract_strided_slice %326 {offsets = [0, 0], sizes = [2, 32], strides = [1, 1]} : vector<2x128xf32> to vector<2x32xf32>
    %328 = arith.negf %327 : vector<2x32xf32>
    %329 = math.exp %328 : vector<2x32xf32>
    %cst_118 = arith.constant 1.000000e+00 : f32
    %330 = vector.broadcast %cst_118 : f32 to vector<2x32xf32>
    %331 = arith.addf %330, %329 : vector<2x32xf32>
    %332 = arith.divf %330, %331 : vector<2x32xf32>
    %333 = vector.extract_strided_slice %326 {offsets = [0, 32], sizes = [2, 32], strides = [1, 1]} : vector<2x128xf32> to vector<2x32xf32>
    %334 = arith.negf %333 : vector<2x32xf32>
    %335 = math.exp %334 : vector<2x32xf32>
    %cst_119 = arith.constant 1.000000e+00 : f32
    %336 = vector.broadcast %cst_119 : f32 to vector<2x32xf32>
    %337 = arith.addf %336, %335 : vector<2x32xf32>
    %338 = arith.divf %336, %337 : vector<2x32xf32>
    %339 = vector.extract_strided_slice %326 {offsets = [0, 64], sizes = [2, 32], strides = [1, 1]} : vector<2x128xf32> to vector<2x32xf32>
    %340 = math.tanh %339 : vector<2x32xf32>
    %341 = vector.extract_strided_slice %326 {offsets = [0, 96], sizes = [2, 32], strides = [1, 1]} : vector<2x128xf32> to vector<2x32xf32>
    %342 = arith.negf %341 : vector<2x32xf32>
    %343 = math.exp %342 : vector<2x32xf32>
    %cst_120 = arith.constant 1.000000e+00 : f32
    %344 = vector.broadcast %cst_120 : f32 to vector<2x32xf32>
    %345 = arith.addf %344, %343 : vector<2x32xf32>
    %346 = arith.divf %344, %345 : vector<2x32xf32>
    %347 = arith.mulf %338, %309 : vector<2x32xf32>
    %348 = arith.mulf %332, %340 : vector<2x32xf32>
    %349 = arith.addf %347, %348 : vector<2x32xf32>
    %350 = math.tanh %349 : vector<2x32xf32>
    %351 = arith.mulf %346, %350 : vector<2x32xf32>
    %c1_i32_121 = arith.constant 1 : i32
    %352 = arith.index_cast %c1_i32_121 : i32 to index
    %c0_122 = arith.constant 0 : index
    %c0_123 = arith.constant 0 : index
    %353 = vector.load %arg11[%352, %c0_122, %c0_123] : memref<8x2x128xf32, #tpu.memory_space<vmem>>, vector<1x2x128xf32>
    %354 = vector.shape_cast %353 : vector<1x2x128xf32> to vector<2x128xf32>
    %355 = arith.truncf %351 : vector<2x32xf32> to vector<2x32xbf16>
    %c0_124 = arith.constant 0 : index
    %c0_125 = arith.constant 0 : index
    %356 = vector.load %arg6[%c0_124, %c0_125] : memref<32x128xbf16, #tpu.memory_space<vmem>>, vector<32x128xbf16>
    %cst_126 = arith.constant dense<0.000000e+00> : vector<2x128xf32>
    %357 = tpu.matmul %355, %356, %cst_126 {dimension_numbers = #tpu.dot_dimension_numbers<[1], [0], [0], [1], [0, 0, 1, 1], [], []>} : vector<2x32xbf16>, vector<32x128xbf16>, vector<2x128xf32> -> vector<2x128xf32>
    %358 = arith.addf %354, %357 : vector<2x128xf32>
    %359 = vector.extract_strided_slice %358 {offsets = [0, 0], sizes = [2, 32], strides = [1, 1]} : vector<2x128xf32> to vector<2x32xf32>
    %360 = arith.negf %359 : vector<2x32xf32>
    %361 = math.exp %360 : vector<2x32xf32>
    %cst_127 = arith.constant 1.000000e+00 : f32
    %362 = vector.broadcast %cst_127 : f32 to vector<2x32xf32>
    %363 = arith.addf %362, %361 : vector<2x32xf32>
    %364 = arith.divf %362, %363 : vector<2x32xf32>
    %365 = vector.extract_strided_slice %358 {offsets = [0, 32], sizes = [2, 32], strides = [1, 1]} : vector<2x128xf32> to vector<2x32xf32>
    %366 = arith.negf %365 : vector<2x32xf32>
    %367 = math.exp %366 : vector<2x32xf32>
    %cst_128 = arith.constant 1.000000e+00 : f32
    %368 = vector.broadcast %cst_128 : f32 to vector<2x32xf32>
    %369 = arith.addf %368, %367 : vector<2x32xf32>
    %370 = arith.divf %368, %369 : vector<2x32xf32>
    %371 = vector.extract_strided_slice %358 {offsets = [0, 64], sizes = [2, 32], strides = [1, 1]} : vector<2x128xf32> to vector<2x32xf32>
    %372 = math.tanh %371 : vector<2x32xf32>
    %373 = vector.extract_strided_slice %358 {offsets = [0, 96], sizes = [2, 32], strides = [1, 1]} : vector<2x128xf32> to vector<2x32xf32>
    %374 = arith.negf %373 : vector<2x32xf32>
    %375 = math.exp %374 : vector<2x32xf32>
    %cst_129 = arith.constant 1.000000e+00 : f32
    %376 = vector.broadcast %cst_129 : f32 to vector<2x32xf32>
    %377 = arith.addf %376, %375 : vector<2x32xf32>
    %378 = arith.divf %376, %377 : vector<2x32xf32>
    %379 = arith.mulf %370, %349 : vector<2x32xf32>
    %380 = arith.mulf %364, %372 : vector<2x32xf32>
    %381 = arith.addf %379, %380 : vector<2x32xf32>
    %382 = math.tanh %381 : vector<2x32xf32>
    %383 = arith.mulf %378, %382 : vector<2x32xf32>
    %c2_i32_130 = arith.constant 2 : i32
    %384 = arith.index_cast %c2_i32_130 : i32 to index
    %c0_131 = arith.constant 0 : index
    %c0_132 = arith.constant 0 : index
    %385 = vector.load %arg11[%384, %c0_131, %c0_132] : memref<8x2x128xf32, #tpu.memory_space<vmem>>, vector<1x2x128xf32>
    %386 = vector.shape_cast %385 : vector<1x2x128xf32> to vector<2x128xf32>
    %387 = arith.truncf %383 : vector<2x32xf32> to vector<2x32xbf16>
    %c0_133 = arith.constant 0 : index
    %c0_134 = arith.constant 0 : index
    %388 = vector.load %arg6[%c0_133, %c0_134] : memref<32x128xbf16, #tpu.memory_space<vmem>>, vector<32x128xbf16>
    %cst_135 = arith.constant dense<0.000000e+00> : vector<2x128xf32>
    %389 = tpu.matmul %387, %388, %cst_135 {dimension_numbers = #tpu.dot_dimension_numbers<[1], [0], [0], [1], [0, 0, 1, 1], [], []>} : vector<2x32xbf16>, vector<32x128xbf16>, vector<2x128xf32> -> vector<2x128xf32>
    %390 = arith.addf %386, %389 : vector<2x128xf32>
    %391 = vector.extract_strided_slice %390 {offsets = [0, 0], sizes = [2, 32], strides = [1, 1]} : vector<2x128xf32> to vector<2x32xf32>
    %392 = arith.negf %391 : vector<2x32xf32>
    %393 = math.exp %392 : vector<2x32xf32>
    %cst_136 = arith.constant 1.000000e+00 : f32
    %394 = vector.broadcast %cst_136 : f32 to vector<2x32xf32>
    %395 = arith.addf %394, %393 : vector<2x32xf32>
    %396 = arith.divf %394, %395 : vector<2x32xf32>
    %397 = vector.extract_strided_slice %390 {offsets = [0, 32], sizes = [2, 32], strides = [1, 1]} : vector<2x128xf32> to vector<2x32xf32>
    %398 = arith.negf %397 : vector<2x32xf32>
    %399 = math.exp %398 : vector<2x32xf32>
    %cst_137 = arith.constant 1.000000e+00 : f32
    %400 = vector.broadcast %cst_137 : f32 to vector<2x32xf32>
    %401 = arith.addf %400, %399 : vector<2x32xf32>
    %402 = arith.divf %400, %401 : vector<2x32xf32>
    %403 = vector.extract_strided_slice %390 {offsets = [0, 64], sizes = [2, 32], strides = [1, 1]} : vector<2x128xf32> to vector<2x32xf32>
    %404 = math.tanh %403 : vector<2x32xf32>
    %405 = vector.extract_strided_slice %390 {offsets = [0, 96], sizes = [2, 32], strides = [1, 1]} : vector<2x128xf32> to vector<2x32xf32>
    %406 = arith.negf %405 : vector<2x32xf32>
    %407 = math.exp %406 : vector<2x32xf32>
    %cst_138 = arith.constant 1.000000e+00 : f32
    %408 = vector.broadcast %cst_138 : f32 to vector<2x32xf32>
    %409 = arith.addf %408, %407 : vector<2x32xf32>
    %410 = arith.divf %408, %409 : vector<2x32xf32>
    %411 = arith.mulf %402, %381 : vector<2x32xf32>
    %412 = arith.mulf %396, %404 : vector<2x32xf32>
    %413 = arith.addf %411, %412 : vector<2x32xf32>
    %414 = math.tanh %413 : vector<2x32xf32>
    %415 = arith.mulf %410, %414 : vector<2x32xf32>
    %c3_i32_139 = arith.constant 3 : i32
    %416 = arith.index_cast %c3_i32_139 : i32 to index
    %c0_140 = arith.constant 0 : index
    %c0_141 = arith.constant 0 : index
    %417 = vector.load %arg11[%416, %c0_140, %c0_141] : memref<8x2x128xf32, #tpu.memory_space<vmem>>, vector<1x2x128xf32>
    %418 = vector.shape_cast %417 : vector<1x2x128xf32> to vector<2x128xf32>
    %419 = arith.truncf %415 : vector<2x32xf32> to vector<2x32xbf16>
    %c0_142 = arith.constant 0 : index
    %c0_143 = arith.constant 0 : index
    %420 = vector.load %arg6[%c0_142, %c0_143] : memref<32x128xbf16, #tpu.memory_space<vmem>>, vector<32x128xbf16>
    %cst_144 = arith.constant dense<0.000000e+00> : vector<2x128xf32>
    %421 = tpu.matmul %419, %420, %cst_144 {dimension_numbers = #tpu.dot_dimension_numbers<[1], [0], [0], [1], [0, 0, 1, 1], [], []>} : vector<2x32xbf16>, vector<32x128xbf16>, vector<2x128xf32> -> vector<2x128xf32>
    %422 = arith.addf %418, %421 : vector<2x128xf32>
    %423 = vector.extract_strided_slice %422 {offsets = [0, 0], sizes = [2, 32], strides = [1, 1]} : vector<2x128xf32> to vector<2x32xf32>
    %424 = arith.negf %423 : vector<2x32xf32>
    %425 = math.exp %424 : vector<2x32xf32>
    %cst_145 = arith.constant 1.000000e+00 : f32
    %426 = vector.broadcast %cst_145 : f32 to vector<2x32xf32>
    %427 = arith.addf %426, %425 : vector<2x32xf32>
    %428 = arith.divf %426, %427 : vector<2x32xf32>
    %429 = vector.extract_strided_slice %422 {offsets = [0, 32], sizes = [2, 32], strides = [1, 1]} : vector<2x128xf32> to vector<2x32xf32>
    %430 = arith.negf %429 : vector<2x32xf32>
    %431 = math.exp %430 : vector<2x32xf32>
    %cst_146 = arith.constant 1.000000e+00 : f32
    %432 = vector.broadcast %cst_146 : f32 to vector<2x32xf32>
    %433 = arith.addf %432, %431 : vector<2x32xf32>
    %434 = arith.divf %432, %433 : vector<2x32xf32>
    %435 = vector.extract_strided_slice %422 {offsets = [0, 64], sizes = [2, 32], strides = [1, 1]} : vector<2x128xf32> to vector<2x32xf32>
    %436 = math.tanh %435 : vector<2x32xf32>
    %437 = vector.extract_strided_slice %422 {offsets = [0, 96], sizes = [2, 32], strides = [1, 1]} : vector<2x128xf32> to vector<2x32xf32>
    %438 = arith.negf %437 : vector<2x32xf32>
    %439 = math.exp %438 : vector<2x32xf32>
    %cst_147 = arith.constant 1.000000e+00 : f32
    %440 = vector.broadcast %cst_147 : f32 to vector<2x32xf32>
    %441 = arith.addf %440, %439 : vector<2x32xf32>
    %442 = arith.divf %440, %441 : vector<2x32xf32>
    %443 = arith.mulf %434, %413 : vector<2x32xf32>
    %444 = arith.mulf %428, %436 : vector<2x32xf32>
    %445 = arith.addf %443, %444 : vector<2x32xf32>
    %446 = math.tanh %445 : vector<2x32xf32>
    %447 = arith.mulf %442, %446 : vector<2x32xf32>
    %c4_i32_148 = arith.constant 4 : i32
    %448 = arith.index_cast %c4_i32_148 : i32 to index
    %c0_149 = arith.constant 0 : index
    %c0_150 = arith.constant 0 : index
    %449 = vector.load %arg11[%448, %c0_149, %c0_150] : memref<8x2x128xf32, #tpu.memory_space<vmem>>, vector<1x2x128xf32>
    %450 = vector.shape_cast %449 : vector<1x2x128xf32> to vector<2x128xf32>
    %451 = arith.truncf %447 : vector<2x32xf32> to vector<2x32xbf16>
    %c0_151 = arith.constant 0 : index
    %c0_152 = arith.constant 0 : index
    %452 = vector.load %arg6[%c0_151, %c0_152] : memref<32x128xbf16, #tpu.memory_space<vmem>>, vector<32x128xbf16>
    %cst_153 = arith.constant dense<0.000000e+00> : vector<2x128xf32>
    %453 = tpu.matmul %451, %452, %cst_153 {dimension_numbers = #tpu.dot_dimension_numbers<[1], [0], [0], [1], [0, 0, 1, 1], [], []>} : vector<2x32xbf16>, vector<32x128xbf16>, vector<2x128xf32> -> vector<2x128xf32>
    %454 = arith.addf %450, %453 : vector<2x128xf32>
    %455 = vector.extract_strided_slice %454 {offsets = [0, 0], sizes = [2, 32], strides = [1, 1]} : vector<2x128xf32> to vector<2x32xf32>
    %456 = arith.negf %455 : vector<2x32xf32>
    %457 = math.exp %456 : vector<2x32xf32>
    %cst_154 = arith.constant 1.000000e+00 : f32
    %458 = vector.broadcast %cst_154 : f32 to vector<2x32xf32>
    %459 = arith.addf %458, %457 : vector<2x32xf32>
    %460 = arith.divf %458, %459 : vector<2x32xf32>
    %461 = vector.extract_strided_slice %454 {offsets = [0, 32], sizes = [2, 32], strides = [1, 1]} : vector<2x128xf32> to vector<2x32xf32>
    %462 = arith.negf %461 : vector<2x32xf32>
    %463 = math.exp %462 : vector<2x32xf32>
    %cst_155 = arith.constant 1.000000e+00 : f32
    %464 = vector.broadcast %cst_155 : f32 to vector<2x32xf32>
    %465 = arith.addf %464, %463 : vector<2x32xf32>
    %466 = arith.divf %464, %465 : vector<2x32xf32>
    %467 = vector.extract_strided_slice %454 {offsets = [0, 64], sizes = [2, 32], strides = [1, 1]} : vector<2x128xf32> to vector<2x32xf32>
    %468 = math.tanh %467 : vector<2x32xf32>
    %469 = vector.extract_strided_slice %454 {offsets = [0, 96], sizes = [2, 32], strides = [1, 1]} : vector<2x128xf32> to vector<2x32xf32>
    %470 = arith.negf %469 : vector<2x32xf32>
    %471 = math.exp %470 : vector<2x32xf32>
    %cst_156 = arith.constant 1.000000e+00 : f32
    %472 = vector.broadcast %cst_156 : f32 to vector<2x32xf32>
    %473 = arith.addf %472, %471 : vector<2x32xf32>
    %474 = arith.divf %472, %473 : vector<2x32xf32>
    %475 = arith.mulf %466, %445 : vector<2x32xf32>
    %476 = arith.mulf %460, %468 : vector<2x32xf32>
    %477 = arith.addf %475, %476 : vector<2x32xf32>
    %478 = math.tanh %477 : vector<2x32xf32>
    %479 = arith.mulf %474, %478 : vector<2x32xf32>
    %c5_i32_157 = arith.constant 5 : i32
    %480 = arith.index_cast %c5_i32_157 : i32 to index
    %c0_158 = arith.constant 0 : index
    %c0_159 = arith.constant 0 : index
    %481 = vector.load %arg11[%480, %c0_158, %c0_159] : memref<8x2x128xf32, #tpu.memory_space<vmem>>, vector<1x2x128xf32>
    %482 = vector.shape_cast %481 : vector<1x2x128xf32> to vector<2x128xf32>
    %483 = arith.truncf %479 : vector<2x32xf32> to vector<2x32xbf16>
    %c0_160 = arith.constant 0 : index
    %c0_161 = arith.constant 0 : index
    %484 = vector.load %arg6[%c0_160, %c0_161] : memref<32x128xbf16, #tpu.memory_space<vmem>>, vector<32x128xbf16>
    %cst_162 = arith.constant dense<0.000000e+00> : vector<2x128xf32>
    %485 = tpu.matmul %483, %484, %cst_162 {dimension_numbers = #tpu.dot_dimension_numbers<[1], [0], [0], [1], [0, 0, 1, 1], [], []>} : vector<2x32xbf16>, vector<32x128xbf16>, vector<2x128xf32> -> vector<2x128xf32>
    %486 = arith.addf %482, %485 : vector<2x128xf32>
    %487 = vector.extract_strided_slice %486 {offsets = [0, 0], sizes = [2, 32], strides = [1, 1]} : vector<2x128xf32> to vector<2x32xf32>
    %488 = arith.negf %487 : vector<2x32xf32>
    %489 = math.exp %488 : vector<2x32xf32>
    %cst_163 = arith.constant 1.000000e+00 : f32
    %490 = vector.broadcast %cst_163 : f32 to vector<2x32xf32>
    %491 = arith.addf %490, %489 : vector<2x32xf32>
    %492 = arith.divf %490, %491 : vector<2x32xf32>
    %493 = vector.extract_strided_slice %486 {offsets = [0, 32], sizes = [2, 32], strides = [1, 1]} : vector<2x128xf32> to vector<2x32xf32>
    %494 = arith.negf %493 : vector<2x32xf32>
    %495 = math.exp %494 : vector<2x32xf32>
    %cst_164 = arith.constant 1.000000e+00 : f32
    %496 = vector.broadcast %cst_164 : f32 to vector<2x32xf32>
    %497 = arith.addf %496, %495 : vector<2x32xf32>
    %498 = arith.divf %496, %497 : vector<2x32xf32>
    %499 = vector.extract_strided_slice %486 {offsets = [0, 64], sizes = [2, 32], strides = [1, 1]} : vector<2x128xf32> to vector<2x32xf32>
    %500 = math.tanh %499 : vector<2x32xf32>
    %501 = vector.extract_strided_slice %486 {offsets = [0, 96], sizes = [2, 32], strides = [1, 1]} : vector<2x128xf32> to vector<2x32xf32>
    %502 = arith.negf %501 : vector<2x32xf32>
    %503 = math.exp %502 : vector<2x32xf32>
    %cst_165 = arith.constant 1.000000e+00 : f32
    %504 = vector.broadcast %cst_165 : f32 to vector<2x32xf32>
    %505 = arith.addf %504, %503 : vector<2x32xf32>
    %506 = arith.divf %504, %505 : vector<2x32xf32>
    %507 = arith.mulf %498, %477 : vector<2x32xf32>
    %508 = arith.mulf %492, %500 : vector<2x32xf32>
    %509 = arith.addf %507, %508 : vector<2x32xf32>
    %510 = math.tanh %509 : vector<2x32xf32>
    %511 = arith.mulf %506, %510 : vector<2x32xf32>
    %c6_i32_166 = arith.constant 6 : i32
    %512 = arith.index_cast %c6_i32_166 : i32 to index
    %c0_167 = arith.constant 0 : index
    %c0_168 = arith.constant 0 : index
    %513 = vector.load %arg11[%512, %c0_167, %c0_168] : memref<8x2x128xf32, #tpu.memory_space<vmem>>, vector<1x2x128xf32>
    %514 = vector.shape_cast %513 : vector<1x2x128xf32> to vector<2x128xf32>
    %515 = arith.truncf %511 : vector<2x32xf32> to vector<2x32xbf16>
    %c0_169 = arith.constant 0 : index
    %c0_170 = arith.constant 0 : index
    %516 = vector.load %arg6[%c0_169, %c0_170] : memref<32x128xbf16, #tpu.memory_space<vmem>>, vector<32x128xbf16>
    %cst_171 = arith.constant dense<0.000000e+00> : vector<2x128xf32>
    %517 = tpu.matmul %515, %516, %cst_171 {dimension_numbers = #tpu.dot_dimension_numbers<[1], [0], [0], [1], [0, 0, 1, 1], [], []>} : vector<2x32xbf16>, vector<32x128xbf16>, vector<2x128xf32> -> vector<2x128xf32>
    %518 = arith.addf %514, %517 : vector<2x128xf32>
    %519 = vector.extract_strided_slice %518 {offsets = [0, 0], sizes = [2, 32], strides = [1, 1]} : vector<2x128xf32> to vector<2x32xf32>
    %520 = arith.negf %519 : vector<2x32xf32>
    %521 = math.exp %520 : vector<2x32xf32>
    %cst_172 = arith.constant 1.000000e+00 : f32
    %522 = vector.broadcast %cst_172 : f32 to vector<2x32xf32>
    %523 = arith.addf %522, %521 : vector<2x32xf32>
    %524 = arith.divf %522, %523 : vector<2x32xf32>
    %525 = vector.extract_strided_slice %518 {offsets = [0, 32], sizes = [2, 32], strides = [1, 1]} : vector<2x128xf32> to vector<2x32xf32>
    %526 = arith.negf %525 : vector<2x32xf32>
    %527 = math.exp %526 : vector<2x32xf32>
    %cst_173 = arith.constant 1.000000e+00 : f32
    %528 = vector.broadcast %cst_173 : f32 to vector<2x32xf32>
    %529 = arith.addf %528, %527 : vector<2x32xf32>
    %530 = arith.divf %528, %529 : vector<2x32xf32>
    %531 = vector.extract_strided_slice %518 {offsets = [0, 64], sizes = [2, 32], strides = [1, 1]} : vector<2x128xf32> to vector<2x32xf32>
    %532 = math.tanh %531 : vector<2x32xf32>
    %533 = vector.extract_strided_slice %518 {offsets = [0, 96], sizes = [2, 32], strides = [1, 1]} : vector<2x128xf32> to vector<2x32xf32>
    %534 = arith.negf %533 : vector<2x32xf32>
    %535 = math.exp %534 : vector<2x32xf32>
    %cst_174 = arith.constant 1.000000e+00 : f32
    %536 = vector.broadcast %cst_174 : f32 to vector<2x32xf32>
    %537 = arith.addf %536, %535 : vector<2x32xf32>
    %538 = arith.divf %536, %537 : vector<2x32xf32>
    %539 = arith.mulf %530, %509 : vector<2x32xf32>
    %540 = arith.mulf %524, %532 : vector<2x32xf32>
    %541 = arith.addf %539, %540 : vector<2x32xf32>
    %542 = math.tanh %541 : vector<2x32xf32>
    %543 = arith.mulf %538, %542 : vector<2x32xf32>
    %c7_i32_175 = arith.constant 7 : i32
    %544 = arith.index_cast %c7_i32_175 : i32 to index
    %c0_176 = arith.constant 0 : index
    %c0_177 = arith.constant 0 : index
    %545 = vector.load %arg11[%544, %c0_176, %c0_177] : memref<8x2x128xf32, #tpu.memory_space<vmem>>, vector<1x2x128xf32>
    %546 = vector.shape_cast %545 : vector<1x2x128xf32> to vector<2x128xf32>
    %547 = arith.truncf %543 : vector<2x32xf32> to vector<2x32xbf16>
    %c0_178 = arith.constant 0 : index
    %c0_179 = arith.constant 0 : index
    %548 = vector.load %arg6[%c0_178, %c0_179] : memref<32x128xbf16, #tpu.memory_space<vmem>>, vector<32x128xbf16>
    %cst_180 = arith.constant dense<0.000000e+00> : vector<2x128xf32>
    %549 = tpu.matmul %547, %548, %cst_180 {dimension_numbers = #tpu.dot_dimension_numbers<[1], [0], [0], [1], [0, 0, 1, 1], [], []>} : vector<2x32xbf16>, vector<32x128xbf16>, vector<2x128xf32> -> vector<2x128xf32>
    %550 = arith.addf %546, %549 : vector<2x128xf32>
    %551 = vector.extract_strided_slice %550 {offsets = [0, 0], sizes = [2, 32], strides = [1, 1]} : vector<2x128xf32> to vector<2x32xf32>
    %552 = arith.negf %551 : vector<2x32xf32>
    %553 = math.exp %552 : vector<2x32xf32>
    %cst_181 = arith.constant 1.000000e+00 : f32
    %554 = vector.broadcast %cst_181 : f32 to vector<2x32xf32>
    %555 = arith.addf %554, %553 : vector<2x32xf32>
    %556 = arith.divf %554, %555 : vector<2x32xf32>
    %557 = vector.extract_strided_slice %550 {offsets = [0, 32], sizes = [2, 32], strides = [1, 1]} : vector<2x128xf32> to vector<2x32xf32>
    %558 = arith.negf %557 : vector<2x32xf32>
    %559 = math.exp %558 : vector<2x32xf32>
    %cst_182 = arith.constant 1.000000e+00 : f32
    %560 = vector.broadcast %cst_182 : f32 to vector<2x32xf32>
    %561 = arith.addf %560, %559 : vector<2x32xf32>
    %562 = arith.divf %560, %561 : vector<2x32xf32>
    %563 = vector.extract_strided_slice %550 {offsets = [0, 64], sizes = [2, 32], strides = [1, 1]} : vector<2x128xf32> to vector<2x32xf32>
    %564 = math.tanh %563 : vector<2x32xf32>
    %565 = vector.extract_strided_slice %550 {offsets = [0, 96], sizes = [2, 32], strides = [1, 1]} : vector<2x128xf32> to vector<2x32xf32>
    %566 = arith.negf %565 : vector<2x32xf32>
    %567 = math.exp %566 : vector<2x32xf32>
    %cst_183 = arith.constant 1.000000e+00 : f32
    %568 = vector.broadcast %cst_183 : f32 to vector<2x32xf32>
    %569 = arith.addf %568, %567 : vector<2x32xf32>
    %570 = arith.divf %568, %569 : vector<2x32xf32>
    %571 = arith.mulf %562, %541 : vector<2x32xf32>
    %572 = arith.mulf %556, %564 : vector<2x32xf32>
    %573 = arith.addf %571, %572 : vector<2x32xf32>
    %574 = math.tanh %573 : vector<2x32xf32>
    %575 = arith.mulf %570, %574 : vector<2x32xf32>
    %c8_i32_184 = arith.constant 8 : i32
    %576 = arith.truncf %575 : vector<2x32xf32> to vector<2x32xbf16>
    %c0_185 = arith.constant 0 : index
    %c0_186 = arith.constant 0 : index
    %577 = vector.load %arg8[%c0_185, %c0_186] : memref<32x5xbf16, #tpu.memory_space<vmem>>, vector<32x5xbf16>
    %cst_187 = arith.constant dense<0.000000e+00> : vector<2x5xf32>
    %578 = tpu.matmul %576, %577, %cst_187 {dimension_numbers = #tpu.dot_dimension_numbers<[1], [0], [0], [1], [0, 0, 1, 1], [], []>} : vector<2x32xbf16>, vector<32x5xbf16>, vector<2x5xf32> -> vector<2x5xf32>
    %c0_188 = arith.constant 0 : index
    %c0_189 = arith.constant 0 : index
    %579 = vector.load %arg9[%c0_188, %c0_189] : memref<1x5xf32, #tpu.memory_space<vmem>>, vector<1x5xf32>
    %580 = vector.broadcast %579 : vector<1x5xf32> to vector<2x5xf32>
    %581 = arith.addf %578, %580 : vector<2x5xf32>
    %582 = tpu.iota {dimensions = array<i32: 1>} : vector<2x5xi32>
    %c4_i32_190 = arith.constant 4 : i32
    %583 = vector.broadcast %c4_i32_190 : i32 to vector<2x5xi32>
    %584 = arith.cmpi slt, %582, %583 : vector<2x5xi32>
    %cst_191 = arith.constant -1.000000e+30 : f32
    %585 = vector.broadcast %cst_191 : f32 to vector<2x5xf32>
    %586 = arith.select %584, %581, %585 : vector<2x5xi1>, vector<2x5xf32>
    %cst_192 = arith.constant dense<0xFF800000> : vector<2xf32>
    %587 = vector.multi_reduction <maximumf>, %586, %cst_192 [1] : vector<2x5xf32> to vector<2xf32>
    %588 = vector.shape_cast %587 : vector<2xf32> to vector<2x1xf32>
    %589 = vector.broadcast %588 : vector<2x1xf32> to vector<2x5xf32>
    %590 = arith.subf %586, %589 : vector<2x5xf32>
    %591 = math.exp %590 : vector<2x5xf32>
    %cst_193 = arith.constant dense<0.000000e+00> : vector<2xf32>
    %592 = vector.multi_reduction <add>, %591, %cst_193 [1] : vector<2x5xf32> to vector<2xf32>
    %593 = vector.shape_cast %592 : vector<2xf32> to vector<2x1xf32>
    %594 = tpu.reciprocal %593 {approx = true} : vector<2x1xf32> -> vector<2x1xf32>
    %595 = arith.mulf %593, %594 : vector<2x1xf32>
    %cst_194 = arith.constant 2.000000e+00 : f32
    %596 = vector.broadcast %cst_194 : f32 to vector<2x1xf32>
    %597 = arith.subf %596, %595 : vector<2x1xf32>
    %598 = arith.mulf %594, %597 : vector<2x1xf32>
    %599 = vector.broadcast %598 : vector<2x1xf32> to vector<2x5xf32>
    %600 = arith.mulf %591, %599 : vector<2x5xf32>
    %601 = arith.select %584, %600, %581 : vector<2x5xi1>, vector<2x5xf32>
    %c0_195 = arith.constant 0 : index
    %c0_196 = arith.constant 0 : index
    %602 = vector.load %arg10[%c0_195, %c0_196] : memref<2x5xf32, #tpu.memory_space<vmem>>, vector<2x5xf32>
    tpu.vector_store %arg10[%c0_195, %c0_196], %601 {strides = array<i32>} : memref<2x5xf32, #tpu.memory_space<vmem>>, vector<2x5xf32>,
    return
  }
  func.func @transform_0(%arg0: i32) -> (i32, i32, i32) {
    %c0_i32 = arith.constant 0 : i32
    %c0_i32_0 = arith.constant 0 : i32
    %c0_i32_1 = arith.constant 0 : i32
    return %c0_i32, %arg0, %c0_i32_0 : i32, i32, i32
  }
  func.func @transform_1(%arg0: i32) -> (i32, i32) {
    %c0_i32 = arith.constant 0 : i32
    %c0_i32_0 = arith.constant 0 : i32
    %c0_i32_1 = arith.constant 0 : i32
    return %c0_i32, %c0_i32_0 : i32, i32
  }
  func.func @transform_2(%arg0: i32) -> (i32, i32) {
    %c0_i32 = arith.constant 0 : i32
    %c0_i32_0 = arith.constant 0 : i32
    %c0_i32_1 = arith.constant 0 : i32
    return %c0_i32, %c0_i32_0 : i32, i32
  }
  func.func @transform_3(%arg0: i32) -> (i32, i32) {
    %c0_i32 = arith.constant 0 : i32
    %c0_i32_0 = arith.constant 0 : i32
    %c0_i32_1 = arith.constant 0 : i32
    return %c0_i32, %c0_i32_0 : i32, i32
  }
  func.func @transform_4(%arg0: i32) -> (i32, i32) {
    %c0_i32 = arith.constant 0 : i32
    %c0_i32_0 = arith.constant 0 : i32
    %c0_i32_1 = arith.constant 0 : i32
    return %c0_i32, %c0_i32_0 : i32, i32
  }
  func.func @transform_5(%arg0: i32) -> (i32, i32) {
    %c0_i32 = arith.constant 0 : i32
    %c0_i32_0 = arith.constant 0 : i32
    %c0_i32_1 = arith.constant 0 : i32
    return %c0_i32, %c0_i32_0 : i32, i32
  }
  func.func @transform_6(%arg0: i32) -> (i32, i32) {
    %c0_i32 = arith.constant 0 : i32
    %c0_i32_0 = arith.constant 0 : i32
    %c0_i32_1 = arith.constant 0 : i32
    return %c0_i32, %c0_i32_0 : i32, i32
  }
  func.func @transform_7(%arg0: i32) -> (i32, i32) {
    %c0_i32 = arith.constant 0 : i32
    %c0_i32_0 = arith.constant 0 : i32
    %c0_i32_1 = arith.constant 0 : i32
    return %c0_i32, %c0_i32_0 : i32, i32
  }
  func.func @transform_8(%arg0: i32) -> (i32, i32) {
    %c0_i32 = arith.constant 0 : i32
    %c0_i32_0 = arith.constant 0 : i32
    %c0_i32_1 = arith.constant 0 : i32
    return %c0_i32, %c0_i32_0 : i32, i32
  }
  func.func @transform_9(%arg0: i32) -> (i32, i32) {
    %c0_i32 = arith.constant 0 : i32
    %c0_i32_0 = arith.constant 0 : i32
    return %arg0, %c0_i32 : i32, i32
  }
}

</mosaic_0001>

<bundles_post_ra>
// kernel: tpu_custom_call.1
= control target key start
LH: loop header
LB: loop body
LE: loop exit
PB: predicated region body
PF: predicated region fallthrough
CT: control target
= control target key end

     0   :  { %14 = vsyncpa [#allocation5], 0  ;;  %s2826_s0 = inlined_call_operand.vmem [shape: f32[8,2,16], index: 0, kind: input, shape index: {}]   ;;  %s2827_s1 = inlined_call_operand.hbm [shape: bf16[16,128], index: 1, kind: input, shape index: {}]   ;;  %s2828_s2 = inlined_call_operand.hbm [shape: bf16[32,128], index: 2, kind: input, shape index: {}]   ;;  %s2829_s3 = inlined_call_operand.vmem [shape: f32[1,128], index: 3, kind: input, shape index: {}]   ;;  %s2830_s4 = inlined_call_operand.vmem [shape: bf16[32,128], index: 4, kind: input, shape index: {}]   ;;  %s2831_s5 = inlined_call_operand.hbm [shape: bf16[32,128], index: 5, kind: input, shape index: {}]   ;;  %s2832_s6 = inlined_call_operand.vmem [shape: f32[1,128], index: 6, kind: input, shape index: {}]   ;;  %s2833_s7 = inlined_call_operand.vmem [shape: bf16[32,5], index: 7, kind: input, shape index: {}]   ;;  %s2834_s8 = inlined_call_operand.vmem [shape: f32[1,5], index: 8, kind: input, shape index: {}]   ;;  %s2835_s9 = inlined_call_operand.hbm [shape: f32[2,5], index: 9, kind: output, shape index: {}]  }
   0x1   :  { %15 = vsyncpa [#allocation8], 0 }
   0x2   :  { %16 = vsyncpa [#allocation6], 0  ;;  %s2409_s30 = smov [#allocation7]   ;;  %s2410_s11 = smov [#allocation4]  }
   0x3   :  { %s36_s10 = sshll.u32 %s2409_s30, 4  ;;  %s24_s12 = sshll.u32 %s2410_s11, 4  ;;  %s37_s10 = int_to_ptr.vmem [resolvable:$true] %s36_s10  ;;  %s2470_s12 = int_to_ptr.vmem [resolvable:$true] %s24_s12 }
   0x4   :  { %s2315_s15 = scalar_lea.hbm %s2828_s2, 256 }
   0x5   :  { %p2316_p0 = scmp.ne.s32.totalorder %s2828_s2, %s2315_s15  ;;  %p2319_p1 = scmp.lt.u32.totalorder %s2315_s15, %s2828_s2 }
   0x7   :  { %p2321_p2 = pnand %p2319_p1, %p2316_p0 }
   0x9   :  { %2324 = shalt.err (!%p2321_p2)
}
   0xa   :  { %s2325_s20 = scalar_lea.vmem %s37_s10, 256  ;;  %p2330_p4 = scmp.lt.s32.totalorder %s37_s10, %s37_s10 }
   0xb   :  { %p2326_p3 = scmp.ne.s32.totalorder %s37_s10, %s2325_s20  ;;  %p2331_p5 = scmp.lt.s32.totalorder %s2325_s20, %s2325_s20 }
   0xd   :  { %p2332_p6 = por %p2331_p5, %p2330_p4 }
   0xf   :  { %p2333_p7 = pnand %p2332_p6, %p2326_p3 }
  0x11   :  { %2336 = shalt.err (!%p2333_p7)
}
  0x12   :  { %s2411_s21 = smov 64   ;;  %s2412_s22 = smov 4  }
  0x13   :  { %42 = dma.hbm_to_vmem [thread:$0]  %s2828_s2, 256, %s37_s10, [#allocation8], %s2411_s21, %s2411_s21, %s2412_s22  }
  0x14   :  { %s2337_s27 = scalar_lea.hbm %s2827_s1, 128 }
  0x15   :  { %p2338_p8 = scmp.ne.s32.totalorder %s2827_s1, %s2337_s27  ;;  %p2341_p9 = scmp.lt.u32.totalorder %s2337_s27, %s2827_s1 }
  0x17   :  { %p2343_p10 = pnand %p2341_p9, %p2338_p8 }
  0x19   :  { %2346 = shalt.err (!%p2343_p10)
}
  0x1a   :  { %s2347_s13 = scalar_lea.vmem %s2470_s12, 128  ;;  %p2352_p12 = scmp.lt.s32.totalorder %s2470_s12, %s2470_s12 }
  0x1b   :  { %p2348_p11 = scmp.ne.s32.totalorder %s2470_s12, %s2347_s13  ;;  %p2353_p13 = scmp.lt.s32.totalorder %s2347_s13, %s2347_s13 }
  0x1d   :  { %p2354_p0 = por %p2353_p13, %p2352_p12 }
  0x1f   :  { %p2355_p1 = pnand %p2354_p0, %p2348_p11 }
  0x21   :  { %2358 = shalt.err (!%p2355_p1)
}
  0x22   :  { %30 = dma.hbm_to_vmem [thread:$0]  %s2827_s1, 128, %s2470_s12, [#allocation5], %s2411_s21, %s2411_s21, %s2412_s22  }
  0x23   :  { %s2413_s14 = smov [#allocation9]   ;;  %s2359_s18 = scalar_lea.hbm %s2831_s5, 256 }
  0x24   :  { %s52_s15 = sshll.u32 %s2413_s14, 4  ;;  %p2360_p2 = scmp.ne.s32.totalorder %s2831_s5, %s2359_s18  ;;  %s53_s15 = int_to_ptr.vmem [resolvable:$true] %s52_s15 }
  0x25   :  { %p2363_p3 = scmp.lt.u32.totalorder %s2359_s18, %s2831_s5 }
  0x27   :  { %p2365_p4 = pnand %p2363_p3, %p2360_p2 }
  0x29   :  { %2368 = shalt.err (!%p2365_p4)
}
  0x2a   :  { %s2369_s25 = scalar_lea.vmem %s53_s15, 256  ;;  %p2374_p6 = scmp.lt.s32.totalorder %s53_s15, %s53_s15 }
  0x2b   :  { %p2370_p5 = scmp.ne.s32.totalorder %s53_s15, %s2369_s25  ;;  %p2375_p7 = scmp.lt.s32.totalorder %s2369_s25, %s2369_s25 }
  0x2d   :  { %p2376_p8 = por %p2375_p7, %p2374_p6 }
  0x2f   :  { %p2377_p9 = pnand %p2376_p8, %p2370_p5 }
  0x31   :  { %2380 = shalt.err (!%p2377_p9)
}
  0x32   :  { %58 = dma.hbm_to_vmem [thread:$0]  %s2831_s5, 256, %s53_s15, [#allocation8], %s2411_s21, %s2411_s21, %s2412_s22  }
  0x33   :  { %2403 = dma.done.wait [#allocation5], 128  }
  0x34   :  { %2404 = vsyncadd [#allocation5], 4294967168 }
  0x35   :  { %2405 = dma.done.wait [#allocation8], 512  }
  0x36   :  { %2406 = vsyncadd [#allocation8], 4294966784  ;;  %v96_v0 = vlaneseq  ;;  %v2414_v1 = vmov 0.0   ;;  %vm2415_vm0 = vmmov 0   ;;  %v2416_v2 = vmov 1983009808  }
  0x37   :  { %1999 = vmatprep.subr.bf16.mxu0 %v2414_v1  ;;  %2001 = vmatprep.mubr.msk.bf16.mxu0 %vm2415_vm0, %v2414_v1  ;;  %v94_v3 = vunpack.c.l.s4 %v2416_v2  ;;  %v2160_v6 = vld [vmem:[#allocation4] sm:$0xff]   ;;  %v79_v12 = vld [vmem:[%s2826_s0 + $0x8] sm:$0x3]  ;;  %v80_v13 = vld [vmem:[%s2826_s0 + $0xa] sm:$0x3]  ;;  %vm143_vm1 = vcmask 130048  }
  0x38   :  { %2005 = vmatprep.subr.bf16.mxu1 %v2414_v1  ;;  %2009 = vmatprep.mubr.msk.bf16.mxu1 %vm2415_vm0, %v2414_v1  ;;  %v97_v5 = vshrl.u32 %v96_v0, 7  ;;  %v75_v8 = vld [vmem:[%s2826_s0] sm:$0x3]  ;;  %v76_v9 = vld [vmem:[%s2826_s0 + $0x2] sm:$0x3]  ;;  %v108_v18 = vcombine.low %v79_v12, %v80_v13  ;;  %v2161_v21 = vld [vmem:[#allocation7] sm:$0xff]  }
  0x39   :  { %v95_v4 = vunpack.c.0.s8 %v94_v3  ;;  %v77_v10 = vld [vmem:[%s2826_s0 + $0x4] sm:$0x3]  ;;  %2000 = vmatpush3.bf16.msra.mxu0 %v2160_v6  ;;  %v78_v11 = vld [vmem:[%s2826_s0 + $0x6] sm:$0x3]  ;;  %v91_v14 = vcombine.low %v75_v8, %v76_v9  ;;  %v81_v15 = vld [vmem:[%s2826_s0 + $0xc] sm:$0x3]  ;;  %2006 = vmatpush3.bf16.msra.mxu1 %v2161_v21 }
  0x3a   :  { %v82_v16 = vld [vmem:[%s2826_s0 + $0xe] sm:$0x3]  ;;  %v92_v17 = vcombine.low %v77_v10, %v78_v11  ;;  %2013 = vmatprep.subr.bf16.mxu0 %v2414_v1  ;;  %v2162_v24 = vld [vmem:[#allocation7 + $0x8] sm:$0xff]   ;;  %2007 = vmatprep.subr.bf16.mxu1 %v2414_v1  ;;  %v2417_v29 = vmov 0   ;;  %v1876_v30 = vld [vmem:[%s2829_s3] ss:$0 sm:$0xff] }
  0x3b   :  { %v2529_v7 = vsub.s32 %v95_v4, %v97_v5  ;;  %v109_v20 = vcombine.low %v81_v15, %v82_v16  ;;  %s2418_s3 = smov 32   ;;  %v2163_v63 = vld [vmem:[#allocation7] sm:$0xff]   ;;  %v2164_v2 = vld [vmem:[#allocation7 + $0x8] sm:$0xff]   ;;  %vm257_vm2 = vcmask 261120   ;;  %vm330_vm3 = vcmask 254976  }
  0x3c   :  { %vm1843_vm5 = vcmask 33792  }
  0x3d   :  { %v99_v19 = vrot.slane %v91_v14, %v2529_v7  ;;  %v106_v22 = vrot.slane %v92_v17, %v2529_v7  ;;  %v116_v23 = vrot.slane %v108_v18, %v2529_v7  ;;  %v123_v25 = vrot.slane %v109_v20, %v2529_v7  ;;  %2008 = vmatpush3.bf16.msra.mxu1 %v2162_v24 }
  0x3e   :  { %2021 = vmatprep.subr.bf16.mxu1 %v2414_v1 }
  0x3f   :  { %v107_v26 = vcombine.low %v99_v19, %v106_v22  ;;  %v124_v27 = vcombine.low %v116_v23, %v123_v25  ;;  %v2165_v25 = vld [vmem:[#allocation7] sm:$0xff]  }
  0x40   :  { %2010 = vmatmul.mubr.bf16.vlgmr.msra.gmra.mrb[0].mxu1 %v2417_v29 }
  0x41   :  { %v127_v28 = vpack.c.bf16 %v124_v27, %v107_v26  ;;  %2025 = vmatprep.mubr.msk.bf16.mxu1 %vm2415_vm0, %v2414_v1  ;;  %2022 = vmatpush3.bf16.msra.mxu1 %v2165_v25  ;;  %v2166_v26 = vld [vmem:[#allocation7 + $0x8] sm:$0xff]  }
  0x42   :  { %2023 = vmatprep.subr.bf16.mxu1 %v2414_v1 }
  0x43   :  { %2002 = vmatmul.mubr.msk.bf16.vlgmr.msra.gmra.mrb[0].mxu0 %vm143_vm1, %v127_v28 }
  0x44   :  { %2017 = vmatprep.mubr.msk.bf16.mxu0 %vm2415_vm0, %v2414_v1  ;;  %2014 = vmatpush3.bf16.msra.mxu0 %v2163_v63 }
  0x45   :  { %2015 = vmatprep.subr.bf16.mxu0 %v2414_v1  ;;  %2024 = vmatpush3.bf16.msra.mxu1 %v2166_v26 }
  0x46   :  { %2037 = vmatprep.subr.bf16.mxu1 %v2414_v1 }
  0x48   :  { %2016 = vmatpush3.bf16.msra.mxu0 %v2164_v2 }
  0x49   :  { %2029 = vmatprep.subr.bf16.mxu0 %v2414_v1 }
 0x113   :  { %v295_v34 = vpop.f32.mrb[0].mxu1 }
 0x114   :  { %v2011_v36 = vpop.f32.mrb[1].mxu1 }
 0x115   :  { %v298_v41 = vpop.f32.mrb[2].mxu1 }
 0x116   :  { %v181_v31 = vpop.f32.mrb[0].mxu0  ;;  %v2012_v42 = vpop.f32.mrb[3].mxu1 }
 0x117   :  { %v182_v32 = vadd.f32 %v1876_v30, %v181_v31  ;;  %v2003_v33 = vpop.f32.mrb[1].mxu0 }
 0x118   :  { %v184_v35 = vpop.f32.mrb[2].mxu0 }
 0x119   :  { %v190_v37 = vcombine.high %v182_v32, %v182_v32  ;;  %v197_v38 = vrot.slane %v182_v32, %v2529_v7  ;;  %1879 = vst.sshfl [vmem:[#allocation2] sm:$0x3 pattern:$0x76325410] %v182_v32  ;;  %v185_v39 = vadd.f32 %v1876_v30, %v184_v35  ;;  %v2004_v40 = vpop.f32.mrb[3].mxu0 }
 0x11b   :  { %v204_v43 = vrot.slane %v190_v37, %v2529_v7  ;;  %v205_v44 = vcombine.high %v197_v38, %v197_v38  ;;  %1880 = vst.sshfl [vmem:[#allocation2 + $0x4] sm:$0x3 pattern:$0x76325410] %v190_v37  ;;  %v207_v45 = vcombine.high %v185_v39, %v185_v39  ;;  %v214_v46 = vrot.slane %v185_v39, %v2529_v7 }
 0x11c   :  { %1881 = vst.sshfl [vmem:[#allocation2 + $0x8] sm:$0x3 pattern:$0x76325410] %v185_v39 }
 0x11d   :  { %v206_v47 = vcombine.high %v204_v43, %v204_v43  ;;  %233 = vst [vmem:[#allocation2 + $0x2] sm:$0x3] %v205_v44  ;;  %v221_v48 = vrot.slane %v207_v45, %v2529_v7  ;;  %v222_v49 = vcombine.high %v214_v46, %v214_v46  ;;  %1882 = vst.sshfl [vmem:[#allocation2 + $0xc] sm:$0x3 pattern:$0x76325410] %v207_v45 }
 0x11f   :  { %235 = vst [vmem:[#allocation2 + $0x6] sm:$0x3] %v206_v47  ;;  %v223_v50 = vcombine.high %v221_v48, %v221_v48  ;;  %237 = vst [vmem:[#allocation2 + $0xa] sm:$0x3] %v222_v49  ;;  %v2167_v49 = vld [vmem:[#allocation7] sm:$0xff]  }
 0x120   :  { %v240_v51 = vld [vmem:[#allocation2] sm:$0x3] }
 0x121   :  { %239 = vst [vmem:[#allocation2 + $0xe] sm:$0x3] %v223_v50  ;;  %v301_v52 = vadd.f32 %v295_v34, %v240_v51  ;;  %v2168_v50 = vld [vmem:[#allocation7 + $0x8] sm:$0xff]  }
 0x122   :  { %v429_v33 = vld [vmem:[#allocation2 + $0x4] sm:$0x3] }
 0x123   :  { %2183 = vtanh.f32 %v301_v52  ;;  %v1885_v54 = vmul.f32 -1.442695, %v301_v52 }
 0x124   :  { %v333_v9 = vld [vmem:[#allocation2 + $0x2] sm:$0x3] }
 0x125   :  { %2185 = vpow2.f32 %v1885_v54 }
 0x12d   :  { %v2184_v53 = vpop.eup %2183 }
 0x12e   :  { %311 = vrot.lane.b32.xlu0 %v2184_v53, %s2411_s21 }
 0x12f   :  { %v2186_v55 = vpop.eup %2185 }
 0x130   :  { %v305_v56 = vadd.f32 1.0, %v2186_v55 }
 0x132   :  { %2187 = vrcp.f32 %v305_v56  ;;  %v525_v56 = vld [vmem:[#allocation2 + $0x6] sm:$0x3] }
 0x13c   :  { %v2188_v57 = vpop.eup %2187 }
 0x13d   :  { %v309_v60 = vmul.f32 0.0, %v2188_v57 }
 0x1a0   :  { %v312_v58 = vpop.permute.xlu0 %311 }
 0x1a1   :  { %v314_v59 = vmul.f32 %v2188_v57, %v312_v58 }
 0x1a3   :  { %316 = vrot.lane.b32.xlu0 %v314_v59, %s2418_s3 }
 0x215   :  { %v317_v61 = vpop.permute.xlu0 %316 }
 0x216   :  { %v319_v62 = vadd.f32 %v317_v61, %v309_v60 }
 0x218   :  { %2189 = vtanh.f32 %v319_v62 }
 0x222   :  { %v2190_v3 = vpop.eup %2189 }
 0x223   :  { %322 = vrot.lane.b32.xlu1 %v2190_v3, %s2411_s21 }
 0x295   :  { %v323_v4 = vpop.permute.xlu1 %322 }
 0x296   :  { %v2579_v5 = vmul.f32 %v2188_v57, %v323_v4 }
 0x298   :  { %v334_v6 = vpack.c.bf16 %v2579_v5, %v2579_v5 }
 0x29a   :  { %340 = vrot.lane.b32.xlu1 %v334_v6, %s2418_s3 }
 0x30c   :  { %v341_v8 = vpop.permute.xlu1 %340 }
 0x30d   :  { %2018 = vmatmul.mubr.msk.bf16.vlgmr.msra.gmra.mrb[4].mxu0 %vm257_vm2, %v341_v8 }
 0x30e   :  { %2033 = vmatprep.mubr.msk.bf16.mxu0 %vm2415_vm0, %v2414_v1  ;;  %2030 = vmatpush3.bf16.msra.mxu0 %v2167_v49 }
 0x30f   :  { %2031 = vmatprep.subr.bf16.mxu0 %v2414_v1 }
 0x312   :  { %2032 = vmatpush3.bf16.msra.mxu0 %v2168_v50 }
 0x313   :  { %2045 = vmatprep.subr.bf16.mxu0 %v2414_v1 }
 0x3e0   :  { %v391_v10 = vpop.f32.mrb[4].mxu0 }
 0x3e1   :  { %v397_v11 = vadd.f32 %v391_v10, %v333_v9  ;;  %v2019_v12 = vpop.f32.mrb[5].mxu0 }
 0x3e2   :  { %v394_v13 = vpop.f32.mrb[6].mxu0  ;;  %v2169_v12 = vld [vmem:[#allocation7] sm:$0xff]  }
 0x3e3   :  { %2191 = vtanh.f32 %v397_v11  ;;  %v2020_v14 = vpop.f32.mrb[7].mxu0  ;;  %v1889_v16 = vmul.f32 -1.442695, %v397_v11  ;;  %v2170_v13 = vld [vmem:[#allocation7 + $0x8] sm:$0xff]  }
 0x3e5   :  { %2193 = vpow2.f32 %v1889_v16 }
 0x3ed   :  { %v2192_v15 = vpop.eup %2191 }
 0x3ee   :  { %407 = vrot.lane.b32.xlu0 %v2192_v15, %s2411_s21 }
 0x3ef   :  { %v2194_v17 = vpop.eup %2193 }
 0x3f0   :  { %v401_v18 = vadd.f32 1.0, %v2194_v17 }
 0x3f2   :  { %2195 = vrcp.f32 %v401_v18 }
 0x3fc   :  { %v2196_v19 = vpop.eup %2195 }
 0x3fd   :  { %v405_v22 = vmul.f32 %v2196_v19, %v319_v62 }
 0x460   :  { %v408_v20 = vpop.permute.xlu0 %407 }
 0x461   :  { %v410_v21 = vmul.f32 %v2196_v19, %v408_v20 }
 0x463   :  { %412 = vrot.lane.b32.xlu1 %v410_v21, %s2418_s3 }
 0x4d5   :  { %v413_v23 = vpop.permute.xlu1 %412 }
 0x4d6   :  { %v415_v24 = vadd.f32 %v413_v23, %v405_v22 }
 0x4d8   :  { %2197 = vtanh.f32 %v415_v24 }
 0x4e2   :  { %v2198_v27 = vpop.eup %2197 }
 0x4e3   :  { %418 = vrot.lane.b32.xlu0 %v2198_v27, %s2411_s21 }
 0x555   :  { %v419_v28 = vpop.permute.xlu0 %418 }
 0x556   :  { %v2592_v30 = vmul.f32 %v2196_v19, %v419_v28  ;;  %v621_v19 = vld [vmem:[#allocation2 + $0x8] sm:$0x3] }
 0x558   :  { %v430_v31 = vpack.c.bf16 %v2592_v30, %v2592_v30 }
 0x55a   :  { %436 = vrot.lane.b32.xlu1 %v430_v31, %s2418_s3 }
 0x5cc   :  { %v437_v32 = vpop.permute.xlu1 %436 }
 0x5cd   :  { %2026 = vmatmul.mubr.msk.bf16.vlgmr.msra.gmra.mrb[4].mxu1 %vm257_vm2, %v437_v32 }
 0x5ce   :  { %2041 = vmatprep.mubr.msk.bf16.mxu1 %vm2415_vm0, %v2414_v1  ;;  %2038 = vmatpush3.bf16.msra.mxu1 %v2169_v12 }
 0x5cf   :  { %2039 = vmatprep.subr.bf16.mxu1 %v2414_v1 }
 0x5d2   :  { %2040 = vmatpush3.bf16.msra.mxu1 %v2170_v13 }
 0x5d3   :  { %2053 = vmatprep.subr.bf16.mxu1 %v2414_v1 }
 0x6a0   :  { %v487_v34 = vpop.f32.mrb[4].mxu1 }
 0x6a1   :  { %v493_v35 = vadd.f32 %v487_v34, %v429_v33  ;;  %v2027_v36 = vpop.f32.mrb[5].mxu1 }
 0x6a2   :  { %v490_v37 = vpop.f32.mrb[6].mxu1 }
 0x6a3   :  { %2199 = vtanh.f32 %v493_v35  ;;  %v2028_v38 = vpop.f32.mrb[7].mxu1  ;;  %v1893_v40 = vmul.f32 -1.442695, %v493_v35  ;;  %v2171_v37 = vld [vmem:[#allocation7] sm:$0xff]  }
 0x6a4   :  { %v2172_v38 = vld [vmem:[#allocation7 + $0x8] sm:$0xff]  }
 0x6a5   :  { %2201 = vpow2.f32 %v1893_v40 }
 0x6ad   :  { %v2200_v39 = vpop.eup %2199 }
 0x6ae   :  { %503 = vrot.lane.b32.xlu0 %v2200_v39, %s2411_s21 }
 0x6af   :  { %v2202_v41 = vpop.eup %2201 }
 0x6b0   :  { %v497_v42 = vadd.f32 1.0, %v2202_v41 }
 0x6b2   :  { %2203 = vrcp.f32 %v497_v42 }
 0x6bc   :  { %v2204_v43 = vpop.eup %2203 }
 0x6bd   :  { %v501_v46 = vmul.f32 %v2204_v43, %v415_v24 }
 0x720   :  { %v504_v44 = vpop.permute.xlu0 %503 }
 0x721   :  { %v506_v45 = vmul.f32 %v2204_v43, %v504_v44  ;;  %v717_v44 = vld [vmem:[#allocation2 + $0xa] sm:$0x3] }
 0x723   :  { %508 = vrot.lane.b32.xlu1 %v506_v45, %s2418_s3 }
 0x795   :  { %v509_v47 = vpop.permute.xlu1 %508 }
 0x796   :  { %v511_v48 = vadd.f32 %v509_v47, %v501_v46 }
 0x798   :  { %2205 = vtanh.f32 %v511_v48 }
 0x7a2   :  { %v2206_v51 = vpop.eup %2205 }
 0x7a3   :  { %514 = vrot.lane.b32.xlu0 %v2206_v51, %s2411_s21 }
 0x815   :  { %v515_v52 = vpop.permute.xlu0 %514 }
 0x816   :  { %v2605_v53 = vmul.f32 %v2204_v43, %v515_v52 }
 0x818   :  { %v526_v54 = vpack.c.bf16 %v2605_v53, %v2605_v53 }
 0x81a   :  { %532 = vrot.lane.b32.xlu1 %v526_v54, %s2418_s3 }
 0x88c   :  { %v533_v55 = vpop.permute.xlu1 %532 }
 0x88d   :  { %2034 = vmatmul.mubr.msk.bf16.vlgmr.msra.gmra.mrb[8].mxu0 %vm257_vm2, %v533_v55 }
 0x88e   :  { %2049 = vmatprep.mubr.msk.bf16.mxu0 %vm2415_vm0, %v2414_v1  ;;  %2046 = vmatpush3.bf16.msra.mxu0 %v2171_v37 }
 0x88f   :  { %2047 = vmatprep.subr.bf16.mxu0 %v2414_v1 }
 0x892   :  { %2048 = vmatpush3.bf16.msra.mxu0 %v2172_v38 }
 0x893   :  { %2061 = vmatprep.subr.bf16.mxu0 %v2414_v1 }
 0x960   :  { %v583_v57 = vpop.f32.mrb[8].mxu0 }
 0x961   :  { %v589_v58 = vadd.f32 %v583_v57, %v525_v56  ;;  %v2035_v59 = vpop.f32.mrb[9].mxu0 }
 0x962   :  { %v586_v60 = vpop.f32.mrb[10].mxu0 }
 0x963   :  { %2207 = vtanh.f32 %v589_v58  ;;  %v2036_v61 = vpop.f32.mrb[11].mxu0  ;;  %v1897_v63 = vmul.f32 -1.442695, %v589_v58 }
 0x964   :  { %v2173_v61 = vld [vmem:[#allocation7] sm:$0xff]  }
 0x965   :  { %2209 = vpow2.f32 %v1897_v63 }
 0x96d   :  { %v2208_v62 = vpop.eup %2207 }
 0x96e   :  { %599 = vrot.lane.b32.xlu0 %v2208_v62, %s2411_s21  ;;  %v2174_v62 = vld [vmem:[#allocation7 + $0x8] sm:$0xff]  }
 0x96f   :  { %v2210_v2 = vpop.eup %2209 }
 0x970   :  { %v593_v3 = vadd.f32 1.0, %v2210_v2 }
 0x972   :  { %2211 = vrcp.f32 %v593_v3 }
 0x97c   :  { %v2212_v4 = vpop.eup %2211 }
 0x97d   :  { %v597_v9 = vmul.f32 %v2212_v4, %v511_v48 }
 0x9e0   :  { %v600_v6 = vpop.permute.xlu0 %599 }
 0x9e1   :  { %v602_v8 = vmul.f32 %v2212_v4, %v600_v6 }
 0x9e3   :  { %604 = vrot.lane.b32.xlu1 %v602_v8, %s2418_s3  ;;  %v813_v8 = vld [vmem:[#allocation2 + $0xc] sm:$0x3] }
 0xa55   :  { %v605_v10 = vpop.permute.xlu1 %604 }
 0xa56   :  { %v607_v11 = vadd.f32 %v605_v10, %v597_v9 }
 0xa58   :  { %2213 = vtanh.f32 %v607_v11 }
 0xa62   :  { %v2214_v14 = vpop.eup %2213 }
 0xa63   :  { %610 = vrot.lane.b32.xlu0 %v2214_v14, %s2411_s21 }
 0xad5   :  { %v611_v15 = vpop.permute.xlu0 %610 }
 0xad6   :  { %v2618_v16 = vmul.f32 %v2212_v4, %v611_v15 }
 0xad8   :  { %v622_v17 = vpack.c.bf16 %v2618_v16, %v2618_v16 }
 0xada   :  { %628 = vrot.lane.b32.xlu1 %v622_v17, %s2418_s3 }
 0xb4c   :  { %v629_v18 = vpop.permute.xlu1 %628 }
 0xb4d   :  { %2042 = vmatmul.mubr.msk.bf16.vlgmr.msra.gmra.mrb[8].mxu1 %vm257_vm2, %v629_v18 }
 0xb4e   :  { %2057 = vmatprep.mubr.msk.bf16.mxu1 %vm2415_vm0, %v2414_v1  ;;  %2054 = vmatpush3.bf16.msra.mxu1 %v2173_v61 }
 0xb4f   :  { %2055 = vmatprep.subr.bf16.mxu1 %v2414_v1 }
 0xb52   :  { %2056 = vmatpush3.bf16.msra.mxu1 %v2174_v62 }
 0xb53   :  { %2069 = vmatprep.subr.bf16.mxu1 %v2414_v1 }
 0xc20   :  { %v679_v20 = vpop.f32.mrb[8].mxu1 }
 0xc21   :  { %v685_v21 = vadd.f32 %v679_v20, %v621_v19  ;;  %v2043_v22 = vpop.f32.mrb[9].mxu1 }
 0xc22   :  { %v682_v23 = vpop.f32.mrb[10].mxu1 }
 0xc23   :  { %2215 = vtanh.f32 %v685_v21  ;;  %v2044_v24 = vpop.f32.mrb[11].mxu1  ;;  %v1901_v26 = vmul.f32 -1.442695, %v685_v21 }
 0xc25   :  { %2217 = vpow2.f32 %v1901_v26  ;;  %v2176_v26 = vld [vmem:[#allocation7 + $0x8] sm:$0xff]  }
 0xc2d   :  { %v2216_v25 = vpop.eup %2215 }
 0xc2e   :  { %695 = vrot.lane.b32.xlu0 %v2216_v25, %s2411_s21  ;;  %v2175_v25 = vld [vmem:[#allocation7] sm:$0xff]  }
 0xc2f   :  { %v2218_v27 = vpop.eup %2217 }
 0xc30   :  { %v689_v28 = vadd.f32 1.0, %v2218_v27 }
 0xc32   :  { %2219 = vrcp.f32 %v689_v28 }
 0xc3c   :  { %v2220_v31 = vpop.eup %2219 }
 0xc3d   :  { %v693_v34 = vmul.f32 %v2220_v31, %v607_v11 }
 0xca0   :  { %v696_v32 = vpop.permute.xlu0 %695 }
 0xca1   :  { %v698_v33 = vmul.f32 %v2220_v31, %v696_v32 }
 0xca3   :  { %700 = vrot.lane.b32.xlu1 %v698_v33, %s2418_s3 }
 0xd15   :  { %v701_v35 = vpop.permute.xlu1 %700 }
 0xd16   :  { %v703_v36 = vadd.f32 %v701_v35, %v693_v34  ;;  %v909_v34 = vld [vmem:[#allocation2 + $0xe] sm:$0x3] }
 0xd18   :  { %2221 = vtanh.f32 %v703_v36 }
 0xd22   :  { %v2222_v39 = vpop.eup %2221 }
 0xd23   :  { %706 = vrot.lane.b32.xlu0 %v2222_v39, %s2411_s21 }
 0xd95   :  { %v707_v40 = vpop.permute.xlu0 %706 }
 0xd96   :  { %v2631_v41 = vmul.f32 %v2220_v31, %v707_v40 }
 0xd98   :  { %v718_v42 = vpack.c.bf16 %v2631_v41, %v2631_v41 }
 0xd9a   :  { %724 = vrot.lane.b32.xlu1 %v718_v42, %s2418_s3 }
 0xe0c   :  { %v725_v43 = vpop.permute.xlu1 %724 }
 0xe0d   :  { %2050 = vmatmul.mubr.msk.bf16.vlgmr.msra.gmra.mrb[12].mxu0 %vm257_vm2, %v725_v43 }
 0xe0e   :  { %2065 = vmatprep.mubr.msk.bf16.mxu0 %vm2415_vm0, %v2414_v1  ;;  %2062 = vmatpush3.bf16.msra.mxu0 %v2175_v25  ;;  %v1914_v25 = vld [vmem:[%s2832_s6] ss:$0 sm:$0xff] }
 0xe0f   :  { %2063 = vmatprep.subr.bf16.mxu0 %v2414_v1 }
 0xe12   :  { %2064 = vmatpush3.bf16.msra.mxu0 %v2176_v26 }
 0xe13   :  { %2077 = vmatprep.subr.bf16.mxu0 %v2414_v1 }
 0xee0   :  { %v775_v45 = vpop.f32.mrb[12].mxu0 }
 0xee1   :  { %v781_v46 = vadd.f32 %v775_v45, %v717_v44  ;;  %v2051_v47 = vpop.f32.mrb[13].mxu0 }
 0xee2   :  { %v778_v48 = vpop.f32.mrb[14].mxu0 }
 0xee3   :  { %2223 = vtanh.f32 %v781_v46  ;;  %v2052_v49 = vpop.f32.mrb[15].mxu0  ;;  %v1905_v51 = vmul.f32 -1.442695, %v781_v46 }
 0xee5   :  { %2225 = vpow2.f32 %v1905_v51 }
 0xeed   :  { %v2224_v50 = vpop.eup %2223 }
 0xeee   :  { %791 = vrot.lane.b32.xlu0 %v2224_v50, %s2411_s21 }
 0xeef   :  { %v2226_v52 = vpop.eup %2225 }
 0xef0   :  { %v785_v54 = vadd.f32 1.0, %v2226_v52 }
 0xef2   :  { %2227 = vrcp.f32 %v785_v54 }
 0xefc   :  { %v2228_v55 = vpop.eup %2227 }
 0xefd   :  { %v789_v58 = vmul.f32 %v2228_v55, %v703_v36 }
 0xf60   :  { %v792_v56 = vpop.permute.xlu0 %791 }
 0xf61   :  { %v794_v57 = vmul.f32 %v2228_v55, %v792_v56 }
 0xf63   :  { %796 = vrot.lane.b32.xlu1 %v794_v57, %s2418_s3  ;;  %v2690_v57 = vld [vmem:[#allocation9] sm:$0xff]  }
 0xfd5   :  { %v797_v59 = vpop.permute.xlu1 %796 }
 0xfd6   :  { %v799_v60 = vadd.f32 %v797_v59, %v789_v58  ;;  %v2694_v58 = vld [vmem:[#allocation9 + $0x8] sm:$0xff]  }
 0xfd8   :  { %2229 = vtanh.f32 %v799_v60 }
 0xfe2   :  { %v2230_v63 = vpop.eup %2229 }
 0xfe3   :  { %802 = vrot.lane.b32.xlu0 %v2230_v63, %s2411_s21 }
0x1055   :  { %v803_v2 = vpop.permute.xlu0 %802 }
0x1056   :  { %v2644_v3 = vmul.f32 %v2228_v55, %v803_v2  ;;  %v2178_v55 = vld [vmem:[%s2830_s4 + $0x8] sm:$0xff]  }
0x1058   :  { %v814_v4 = vpack.c.bf16 %v2644_v3, %v2644_v3 }
0x105a   :  { %820 = vrot.lane.b32.xlu1 %v814_v4, %s2418_s3 }
0x10cc   :  { %v821_v6 = vpop.permute.xlu1 %820 }
0x10cd   :  { %2058 = vmatmul.mubr.msk.bf16.vlgmr.msra.gmra.mrb[12].mxu1 %vm257_vm2, %v821_v6 }
0x10ce   :  { %2073 = vmatprep.mubr.msk.bf16.mxu1 %vm2415_vm0, %v2414_v1 }
0x11a0   :  { %v871_v9 = vpop.f32.mrb[12].mxu1 }
0x11a1   :  { %v877_v10 = vadd.f32 %v871_v9, %v813_v8  ;;  %v2059_v11 = vpop.f32.mrb[13].mxu1 }
0x11a2   :  { %v874_v12 = vpop.f32.mrb[14].mxu1 }
0x11a3   :  { %2231 = vtanh.f32 %v877_v10  ;;  %v2060_v13 = vpop.f32.mrb[15].mxu1  ;;  %v1909_v15 = vmul.f32 -1.442695, %v877_v10 }
0x11a5   :  { %2233 = vpow2.f32 %v1909_v15 }
0x11ad   :  { %v2232_v14 = vpop.eup %2231 }
0x11ae   :  { %887 = vrot.lane.b32.xlu0 %v2232_v14, %s2411_s21 }
0x11af   :  { %v2234_v17 = vpop.eup %2233 }
0x11b0   :  { %v881_v18 = vadd.f32 1.0, %v2234_v17 }
0x11b2   :  { %2235 = vrcp.f32 %v881_v18 }
0x11bc   :  { %v2236_v19 = vpop.eup %2235 }
0x11bd   :  { %v885_v22 = vmul.f32 %v2236_v19, %v799_v60 }
0x1220   :  { %v888_v20 = vpop.permute.xlu0 %887 }
0x1221   :  { %v890_v21 = vmul.f32 %v2236_v19, %v888_v20 }
0x1223   :  { %892 = vrot.lane.b32.xlu1 %v890_v21, %s2418_s3 }
0x1295   :  { %v893_v23 = vpop.permute.xlu1 %892 }
0x1296   :  { %v895_v24 = vadd.f32 %v893_v23, %v885_v22 }
0x1298   :  { %2237 = vtanh.f32 %v895_v24 }
0x12a2   :  { %v2238_v27 = vpop.eup %2237 }
0x12a3   :  { %898 = vrot.lane.b32.xlu0 %v2238_v27, %s2411_s21 }
0x1315   :  { %v899_v28 = vpop.permute.xlu0 %898 }
0x1316   :  { %v901_v31 = vmul.f32 %v2236_v19, %v899_v28 }
0x1318   :  { %v910_v32 = vpack.c.bf16 %v901_v31, %v901_v31 }
0x131a   :  { %916 = vrot.lane.b32.xlu1 %v910_v32, %s2418_s3 }
0x138c   :  { %v917_v33 = vpop.permute.xlu1 %916 }
0x138d   :  { %2066 = vmatmul.mubr.msk.bf16.vlgmr.msra.gmra.mrb[16].mxu0 %vm257_vm2, %v917_v33 }
0x138e   :  { %2081 = vmatprep.mubr.msk.bf16.mxu0 %vm2415_vm0, %v2414_v1  ;;  %2078 = vmatpush3.bf16.msra.mxu0 %v2690_v57 }
0x138f   :  { %2079 = vmatprep.subr.bf16.mxu0 %v2414_v1 }
0x1392   :  { %2080 = vmatpush3.bf16.msra.mxu0 %v2694_v58 }
0x1393   :  { %2093 = vmatprep.subr.bf16.mxu0 %v2414_v1 }
0x1395   :  { %2082 = vmatmul.mubr.bf16.vlgmr.msra.gmra.mrb[20].mxu0 %v2417_v29 }
0x1396   :  { %2094 = vmatpush3.bf16.msra.mxu0 %v2690_v57  ;;  %2097 = vmatprep.mubr.msk.bf16.mxu0 %vm2415_vm0, %v2414_v1 }
0x1397   :  { %2095 = vmatprep.subr.bf16.mxu0 %v2414_v1 }
0x139a   :  { %2096 = vmatpush3.bf16.msra.mxu0 %v2694_v58 }
0x139b   :  { %2109 = vmatprep.subr.bf16.mxu0 %v2414_v1 }
0x1460   :  { %v967_v35 = vpop.f32.mrb[16].mxu0 }
0x1461   :  { %v973_v36 = vadd.f32 %v967_v35, %v909_v34  ;;  %v2067_v37 = vpop.f32.mrb[17].mxu0 }
0x1462   :  { %v970_v38 = vpop.f32.mrb[18].mxu0 }
0x1463   :  { %2239 = vtanh.f32 %v973_v36  ;;  %v2068_v39 = vpop.f32.mrb[19].mxu0  ;;  %v1913_v42 = vmul.f32 -1.442695, %v973_v36 }
0x1465   :  { %2241 = vpow2.f32 %v1913_v42 }
0x1468   :  { %v1227_v21 = vpop.f32.mrb[20].mxu0 }
0x1469   :  { %v2083_v22 = vpop.f32.mrb[21].mxu0 }
0x146a   :  { %v1230_v23 = vpop.f32.mrb[22].mxu0 }
0x146d   :  { %v2240_v40 = vpop.eup %2239 }
0x146e   :  { %983 = vrot.lane.b32.xlu0 %v2240_v40, %s2411_s21 }
0x146f   :  { %v2242_v43 = vpop.eup %2241 }
0x1470   :  { %v977_v44 = vadd.f32 1.0, %v2242_v43 }
0x1472   :  { %2243 = vrcp.f32 %v977_v44 }
0x147c   :  { %v2244_v45 = vpop.eup %2243 }
0x147d   :  { %v981_v48 = vmul.f32 %v2244_v45, %v895_v24  ;;  %v2084_v24 = vpop.f32.mrb[23].mxu0 }
0x14e0   :  { %v984_v46 = vpop.permute.xlu0 %983 }
0x14e1   :  { %v986_v47 = vmul.f32 %v2244_v45, %v984_v46 }
0x14e3   :  { %988 = vrot.lane.b32.xlu1 %v986_v47, %s2418_s3 }
0x14e7   :  { %327 = vrot.lane.b32.xlu1 %v2579_v5, %s2418_s3 }
0x14eb   :  { %519 = vrot.lane.b32.xlu1 %v2605_v53, %s2418_s3 }
0x14ef   :  { %711 = vrot.lane.b32.xlu1 %v2631_v41, %s2418_s3  ;;  %v2177_v41 = vld [vmem:[%s2830_s4] sm:$0xff]  }
0x14f0   :  { %2070 = vmatpush3.bf16.msra.mxu1 %v2177_v41 }
0x14f1   :  { %2071 = vmatprep.subr.bf16.mxu1 %v2414_v1 }
0x14f3   :  { %903 = vrot.lane.b32.xlu1 %v901_v31, %s2418_s3 }
0x14f4   :  { %2072 = vmatpush3.bf16.msra.mxu1 %v2178_v55 }
0x14f5   :  { %2085 = vmatprep.subr.bf16.mxu1 %v2414_v1 }
0x1555   :  { %v989_v49 = vpop.permute.xlu1 %988 }
0x1556   :  { %v991_v50 = vadd.f32 %v989_v49, %v981_v48 }
0x1558   :  { %2245 = vtanh.f32 %v991_v50 }
0x1559   :  { %v328_v51 = vpop.permute.xlu1 %327 }
0x155a   :  { %331 = vst.msk [vmem:[#allocation3] sm:$0x3] %vm330_vm3, %v328_v51 }
0x155d   :  { %v520_v52 = vpop.permute.xlu1 %519 }
0x155e   :  { %523 = vst.msk [vmem:[#allocation3 + $0x4] sm:$0x3] %vm330_vm3, %v520_v52 }
0x1561   :  { %v712_v5 = vpop.permute.xlu1 %711  ;;  %v1004_v29 = vld [vmem:[#allocation3] sm:$0x3] }
0x1562   :  { %v2246_v54 = vpop.eup %2245  ;;  %715 = vst.msk [vmem:[#allocation3 + $0x8] sm:$0x3] %vm330_vm3, %v712_v5 }
0x1563   :  { %994 = vrot.lane.b32.xlu0 %v2246_v54, %s2411_s21 }
0x1565   :  { %v904_v53 = vpop.permute.xlu1 %903  ;;  %v1006_v2 = vld [vmem:[#allocation3 + $0x4] sm:$0x3] }
0x1566   :  { %907 = vst.msk [vmem:[#allocation3 + $0xc] sm:$0x3] %vm330_vm3, %v904_v53 }
0x1567   :  { %423 = vrot.lane.b32.xlu0 %v2592_v30, %s2418_s3 }
0x1569   :  { %v1008_v6 = vld [vmem:[#allocation3 + $0x8] sm:$0x3] }
0x156b   :  { %615 = vrot.lane.b32.xlu0 %v2618_v16, %s2418_s3 }
0x156d   :  { %v1010_v10 = vld [vmem:[#allocation3 + $0xc] sm:$0x3] }
0x156f   :  { %807 = vrot.lane.b32.xlu0 %v2644_v3, %s2418_s3 }
0x15d5   :  { %v995_v30 = vpop.permute.xlu0 %994 }
0x15d6   :  { %v997_v56 = vmul.f32 %v2244_v45, %v995_v30 }
0x15d8   :  { %999 = vrot.lane.b32.xlu0 %v997_v56, %s2418_s3 }
0x15d9   :  { %v424_v16 = vpop.permute.xlu0 %423 }
0x15da   :  { %427 = vst.msk [vmem:[#allocation3 + $0x2] sm:$0x3] %vm330_vm3, %v424_v16 }
0x15dd   :  { %v616_v59 = vpop.permute.xlu0 %615 }
0x15de   :  { %619 = vst.msk [vmem:[#allocation3 + $0x6] sm:$0x3] %vm330_vm3, %v616_v59 }
0x15e1   :  { %v808_v60 = vpop.permute.xlu0 %807  ;;  %v1005_v63 = vld [vmem:[#allocation3 + $0x2] sm:$0x3] }
0x15e2   :  { %811 = vst.msk [vmem:[#allocation3 + $0xa] sm:$0x3] %vm330_vm3, %v808_v60  ;;  %v1020_v8 = vcombine.low %v1004_v29, %v1005_v63 }
0x15e4   :  { %v1028_v14 = vrot.slane %v1020_v8, %v2529_v7 }
0x15e5   :  { %v1007_v62 = vld [vmem:[#allocation3 + $0x6] sm:$0x3] }
0x15e6   :  { %v1021_v4 = vcombine.low %v1006_v2, %v1007_v62 }
0x15e8   :  { %v1035_v12 = vrot.slane %v1021_v4, %v2529_v7 }
0x15e9   :  { %v1009_v3 = vld [vmem:[#allocation3 + $0xa] sm:$0x3] }
0x15ea   :  { %v1037_v9 = vcombine.low %v1008_v6, %v1009_v3  ;;  %v1036_v18 = vcombine.low %v1028_v14, %v1035_v12 }
0x15ec   :  { %v1045_v15 = vrot.slane %v1037_v9, %v2529_v7 }
0x164a   :  { %v1000_v61 = vpop.permute.xlu0 %999 }
0x164b   :  { %1003 = vst.msk [vmem:[#allocation3 + $0xe] sm:$0x3] %vm330_vm3, %v1000_v61 }
0x1652   :  { %v1011_v11 = vld [vmem:[#allocation3 + $0xe] sm:$0x3] }
0x1653   :  { %v1038_v13 = vcombine.low %v1010_v10, %v1011_v11 }
0x1655   :  { %v1052_v17 = vrot.slane %v1038_v13, %v2529_v7 }
0x1657   :  { %v1053_v19 = vcombine.low %v1045_v15, %v1052_v17 }
0x1659   :  { %v1056_v20 = vpack.c.bf16 %v1053_v19, %v1036_v18 }
0x165b   :  { %2074 = vmatmul.mubr.msk.bf16.vlgmr.msra.gmra.mrb[16].mxu1 %vm257_vm2, %v1056_v20 }
0x165c   :  { %2086 = vmatpush3.bf16.msra.mxu1 %v2690_v57  ;;  %2089 = vmatprep.mubr.msk.bf16.mxu1 %vm2415_vm0, %v2414_v1 }
0x165d   :  { %2087 = vmatprep.subr.bf16.mxu1 %v2414_v1 }
0x1660   :  { %2088 = vmatpush3.bf16.msra.mxu1 %v2694_v58 }
0x1661   :  { %2101 = vmatprep.subr.bf16.mxu1 %v2414_v1 }
0x172e   :  { %v1117_v26 = vpop.f32.mrb[16].mxu1 }
0x172f   :  { %v1118_v27 = vadd.f32 %v1914_v25, %v1117_v26  ;;  %v2075_v28 = vpop.f32.mrb[17].mxu1 }
0x1730   :  { %v1120_v31 = vpop.f32.mrb[18].mxu1 }
0x1731   :  { %v1126_v32 = vcombine.high %v1118_v27, %v1118_v27  ;;  %v1133_v33 = vrot.slane %v1118_v27, %v2529_v7  ;;  %1918 = vst.sshfl [vmem:[#allocation2] sm:$0x3 pattern:$0x76325410] %v1118_v27  ;;  %v1121_v34 = vadd.f32 %v1914_v25, %v1120_v31  ;;  %v2076_v35 = vpop.f32.mrb[19].mxu1 }
0x1733   :  { %v1140_v36 = vrot.slane %v1126_v32, %v2529_v7  ;;  %v1141_v37 = vcombine.high %v1133_v33, %v1133_v33  ;;  %1919 = vst.sshfl [vmem:[#allocation2 + $0x4] sm:$0x3 pattern:$0x76325410] %v1126_v32  ;;  %v1143_v38 = vcombine.high %v1121_v34, %v1121_v34  ;;  %v1150_v39 = vrot.slane %v1121_v34, %v2529_v7 }
0x1734   :  { %1920 = vst.sshfl [vmem:[#allocation2 + $0x8] sm:$0x3 pattern:$0x76325410] %v1121_v34 }
0x1735   :  { %v1142_v40 = vcombine.high %v1140_v36, %v1140_v36  ;;  %1169 = vst [vmem:[#allocation2 + $0x2] sm:$0x3] %v1141_v37  ;;  %v1157_v42 = vrot.slane %v1143_v38, %v2529_v7  ;;  %v1158_v43 = vcombine.high %v1150_v39, %v1150_v39  ;;  %1921 = vst.sshfl [vmem:[#allocation2 + $0xc] sm:$0x3 pattern:$0x76325410] %v1143_v38 }
0x1737   :  { %1171 = vst [vmem:[#allocation2 + $0x6] sm:$0x3] %v1142_v40  ;;  %v1159_v44 = vcombine.high %v1157_v42, %v1157_v42  ;;  %1173 = vst [vmem:[#allocation2 + $0xa] sm:$0x3] %v1158_v43 }
0x1738   :  { %v1176_v45 = vld [vmem:[#allocation2] sm:$0x3] }
0x1739   :  { %1175 = vst [vmem:[#allocation2 + $0xe] sm:$0x3] %v1159_v44  ;;  %v1233_v46 = vadd.f32 %v1227_v21, %v1176_v45 }
0x173a   :  { %v1331_v20 = vld [vmem:[#allocation2 + $0x4] sm:$0x3] }
0x173b   :  { %2247 = vtanh.f32 %v1233_v46  ;;  %v1924_v48 = vmul.f32 -1.442695, %v1233_v46 }
0x173c   :  { %v1258_v59 = vld [vmem:[#allocation2 + $0x2] sm:$0x3] }
0x173d   :  { %2249 = vpow2.f32 %v1924_v48 }
0x173e   :  { %v1404_v44 = vld [vmem:[#allocation2 + $0x6] sm:$0x3] }
0x1745   :  { %v2248_v47 = vpop.eup %2247 }
0x1746   :  { %1243 = vrot.lane.b32.xlu1 %v2248_v47, %s2411_s21 }
0x1747   :  { %v2250_v49 = vpop.eup %2249 }
0x1748   :  { %v1237_v50 = vadd.f32 1.0, %v2250_v49 }
0x174a   :  { %2251 = vrcp.f32 %v1237_v50 }
0x1754   :  { %v2252_v51 = vpop.eup %2251 }
0x1755   :  { %v1241_v5 = vmul.f32 0.0, %v2252_v51 }
0x17b8   :  { %v1244_v52 = vpop.permute.xlu1 %1243 }
0x17b9   :  { %v1246_v7 = vmul.f32 %v2252_v51, %v1244_v52 }
0x17bb   :  { %1248 = vrot.lane.b32.xlu0 %v1246_v7, %s2418_s3 }
0x182d   :  { %v1249_v54 = vpop.permute.xlu0 %1248 }
0x182e   :  { %v1251_v53 = vadd.f32 %v1249_v54, %v1241_v5 }
0x1830   :  { %2253 = vtanh.f32 %v1251_v53 }
0x183a   :  { %v2254_v41 = vpop.eup %2253 }
0x183b   :  { %1254 = vrot.lane.b32.xlu1 %v2254_v41, %s2411_s21 }
0x18ad   :  { %v1255_v55 = vpop.permute.xlu1 %1254 }
0x18ae   :  { %v1257_v30 = vmul.f32 %v2252_v51, %v1255_v55 }
0x18b0   :  { %v1259_v56 = vpack.c.bf16 %v1257_v30, %v1257_v30 }
0x18b2   :  { %1261 = vrot.lane.b32.xlu0 %v1259_v56, %s2418_s3 }
0x1924   :  { %v1262_v16 = vpop.permute.xlu0 %1261 }
0x1925   :  { %2090 = vmatmul.mubr.msk.bf16.vlgmr.msra.gmra.mrb[20].mxu1 %vm257_vm2, %v1262_v16 }
0x1926   :  { %2102 = vmatpush3.bf16.msra.mxu1 %v2690_v57  ;;  %2105 = vmatprep.mubr.msk.bf16.mxu1 %vm2415_vm0, %v2414_v1 }
0x1927   :  { %2103 = vmatprep.subr.bf16.mxu1 %v2414_v1 }
0x192a   :  { %2104 = vmatpush3.bf16.msra.mxu1 %v2694_v58 }
0x192b   :  { %2117 = vmatprep.subr.bf16.mxu1 %v2414_v1 }
0x19f8   :  { %v1300_v60 = vpop.f32.mrb[20].mxu1 }
0x19f9   :  { %v1306_v61 = vadd.f32 %v1300_v60, %v1258_v59  ;;  %v2091_v62 = vpop.f32.mrb[21].mxu1 }
0x19fa   :  { %v1303_v63 = vpop.f32.mrb[22].mxu1  ;;  %v1477_v62 = vld [vmem:[#allocation2 + $0x8] sm:$0x3] }
0x19fb   :  { %2255 = vtanh.f32 %v1306_v61  ;;  %v2092_v2 = vpop.f32.mrb[23].mxu1  ;;  %v1926_v4 = vmul.f32 -1.442695, %v1306_v61 }
0x19fd   :  { %2257 = vpow2.f32 %v1926_v4 }
0x1a05   :  { %v2256_v3 = vpop.eup %2255 }
0x1a06   :  { %1316 = vrot.lane.b32.xlu1 %v2256_v3, %s2411_s21 }
0x1a07   :  { %v2258_v29 = vpop.eup %2257 }
0x1a08   :  { %v1310_v6 = vadd.f32 1.0, %v2258_v29 }
0x1a0a   :  { %2259 = vrcp.f32 %v1310_v6 }
0x1a14   :  { %v2260_v8 = vpop.eup %2259 }
0x1a15   :  { %v1314_v11 = vmul.f32 %v2260_v8, %v1251_v53 }
0x1a78   :  { %v1317_v9 = vpop.permute.xlu1 %1316 }
0x1a79   :  { %v1319_v10 = vmul.f32 %v2260_v8, %v1317_v9 }
0x1a7b   :  { %1321 = vrot.lane.b32.xlu0 %v1319_v10, %s2418_s3 }
0x1aed   :  { %v1322_v12 = vpop.permute.xlu0 %1321 }
0x1aee   :  { %v1324_v13 = vadd.f32 %v1322_v12, %v1314_v11 }
0x1af0   :  { %2261 = vtanh.f32 %v1324_v13 }
0x1afa   :  { %v2262_v14 = vpop.eup %2261 }
0x1afb   :  { %1327 = vrot.lane.b32.xlu1 %v2262_v14, %s2411_s21 }
0x1b6d   :  { %v1328_v15 = vpop.permute.xlu1 %1327 }
0x1b6e   :  { %v1330_v17 = vmul.f32 %v2260_v8, %v1328_v15 }
0x1b70   :  { %v1332_v18 = vpack.c.bf16 %v1330_v17, %v1330_v17 }
0x1b72   :  { %1334 = vrot.lane.b32.xlu0 %v1332_v18, %s2418_s3 }
0x1be4   :  { %v1335_v19 = vpop.permute.xlu0 %1334 }
0x1be5   :  { %2098 = vmatmul.mubr.msk.bf16.vlgmr.msra.gmra.mrb[24].mxu0 %vm257_vm2, %v1335_v19 }
0x1be6   :  { %2110 = vmatpush3.bf16.msra.mxu0 %v2690_v57  ;;  %2113 = vmatprep.mubr.msk.bf16.mxu0 %vm2415_vm0, %v2414_v1 }
0x1be7   :  { %2111 = vmatprep.subr.bf16.mxu0 %v2414_v1 }
0x1bea   :  { %2112 = vmatpush3.bf16.msra.mxu0 %v2694_v58 }
0x1beb   :  { %2125 = vmatprep.subr.bf16.mxu0 %v2414_v1 }
0x1cb8   :  { %v1373_v21 = vpop.f32.mrb[24].mxu0 }
0x1cb9   :  { %v1379_v22 = vadd.f32 %v1373_v21, %v1331_v20  ;;  %v2099_v23 = vpop.f32.mrb[25].mxu0 }
0x1cba   :  { %v1376_v24 = vpop.f32.mrb[26].mxu0  ;;  %v1550_v23 = vld [vmem:[#allocation2 + $0xa] sm:$0x3] }
0x1cbb   :  { %2263 = vtanh.f32 %v1379_v22  ;;  %v2100_v25 = vpop.f32.mrb[27].mxu0  ;;  %v1928_v27 = vmul.f32 -1.442695, %v1379_v22 }
0x1cbd   :  { %2265 = vpow2.f32 %v1928_v27 }
0x1cc5   :  { %v2264_v26 = vpop.eup %2263 }
0x1cc6   :  { %1389 = vrot.lane.b32.xlu1 %v2264_v26, %s2411_s21 }
0x1cc7   :  { %v2266_v28 = vpop.eup %2265 }
0x1cc8   :  { %v1383_v31 = vadd.f32 1.0, %v2266_v28 }
0x1cca   :  { %2267 = vrcp.f32 %v1383_v31 }
0x1cd4   :  { %v2268_v32 = vpop.eup %2267 }
0x1cd5   :  { %v1387_v35 = vmul.f32 %v2268_v32, %v1324_v13 }
0x1d38   :  { %v1390_v33 = vpop.permute.xlu1 %1389 }
0x1d39   :  { %v1392_v34 = vmul.f32 %v2268_v32, %v1390_v33 }
0x1d3b   :  { %1394 = vrot.lane.b32.xlu0 %v1392_v34, %s2418_s3 }
0x1dad   :  { %v1395_v36 = vpop.permute.xlu0 %1394 }
0x1dae   :  { %v1397_v37 = vadd.f32 %v1395_v36, %v1387_v35 }
0x1db0   :  { %2269 = vtanh.f32 %v1397_v37 }
0x1dba   :  { %v2270_v38 = vpop.eup %2269 }
0x1dbb   :  { %1400 = vrot.lane.b32.xlu1 %v2270_v38, %s2411_s21 }
0x1e2d   :  { %v1401_v39 = vpop.permute.xlu1 %1400 }
0x1e2e   :  { %v1403_v40 = vmul.f32 %v2268_v32, %v1401_v39 }
0x1e30   :  { %v1405_v42 = vpack.c.bf16 %v1403_v40, %v1403_v40 }
0x1e32   :  { %1407 = vrot.lane.b32.xlu0 %v1405_v42, %s2418_s3 }
0x1ea4   :  { %v1408_v43 = vpop.permute.xlu0 %1407 }
0x1ea5   :  { %2106 = vmatmul.mubr.msk.bf16.vlgmr.msra.gmra.mrb[24].mxu1 %vm257_vm2, %v1408_v43 }
0x1ea6   :  { %2118 = vmatpush3.bf16.msra.mxu1 %v2690_v57  ;;  %2121 = vmatprep.mubr.msk.bf16.mxu1 %vm2415_vm0, %v2414_v1 }
0x1ea7   :  { %2119 = vmatprep.subr.bf16.mxu1 %v2414_v1 }
0x1eaa   :  { %2120 = vmatpush3.bf16.msra.mxu1 %v2694_v58 }
0x1eab   :  { %2133 = vmatprep.subr.bf16.mxu1 %v2414_v1 }
0x1f78   :  { %v1446_v45 = vpop.f32.mrb[24].mxu1 }
0x1f79   :  { %v1452_v46 = vadd.f32 %v1446_v45, %v1404_v44  ;;  %v2107_v47 = vpop.f32.mrb[25].mxu1  ;;  %v1623_v45 = vld [vmem:[#allocation2 + $0xc] sm:$0x3] }
0x1f7a   :  { %v1449_v48 = vpop.f32.mrb[26].mxu1 }
0x1f7b   :  { %2271 = vtanh.f32 %v1452_v46  ;;  %v2108_v49 = vpop.f32.mrb[27].mxu1  ;;  %v1930_v51 = vmul.f32 -1.442695, %v1452_v46 }
0x1f7d   :  { %2273 = vpow2.f32 %v1930_v51 }
0x1f85   :  { %v2272_v50 = vpop.eup %2271 }
0x1f86   :  { %1462 = vrot.lane.b32.xlu1 %v2272_v50, %s2411_s21 }
0x1f87   :  { %v2274_v52 = vpop.eup %2273 }
0x1f88   :  { %v1456_v7 = vadd.f32 1.0, %v2274_v52 }
0x1f8a   :  { %2275 = vrcp.f32 %v1456_v7 }
0x1f94   :  { %v2276_v5 = vpop.eup %2275 }
0x1f95   :  { %v1460_v41 = vmul.f32 %v2276_v5, %v1397_v37 }
0x1ff8   :  { %v1463_v54 = vpop.permute.xlu1 %1462 }
0x1ff9   :  { %v1465_v53 = vmul.f32 %v2276_v5, %v1463_v54 }
0x1ffb   :  { %1467 = vrot.lane.b32.xlu0 %v1465_v53, %s2418_s3 }
0x206d   :  { %v1468_v55 = vpop.permute.xlu0 %1467 }
0x206e   :  { %v1470_v30 = vadd.f32 %v1468_v55, %v1460_v41 }
0x2070   :  { %2277 = vtanh.f32 %v1470_v30 }
0x207a   :  { %v2278_v56 = vpop.eup %2277 }
0x207b   :  { %1473 = vrot.lane.b32.xlu1 %v2278_v56, %s2411_s21 }
0x20ed   :  { %v1474_v16 = vpop.permute.xlu1 %1473 }
0x20ee   :  { %v1476_v59 = vmul.f32 %v2276_v5, %v1474_v16 }
0x20f0   :  { %v1478_v60 = vpack.c.bf16 %v1476_v59, %v1476_v59 }
0x20f2   :  { %1480 = vrot.lane.b32.xlu0 %v1478_v60, %s2418_s3 }
0x2164   :  { %v1481_v61 = vpop.permute.xlu0 %1480 }
0x2165   :  { %2114 = vmatmul.mubr.msk.bf16.vlgmr.msra.gmra.mrb[28].mxu0 %vm257_vm2, %v1481_v61 }
0x2166   :  { %2126 = vmatpush3.bf16.msra.mxu0 %v2690_v57  ;;  %2129 = vmatprep.mubr.msk.bf16.mxu0 %vm2415_vm0, %v2414_v1 }
0x2167   :  { %2127 = vmatprep.subr.bf16.mxu0 %v2414_v1 }
0x216a   :  { %2128 = vmatpush3.bf16.msra.mxu0 %v2694_v58 }
0x216b   :  { %2141 = vmatprep.subr.bf16.mxu0 %v2414_v1 }
0x2238   :  { %v1519_v63 = vpop.f32.mrb[28].mxu0 }
0x2239   :  { %v1525_v2 = vadd.f32 %v1519_v63, %v1477_v62  ;;  %v2115_v3 = vpop.f32.mrb[29].mxu0  ;;  %v1696_v63 = vld [vmem:[#allocation2 + $0xe] sm:$0x3] }
0x223a   :  { %v1522_v4 = vpop.f32.mrb[30].mxu0 }
0x223b   :  { %2279 = vtanh.f32 %v1525_v2  ;;  %v2116_v29 = vpop.f32.mrb[31].mxu0  ;;  %v1932_v8 = vmul.f32 -1.442695, %v1525_v2 }
0x223d   :  { %2281 = vpow2.f32 %v1932_v8 }
0x2245   :  { %v2280_v6 = vpop.eup %2279 }
0x2246   :  { %1535 = vrot.lane.b32.xlu1 %v2280_v6, %s2411_s21 }
0x2247   :  { %v2282_v9 = vpop.eup %2281 }
0x2248   :  { %v1529_v10 = vadd.f32 1.0, %v2282_v9 }
0x224a   :  { %2283 = vrcp.f32 %v1529_v10 }
0x2254   :  { %v2284_v11 = vpop.eup %2283 }
0x2255   :  { %v1533_v14 = vmul.f32 %v2284_v11, %v1470_v30 }
0x22b8   :  { %v1536_v12 = vpop.permute.xlu1 %1535 }
0x22b9   :  { %v1538_v13 = vmul.f32 %v2284_v11, %v1536_v12 }
0x22bb   :  { %1540 = vrot.lane.b32.xlu0 %v1538_v13, %s2418_s3 }
0x232d   :  { %v1541_v15 = vpop.permute.xlu0 %1540 }
0x232e   :  { %v1543_v17 = vadd.f32 %v1541_v15, %v1533_v14 }
0x2330   :  { %2285 = vtanh.f32 %v1543_v17 }
0x233a   :  { %v2286_v18 = vpop.eup %2285 }
0x233b   :  { %1546 = vrot.lane.b32.xlu1 %v2286_v18, %s2411_s21 }
0x23ad   :  { %v1547_v19 = vpop.permute.xlu1 %1546 }
0x23ae   :  { %v1549_v20 = vmul.f32 %v2284_v11, %v1547_v19  ;;  %v2181_v19 = vld [vmem:[%s2833_s7] sm:$0xff]  }
0x23b0   :  { %v1551_v21 = vpack.c.bf16 %v1549_v20, %v1549_v20  ;;  %v2182_v20 = vld [vmem:[%s2833_s7 + $0x8] sm:$0xff]   ;;  %s2419_s7 = smov [#allocation10]  }
0x23b2   :  { %1553 = vrot.lane.b32.xlu0 %v1551_v21, %s2418_s3 }
0x2424   :  { %v1554_v22 = vpop.permute.xlu0 %1553 }
0x2425   :  { %2122 = vmatmul.mubr.msk.bf16.vlgmr.msra.gmra.mrb[28].mxu1 %vm257_vm2, %v1554_v22 }
0x2426   :  { %2134 = vmatpush3.bf16.msra.mxu1 %v2690_v57  ;;  %2137 = vmatprep.mubr.msk.bf16.mxu1 %vm2415_vm0, %v2414_v1 }
0x2427   :  { %2135 = vmatprep.subr.bf16.mxu1 %v2414_v1 }
0x242a   :  { %2136 = vmatpush3.bf16.msra.mxu1 %v2694_v58 }
0x24f8   :  { %v1592_v24 = vpop.f32.mrb[28].mxu1 }
0x24f9   :  { %v1598_v25 = vadd.f32 %v1592_v24, %v1550_v23  ;;  %v2123_v26 = vpop.f32.mrb[29].mxu1 }
0x24fa   :  { %v1595_v27 = vpop.f32.mrb[30].mxu1  ;;  %v1840_v26 = vand.u32 127, %v96_v0 }
0x24fb   :  { %2287 = vtanh.f32 %v1598_v25  ;;  %v2124_v28 = vpop.f32.mrb[31].mxu1  ;;  %v1934_v32 = vmul.f32 -1.442695, %v1598_v25  ;;  %v1939_v27 = vld [vmem:[%s2834_s8] ss:$0 sm:$0xff]  ;;  %s1866_s8 = sshll.u32 %s2419_s7, 4  ;;  %s1867_s8 = int_to_ptr.vmem [resolvable:$true] %s1866_s8 }
0x24fc   :  { %vm1841_vm4 = vcmp.lt.s32.totalorder %v1840_v26, 4  ;;  %p2386_p11 = scmp.lt.s32.totalorder %s1867_s8, %s1867_s8 }
0x24fd   :  { %2289 = vpow2.f32 %v1934_v32 }
0x2505   :  { %v2288_v31 = vpop.eup %2287 }
0x2506   :  { %1608 = vrot.lane.b32.xlu1 %v2288_v31, %s2411_s21 }
0x2507   :  { %v2290_v57 = vpop.eup %2289 }
0x2508   :  { %v1602_v33 = vadd.f32 1.0, %v2290_v57 }
0x250a   :  { %2291 = vrcp.f32 %v1602_v33 }
0x2514   :  { %v2292_v34 = vpop.eup %2291 }
0x2515   :  { %v1606_v58 = vmul.f32 %v2292_v34, %v1543_v17 }
0x2578   :  { %v1609_v35 = vpop.permute.xlu1 %1608 }
0x2579   :  { %v1611_v36 = vmul.f32 %v2292_v34, %v1609_v35 }
0x257b   :  { %1613 = vrot.lane.b32.xlu0 %v1611_v36, %s2418_s3 }
0x25ed   :  { %v1614_v37 = vpop.permute.xlu0 %1613 }
0x25ee   :  { %v1616_v38 = vadd.f32 %v1614_v37, %v1606_v58 }
0x25f0   :  { %2293 = vtanh.f32 %v1616_v38 }
0x25fa   :  { %v2294_v39 = vpop.eup %2293 }
0x25fb   :  { %1619 = vrot.lane.b32.xlu1 %v2294_v39, %s2411_s21 }
0x266d   :  { %v1620_v40 = vpop.permute.xlu1 %1619 }
0x266e   :  { %v1622_v42 = vmul.f32 %v2292_v34, %v1620_v40 }
0x2670   :  { %v1624_v43 = vpack.c.bf16 %v1622_v42, %v1622_v42 }
0x2672   :  { %1626 = vrot.lane.b32.xlu0 %v1624_v43, %s2418_s3 }
0x26e4   :  { %v1627_v44 = vpop.permute.xlu0 %1626 }
0x26e5   :  { %2130 = vmatmul.mubr.msk.bf16.vlgmr.msra.gmra.mrb[32].mxu0 %vm257_vm2, %v1627_v44 }
0x26e6   :  { %2145 = vmatprep.mubr.msk.bf16.mxu0 %vm2415_vm0, %v2414_v1  ;;  %2142 = vmatpush3.bf16.msra.mxu0 %v2181_v19 }
0x26e7   :  { %2143 = vmatprep.subr.bf16.mxu0 %v2414_v1 }
0x26ea   :  { %2144 = vmatpush3.bf16.msra.mxu0 %v2182_v20 }
0x27b8   :  { %v1665_v46 = vpop.f32.mrb[32].mxu0 }
0x27b9   :  { %v1671_v47 = vadd.f32 %v1665_v46, %v1623_v45  ;;  %v2131_v48 = vpop.f32.mrb[33].mxu0 }
0x27ba   :  { %v1668_v49 = vpop.f32.mrb[34].mxu0 }
0x27bb   :  { %2295 = vtanh.f32 %v1671_v47  ;;  %v2132_v50 = vpop.f32.mrb[35].mxu0  ;;  %v1936_v52 = vmul.f32 -1.442695, %v1671_v47 }
0x27bd   :  { %2297 = vpow2.f32 %v1936_v52 }
0x27c5   :  { %v2296_v51 = vpop.eup %2295 }
0x27c6   :  { %1681 = vrot.lane.b32.xlu1 %v2296_v51, %s2411_s21 }
0x27c7   :  { %v2298_v7 = vpop.eup %2297 }
0x27c8   :  { %v1675_v5 = vadd.f32 1.0, %v2298_v7 }
0x27ca   :  { %2299 = vrcp.f32 %v1675_v5 }
0x27d4   :  { %v2300_v54 = vpop.eup %2299 }
0x27d5   :  { %v1679_v55 = vmul.f32 %v2300_v54, %v1616_v38 }
0x2838   :  { %v1682_v53 = vpop.permute.xlu1 %1681 }
0x2839   :  { %v1684_v41 = vmul.f32 %v2300_v54, %v1682_v53 }
0x283b   :  { %1686 = vrot.lane.b32.xlu0 %v1684_v41, %s2418_s3 }
0x28ad   :  { %v1687_v30 = vpop.permute.xlu0 %1686 }
0x28ae   :  { %v1689_v56 = vadd.f32 %v1687_v30, %v1679_v55 }
0x28b0   :  { %2301 = vtanh.f32 %v1689_v56 }
0x28ba   :  { %v2302_v16 = vpop.eup %2301 }
0x28bb   :  { %1692 = vrot.lane.b32.xlu1 %v2302_v16, %s2411_s21 }
0x292d   :  { %v1693_v59 = vpop.permute.xlu1 %1692 }
0x292e   :  { %v1695_v60 = vmul.f32 %v2300_v54, %v1693_v59 }
0x2930   :  { %v1697_v61 = vpack.c.bf16 %v1695_v60, %v1695_v60 }
0x2932   :  { %1699 = vrot.lane.b32.xlu0 %v1697_v61, %s2418_s3 }
0x29a4   :  { %v1700_v62 = vpop.permute.xlu0 %1699 }
0x29a5   :  { %2138 = vmatmul.mubr.msk.bf16.vlgmr.msra.gmra.mrb[32].mxu1 %vm257_vm2, %v1700_v62 }
0x2a78   :  { %v1738_v2 = vpop.f32.mrb[32].mxu1 }
0x2a79   :  { %v1744_v3 = vadd.f32 %v1738_v2, %v1696_v63  ;;  %v2139_v4 = vpop.f32.mrb[33].mxu1 }
0x2a7a   :  { %v1741_v29 = vpop.f32.mrb[34].mxu1 }
0x2a7b   :  { %2303 = vtanh.f32 %v1744_v3  ;;  %v2140_v6 = vpop.f32.mrb[35].mxu1  ;;  %v1938_v9 = vmul.f32 -1.442695, %v1744_v3 }
0x2a7d   :  { %2305 = vpow2.f32 %v1938_v9 }
0x2a85   :  { %v2304_v8 = vpop.eup %2303 }
0x2a86   :  { %1754 = vrot.lane.b32.xlu1 %v2304_v8, %s2411_s21 }
0x2a87   :  { %v2306_v10 = vpop.eup %2305 }
0x2a88   :  { %v1748_v11 = vadd.f32 1.0, %v2306_v10 }
0x2a8a   :  { %2307 = vrcp.f32 %v1748_v11 }
0x2a94   :  { %v2308_v12 = vpop.eup %2307 }
0x2a95   :  { %v1752_v15 = vmul.f32 %v2308_v12, %v1689_v56 }
0x2af8   :  { %v1755_v13 = vpop.permute.xlu1 %1754 }
0x2af9   :  { %v1757_v14 = vmul.f32 %v2308_v12, %v1755_v13 }
0x2afb   :  { %1759 = vrot.lane.b32.xlu0 %v1757_v14, %s2418_s3 }
0x2b6d   :  { %v1760_v17 = vpop.permute.xlu0 %1759 }
0x2b6e   :  { %v1762_v18 = vadd.f32 %v1760_v17, %v1752_v15 }
0x2b70   :  { %2309 = vtanh.f32 %v1762_v18 }
0x2b7a   :  { %v2310_v21 = vpop.eup %2309 }
0x2b7b   :  { %1765 = vrot.lane.b32.xlu1 %v2310_v21, %s2411_s21  ;;  %s2381_s21 = scalar_lea.vmem %s1867_s8, 32 }
0x2b7c   :  { %p2382_p10 = scmp.ne.s32.totalorder %s1867_s8, %s2381_s21  ;;  %p2387_p12 = scmp.lt.s32.totalorder %s2381_s21, %s2381_s21 }
0x2b7e   :  { %p2388_p13 = por %p2387_p12, %p2386_p11 }
0x2b80   :  { %p2389_p0 = pnand %p2388_p13, %p2382_p10 }
0x2bed   :  { %v1766_v22 = vpop.permute.xlu1 %1765 }
0x2bee   :  { %v1768_v23 = vmul.f32 %v2308_v12, %v1766_v22 }
0x2bf0   :  { %v1769_v24 = vpack.c.bf16 %v1768_v23, %v1768_v23 }
0x2bf2   :  { %1782 = vrot.lane.b32.xlu0 %v1769_v24, %s2418_s3 }
0x2c64   :  { %v1783_v25 = vpop.permute.xlu0 %1782 }
0x2c65   :  { %2146 = vmatmul.mubr.msk.bf16.vlgmr.msra.gmra.mrb[36].mxu0 %vm257_vm2, %v1783_v25 }
0x2d38   :  { %v1833_v28 = vpop.f32.mrb[36].mxu0 }
0x2d39   :  { %v1834_v1 = vadd.f32 %v1939_v27, %v1833_v28  ;;  %v2147_v31 = vpop.f32.mrb[37].mxu0 }
0x2d3a   :  { %v1836_v32 = vpop.f32.mrb[38].mxu0 }
0x2d3b   :  { %v2148_v57 = vpop.f32.mrb[39].mxu0  ;;  %v1842_v33 = vsel %vm1841_vm4, %v1834_v1, -1e+30 }
0x2d3c   :  { %v1844_v34 = vsel %vm1843_vm5, %v1842_v33, -inf }
0x2d3d   :  { %1845 = vmax.xlane.f32.xlu1 %v1844_v34 }
0x2dca   :  { %v1846_v35 = vpop.xlane.xlu1 %1845 }
0x2dcb   :  { %v1847_v36 = vsub.f32 %v1842_v33, %v1846_v35 }
0x2dcd   :  { %v1848_v58 = vmul.f32 1.442695, %v1847_v36 }
0x2dcf   :  { %2311 = vpow2.f32 %v1848_v58 }
0x2dd9   :  { %v2312_v0 = vpop.eup %2311 }
0x2dda   :  { %v1850_v37 = vsel %vm1843_vm5, %v2312_v0, 0.0 }
0x2ddb   :  { %1851 = vadd.xlane.f32.xlu0 %v1850_v37 }
0x2e68   :  { %v1852_v38 = vpop.xlane.xlu0 %1851 }
0x2e69   :  { %2313 = vrcp.f32 %v1852_v38 }
0x2e73   :  { %v2314_v39 = vpop.eup %2313 }
0x2e74   :  { %v1854_v40 = vmul.f32 %v2314_v39, %v1852_v38 }
0x2e76   :  { %v1855_v42 = vsub.f32 2.0, %v1854_v40 }
0x2e78   :  { %v1856_v43 = vmul.f32 %v2314_v39, %v1855_v42 }
0x2e7a   :  { %v1857_v44 = vmul.f32 %v2312_v0, %v1856_v43 }
0x2e7c   :  { %v1858_v45 = vsel %vm1841_vm4, %v1857_v44, %v1834_v1 }
0x2e7d   :  { %1859 = vst.msk [vmem:[#allocation10] sm:$0x3] %vm1843_vm5, %v1858_v45 }
0x2e7e   :  { %2392 = shalt.err (!%p2389_p0)
}
0x2e7f   :  { %s2393_s30 = scalar_lea.hbm %s2835_s9, 32 }
0x2e80   :  { %p2394_p1 = scmp.ne.s32.totalorder %s2835_s9, %s2393_s30  ;;  %p2397_p2 = scmp.lt.u32.totalorder %s2393_s30, %s2835_s9 }
0x2e82   :  { %p2399_p3 = pnand %p2397_p2, %p2394_p1 }
0x2e84   :  { %2402 = shalt.err (!%p2399_p3)
}
0x2e85   :  { %1869 = dma.vmem_to_hbm [thread:$0]  %s1867_s8, 32, %s2835_s9, [#allocation6]  }
0x2e86   :  { %2407 = dma.done.wait [#allocation6], 32  }
0x2e87   :  { %2408 = vsyncadd [#allocation6], 4294967264 }
0x2e88   :  { %1873 = vsyncpa [#allocation5], 1 }
0x2e89   :  { %1874 = vsyncpa [#allocation8], 1 }
0x2e8a   :  { %1875 = vsyncpa [#allocation6], 1 }

// kernel: tpu_custom_call.1
= control target key start
LH: loop header
LB: loop body
LE: loop exit
PB: predicated region body
PF: predicated region fallthrough
CT: control target
= control target key end

     0   :  { %14 = vsyncpa [#allocation5], 0  ;;  %s2826_s0 = inlined_call_operand.vmem [shape: f32[8,2,16], index: 0, kind: input, shape index: {}]   ;;  %s2827_s1 = inlined_call_operand.hbm [shape: bf16[16,128], index: 1, kind: input, shape index: {}]   ;;  %s2828_s2 = inlined_call_operand.hbm [shape: bf16[32,128], index: 2, kind: input, shape index: {}]   ;;  %s2829_s3 = inlined_call_operand.vmem [shape: f32[1,128], index: 3, kind: input, shape index: {}]   ;;  %s2830_s4 = inlined_call_operand.vmem [shape: bf16[32,128], index: 4, kind: input, shape index: {}]   ;;  %s2831_s5 = inlined_call_operand.hbm [shape: bf16[32,128], index: 5, kind: input, shape index: {}]   ;;  %s2832_s6 = inlined_call_operand.vmem [shape: f32[1,128], index: 6, kind: input, shape index: {}]   ;;  %s2833_s7 = inlined_call_operand.vmem [shape: bf16[32,5], index: 7, kind: input, shape index: {}]   ;;  %s2834_s8 = inlined_call_operand.vmem [shape: f32[1,5], index: 8, kind: input, shape index: {}]   ;;  %s2835_s9 = inlined_call_operand.hbm [shape: f32[2,5], index: 9, kind: output, shape index: {}]  }
   0x1   :  { %15 = vsyncpa [#allocation8], 0 }
   0x2   :  { %16 = vsyncpa [#allocation6], 0  ;;  %s2409_s30 = smov [#allocation7]   ;;  %s2410_s11 = smov [#allocation4]  }
   0x3   :  { %s36_s10 = sshll.u32 %s2409_s30, 4  ;;  %s24_s12 = sshll.u32 %s2410_s11, 4  ;;  %s37_s10 = int_to_ptr.vmem [resolvable:$true] %s36_s10  ;;  %s2470_s12 = int_to_ptr.vmem [resolvable:$true] %s24_s12 }
   0x4   :  { %s2315_s15 = scalar_lea.hbm %s2828_s2, 256 }
   0x5   :  { %p2316_p0 = scmp.ne.s32.totalorder %s2828_s2, %s2315_s15  ;;  %p2319_p1 = scmp.lt.u32.totalorder %s2315_s15, %s2828_s2 }
   0x7   :  { %p2321_p2 = pnand %p2319_p1, %p2316_p0 }
   0x9   :  { %2324 = shalt.err (!%p2321_p2)
}
   0xa   :  { %s2325_s20 = scalar_lea.vmem %s37_s10, 256  ;;  %p2330_p4 = scmp.lt.s32.totalorder %s37_s10, %s37_s10 }
   0xb   :  { %p2326_p3 = scmp.ne.s32.totalorder %s37_s10, %s2325_s20  ;;  %p2331_p5 = scmp.lt.s32.totalorder %s2325_s20, %s2325_s20 }
   0xd   :  { %p2332_p6 = por %p2331_p5, %p2330_p4 }
   0xf   :  { %p2333_p7 = pnand %p2332_p6, %p2326_p3 }
  0x11   :  { %2336 = shalt.err (!%p2333_p7)
}
  0x12   :  { %s2411_s21 = smov 64   ;;  %s2412_s22 = smov 4  }
  0x13   :  { %42 = dma.hbm_to_vmem [thread:$0]  %s2828_s2, 256, %s37_s10, [#allocation8], %s2411_s21, %s2411_s21, %s2412_s22  }
  0x14   :  { %s2337_s27 = scalar_lea.hbm %s2827_s1, 128 }
  0x15   :  { %p2338_p8 = scmp.ne.s32.totalorder %s2827_s1, %s2337_s27  ;;  %p2341_p9 = scmp.lt.u32.totalorder %s2337_s27, %s2827_s1 }
  0x17   :  { %p2343_p10 = pnand %p2341_p9, %p2338_p8 }
  0x19   :  { %2346 = shalt.err (!%p2343_p10)
}
  0x1a   :  { %s2347_s13 = scalar_lea.vmem %s2470_s12, 128  ;;  %p2352_p12 = scmp.lt.s32.totalorder %s2470_s12, %s2470_s12 }
  0x1b   :  { %p2348_p11 = scmp.ne.s32.totalorder %s2470_s12, %s2347_s13  ;;  %p2353_p13 = scmp.lt.s32.totalorder %s2347_s13, %s2347_s13 }
  0x1d   :  { %p2354_p0 = por %p2353_p13, %p2352_p12 }
  0x1f   :  { %p2355_p1 = pnand %p2354_p0, %p2348_p11 }
  0x21   :  { %2358 = shalt.err (!%p2355_p1)
}
  0x22   :  { %30 = dma.hbm_to_vmem [thread:$0]  %s2827_s1, 128, %s2470_s12, [#allocation5], %s2411_s21, %s2411_s21, %s2412_s22  }
  0x23   :  { %s2413_s14 = smov [#allocation9]   ;;  %s2359_s18 = scalar_lea.hbm %s2831_s5, 256 }
  0x24   :  { %s52_s15 = sshll.u32 %s2413_s14, 4  ;;  %p2360_p2 = scmp.ne.s32.totalorder %s2831_s5, %s2359_s18  ;;  %s53_s15 = int_to_ptr.vmem [resolvable:$true] %s52_s15 }
  0x25   :  { %p2363_p3 = scmp.lt.u32.totalorder %s2359_s18, %s2831_s5 }
  0x27   :  { %p2365_p4 = pnand %p2363_p3, %p2360_p2 }
  0x29   :  { %2368 = shalt.err (!%p2365_p4)
}
  0x2a   :  { %s2369_s25 = scalar_lea.vmem %s53_s15, 256  ;;  %p2374_p6 = scmp.lt.s32.totalorder %s53_s15, %s53_s15 }
  0x2b   :  { %p2370_p5 = scmp.ne.s32.totalorder %s53_s15, %s2369_s25  ;;  %p2375_p7 = scmp.lt.s32.totalorder %s2369_s25, %s2369_s25 }
  0x2d   :  { %p2376_p8 = por %p2375_p7, %p2374_p6 }
  0x2f   :  { %p2377_p9 = pnand %p2376_p8, %p2370_p5 }
  0x31   :  { %2380 = shalt.err (!%p2377_p9)
}
  0x32   :  { %58 = dma.hbm_to_vmem [thread:$0]  %s2831_s5, 256, %s53_s15, [#allocation8], %s2411_s21, %s2411_s21, %s2412_s22  }
  0x33   :  { %2403 = dma.done.wait [#allocation5], 128  }
  0x34   :  { %2404 = vsyncadd [#allocation5], 4294967168 }
  0x35   :  { %2405 = dma.done.wait [#allocation8], 512  }
  0x36   :  { %2406 = vsyncadd [#allocation8], 4294966784  ;;  %v96_v0 = vlaneseq  ;;  %v2414_v1 = vmov 0.0   ;;  %vm2415_vm0 = vmmov 0   ;;  %v2416_v2 = vmov 1983009808  }
  0x37   :  { %1999 = vmatprep.subr.bf16.mxu0 %v2414_v1  ;;  %2001 = vmatprep.mubr.msk.bf16.mxu0 %vm2415_vm0, %v2414_v1  ;;  %v94_v3 = vunpack.c.l.s4 %v2416_v2  ;;  %v2160_v6 = vld [vmem:[#allocation4] sm:$0xff]   ;;  %v79_v12 = vld [vmem:[%s2826_s0 + $0x8] sm:$0x3]  ;;  %v80_v13 = vld [vmem:[%s2826_s0 + $0xa] sm:$0x3]  ;;  %vm143_vm1 = vcmask 130048  }
  0x38   :  { %2005 = vmatprep.subr.bf16.mxu1 %v2414_v1  ;;  %2009 = vmatprep.mubr.msk.bf16.mxu1 %vm2415_vm0, %v2414_v1  ;;  %v97_v5 = vshrl.u32 %v96_v0, 7  ;;  %v75_v8 = vld [vmem:[%s2826_s0] sm:$0x3]  ;;  %v76_v9 = vld [vmem:[%s2826_s0 + $0x2] sm:$0x3]  ;;  %v108_v18 = vcombine.low %v79_v12, %v80_v13  ;;  %v2161_v21 = vld [vmem:[#allocation7] sm:$0xff]  }
  0x39   :  { %v95_v4 = vunpack.c.0.s8 %v94_v3  ;;  %v77_v10 = vld [vmem:[%s2826_s0 + $0x4] sm:$0x3]  ;;  %2000 = vmatpush3.bf16.msra.mxu0 %v2160_v6  ;;  %v78_v11 = vld [vmem:[%s2826_s0 + $0x6] sm:$0x3]  ;;  %v91_v14 = vcombine.low %v75_v8, %v76_v9  ;;  %v81_v15 = vld [vmem:[%s2826_s0 + $0xc] sm:$0x3]  ;;  %2006 = vmatpush3.bf16.msra.mxu1 %v2161_v21 }
  0x3a   :  { %v82_v16 = vld [vmem:[%s2826_s0 + $0xe] sm:$0x3]  ;;  %v92_v17 = vcombine.low %v77_v10, %v78_v11  ;;  %2013 = vmatprep.subr.bf16.mxu0 %v2414_v1  ;;  %v2162_v24 = vld [vmem:[#allocation7 + $0x8] sm:$0xff]   ;;  %2007 = vmatprep.subr.bf16.mxu1 %v2414_v1  ;;  %v2417_v29 = vmov 0   ;;  %v1876_v30 = vld [vmem:[%s2829_s3] ss:$0 sm:$0xff] }
  0x3b   :  { %v2529_v7 = vsub.s32 %v95_v4, %v97_v5  ;;  %v109_v20 = vcombine.low %v81_v15, %v82_v16  ;;  %s2418_s3 = smov 32   ;;  %v2163_v63 = vld [vmem:[#allocation7] sm:$0xff]   ;;  %v2164_v2 = vld [vmem:[#allocation7 + $0x8] sm:$0xff]   ;;  %vm257_vm2 = vcmask 261120   ;;  %vm330_vm3 = vcmask 254976  }
  0x3c   :  { %vm1843_vm5 = vcmask 33792  }
  0x3d   :  { %v99_v19 = vrot.slane %v91_v14, %v2529_v7  ;;  %v106_v22 = vrot.slane %v92_v17, %v2529_v7  ;;  %v116_v23 = vrot.slane %v108_v18, %v2529_v7  ;;  %v123_v25 = vrot.slane %v109_v20, %v2529_v7  ;;  %2008 = vmatpush3.bf16.msra.mxu1 %v2162_v24 }
  0x3e   :  { %2021 = vmatprep.subr.bf16.mxu1 %v2414_v1 }
  0x3f   :  { %v107_v26 = vcombine.low %v99_v19, %v106_v22  ;;  %v124_v27 = vcombine.low %v116_v23, %v123_v25  ;;  %v2165_v25 = vld [vmem:[#allocation7] sm:$0xff]  }
  0x40   :  { %2010 = vmatmul.mubr.bf16.vlgmr.msra.gmra.mrb[0].mxu1 %v2417_v29 }
  0x41   :  { %v127_v28 = vpack.c.bf16 %v124_v27, %v107_v26  ;;  %2025 = vmatprep.mubr.msk.bf16.mxu1 %vm2415_vm0, %v2414_v1  ;;  %2022 = vmatpush3.bf16.msra.mxu1 %v2165_v25  ;;  %v2166_v26 = vld [vmem:[#allocation7 + $0x8] sm:$0xff]  }
  0x42   :  { %2023 = vmatprep.subr.bf16.mxu1 %v2414_v1 }
  0x43   :  { %2002 = vmatmul.mubr.msk.bf16.vlgmr.msra.gmra.mrb[0].mxu0 %vm143_vm1, %v127_v28 }
  0x44   :  { %2017 = vmatprep.mubr.msk.bf16.mxu0 %vm2415_vm0, %v2414_v1  ;;  %2014 = vmatpush3.bf16.msra.mxu0 %v2163_v63 }
  0x45   :  { %2015 = vmatprep.subr.bf16.mxu0 %v2414_v1  ;;  %2024 = vmatpush3.bf16.msra.mxu1 %v2166_v26 }
  0x46   :  { %2037 = vmatprep.subr.bf16.mxu1 %v2414_v1 }
  0x48   :  { %2016 = vmatpush3.bf16.msra.mxu0 %v2164_v2 }
  0x49   :  { %2029 = vmatprep.subr.bf16.mxu0 %v2414_v1 }
 0x113   :  { %v295_v34 = vpop.f32.mrb[0].mxu1 }
 0x114   :  { %v2011_v36 = vpop.f32.mrb[1].mxu1 }
 0x115   :  { %v298_v41 = vpop.f32.mrb[2].mxu1 }
 0x116   :  { %v181_v31 = vpop.f32.mrb[0].mxu0  ;;  %v2012_v42 = vpop.f32.mrb[3].mxu1 }
 0x117   :  { %v182_v32 = vadd.f32 %v1876_v30, %v181_v31  ;;  %v2003_v33 = vpop.f32.mrb[1].mxu0 }
 0x118   :  { %v184_v35 = vpop.f32.mrb[2].mxu0 }
 0x119   :  { %v190_v37 = vcombine.high %v182_v32, %v182_v32  ;;  %v197_v38 = vrot.slane %v182_v32, %v2529_v7  ;;  %1879 = vst.sshfl [vmem:[#allocation2] sm:$0x3 pattern:$0x76325410] %v182_v32  ;;  %v185_v39 = vadd.f32 %v1876_v30, %v184_v35  ;;  %v2004_v40 = vpop.f32.mrb[3].mxu0 }
 0x11b   :  { %v204_v43 = vrot.slane %v190_v37, %v2529_v7  ;;  %v205_v44 = vcombine.high %v197_v38, %v197_v38  ;;  %1880 = vst.sshfl [vmem:[#allocation2 + $0x4] sm:$0x3 pattern:$0x76325410] %v190_v37  ;;  %v207_v45 = vcombine.high %v185_v39, %v185_v39  ;;  %v214_v46 = vrot.slane %v185_v39, %v2529_v7 }
 0x11c   :  { %1881 = vst.sshfl [vmem:[#allocation2 + $0x8] sm:$0x3 pattern:$0x76325410] %v185_v39 }
 0x11d   :  { %v206_v47 = vcombine.high %v204_v43, %v204_v43  ;;  %233 = vst [vmem:[#allocation2 + $0x2] sm:$0x3] %v205_v44  ;;  %v221_v48 = vrot.slane %v207_v45, %v2529_v7  ;;  %v222_v49 = vcombine.high %v214_v46, %v214_v46  ;;  %1882 = vst.sshfl [vmem:[#allocation2 + $0xc] sm:$0x3 pattern:$0x76325410] %v207_v45 }
 0x11f   :  { %235 = vst [vmem:[#allocation2 + $0x6] sm:$0x3] %v206_v47  ;;  %v223_v50 = vcombine.high %v221_v48, %v221_v48  ;;  %237 = vst [vmem:[#allocation2 + $0xa] sm:$0x3] %v222_v49  ;;  %v2167_v49 = vld [vmem:[#allocation7] sm:$0xff]  }
 0x120   :  { %v240_v51 = vld [vmem:[#allocation2] sm:$0x3] }
 0x121   :  { %239 = vst [vmem:[#allocation2 + $0xe] sm:$0x3] %v223_v50  ;;  %v301_v52 = vadd.f32 %v295_v34, %v240_v51  ;;  %v2168_v50 = vld [vmem:[#allocation7 + $0x8] sm:$0xff]  }
 0x122   :  { %v429_v33 = vld [vmem:[#allocation2 + $0x4] sm:$0x3] }
 0x123   :  { %2183 = vtanh.f32 %v301_v52  ;;  %v1885_v54 = vmul.f32 -1.442695, %v301_v52 }
 0x124   :  { %v333_v9 = vld [vmem:[#allocation2 + $0x2] sm:$0x3] }
 0x125   :  { %2185 = vpow2.f32 %v1885_v54 }
 0x12d   :  { %v2184_v53 = vpop.eup %2183 }
 0x12e   :  { %311 = vrot.lane.b32.xlu0 %v2184_v53, %s2411_s21 }
 0x12f   :  { %v2186_v55 = vpop.eup %2185 }
 0x130   :  { %v305_v56 = vadd.f32 1.0, %v2186_v55 }
 0x132   :  { %2187 = vrcp.f32 %v305_v56  ;;  %v525_v56 = vld [vmem:[#allocation2 + $0x6] sm:$0x3] }
 0x13c   :  { %v2188_v57 = vpop.eup %2187 }
 0x13d   :  { %v309_v60 = vmul.f32 0.0, %v2188_v57 }
 0x1a0   :  { %v312_v58 = vpop.permute.xlu0 %311 }
 0x1a1   :  { %v314_v59 = vmul.f32 %v2188_v57, %v312_v58 }
 0x1a3   :  { %316 = vrot.lane.b32.xlu0 %v314_v59, %s2418_s3 }
 0x215   :  { %v317_v61 = vpop.permute.xlu0 %316 }
 0x216   :  { %v319_v62 = vadd.f32 %v317_v61, %v309_v60 }
 0x218   :  { %2189 = vtanh.f32 %v319_v62 }
 0x222   :  { %v2190_v3 = vpop.eup %2189 }
 0x223   :  { %322 = vrot.lane.b32.xlu1 %v2190_v3, %s2411_s21 }
 0x295   :  { %v323_v4 = vpop.permute.xlu1 %322 }
 0x296   :  { %v2579_v5 = vmul.f32 %v2188_v57, %v323_v4 }
 0x298   :  { %v334_v6 = vpack.c.bf16 %v2579_v5, %v2579_v5 }
 0x29a   :  { %340 = vrot.lane.b32.xlu1 %v334_v6, %s2418_s3 }
 0x30c   :  { %v341_v8 = vpop.permute.xlu1 %340 }
 0x30d   :  { %2018 = vmatmul.mubr.msk.bf16.vlgmr.msra.gmra.mrb[4].mxu0 %vm257_vm2, %v341_v8 }
 0x30e   :  { %2033 = vmatprep.mubr.msk.bf16.mxu0 %vm2415_vm0, %v2414_v1  ;;  %2030 = vmatpush3.bf16.msra.mxu0 %v2167_v49 }
 0x30f   :  { %2031 = vmatprep.subr.bf16.mxu0 %v2414_v1 }
 0x312   :  { %2032 = vmatpush3.bf16.msra.mxu0 %v2168_v50 }
 0x313   :  { %2045 = vmatprep.subr.bf16.mxu0 %v2414_v1 }
 0x3e0   :  { %v391_v10 = vpop.f32.mrb[4].mxu0 }
 0x3e1   :  { %v397_v11 = vadd.f32 %v391_v10, %v333_v9  ;;  %v2019_v12 = vpop.f32.mrb[5].mxu0 }
 0x3e2   :  { %v394_v13 = vpop.f32.mrb[6].mxu0  ;;  %v2169_v12 = vld [vmem:[#allocation7] sm:$0xff]  }
 0x3e3   :  { %2191 = vtanh.f32 %v397_v11  ;;  %v2020_v14 = vpop.f32.mrb[7].mxu0  ;;  %v1889_v16 = vmul.f32 -1.442695, %v397_v11  ;;  %v2170_v13 = vld [vmem:[#allocation7 + $0x8] sm:$0xff]  }
 0x3e5   :  { %2193 = vpow2.f32 %v1889_v16 }
 0x3ed   :  { %v2192_v15 = vpop.eup %2191 }
 0x3ee   :  { %407 = vrot.lane.b32.xlu0 %v2192_v15, %s2411_s21 }
 0x3ef   :  { %v2194_v17 = vpop.eup %2193 }
 0x3f0   :  { %v401_v18 = vadd.f32 1.0, %v2194_v17 }
 0x3f2   :  { %2195 = vrcp.f32 %v401_v18 }
 0x3fc   :  { %v2196_v19 = vpop.eup %2195 }
 0x3fd   :  { %v405_v22 = vmul.f32 %v2196_v19, %v319_v62 }
 0x460   :  { %v408_v20 = vpop.permute.xlu0 %407 }
 0x461   :  { %v410_v21 = vmul.f32 %v2196_v19, %v408_v20 }
 0x463   :  { %412 = vrot.lane.b32.xlu1 %v410_v21, %s2418_s3 }
 0x4d5   :  { %v413_v23 = vpop.permute.xlu1 %412 }
 0x4d6   :  { %v415_v24 = vadd.f32 %v413_v23, %v405_v22 }
 0x4d8   :  { %2197 = vtanh.f32 %v415_v24 }
 0x4e2   :  { %v2198_v27 = vpop.eup %2197 }
 0x4e3   :  { %418 = vrot.lane.b32.xlu0 %v2198_v27, %s2411_s21 }
 0x555   :  { %v419_v28 = vpop.permute.xlu0 %418 }
 0x556   :  { %v2592_v30 = vmul.f32 %v2196_v19, %v419_v28  ;;  %v621_v19 = vld [vmem:[#allocation2 + $0x8] sm:$0x3] }
 0x558   :  { %v430_v31 = vpack.c.bf16 %v2592_v30, %v2592_v30 }
 0x55a   :  { %436 = vrot.lane.b32.xlu1 %v430_v31, %s2418_s3 }
 0x5cc   :  { %v437_v32 = vpop.permute.xlu1 %436 }
 0x5cd   :  { %2026 = vmatmul.mubr.msk.bf16.vlgmr.msra.gmra.mrb[4].mxu1 %vm257_vm2, %v437_v32 }
 0x5ce   :  { %2041 = vmatprep.mubr.msk.bf16.mxu1 %vm2415_vm0, %v2414_v1  ;;  %2038 = vmatpush3.bf16.msra.mxu1 %v2169_v12 }
 0x5cf   :  { %2039 = vmatprep.subr.bf16.mxu1 %v2414_v1 }
 0x5d2   :  { %2040 = vmatpush3.bf16.msra.mxu1 %v2170_v13 }
 0x5d3   :  { %2053 = vmatprep.subr.bf16.mxu1 %v2414_v1 }
 0x6a0   :  { %v487_v34 = vpop.f32.mrb[4].mxu1 }
 0x6a1   :  { %v493_v35 = vadd.f32 %v487_v34, %v429_v33  ;;  %v2027_v36 = vpop.f32.mrb[5].mxu1 }
 0x6a2   :  { %v490_v37 = vpop.f32.mrb[6].mxu1 }
 0x6a3   :  { %2199 = vtanh.f32 %v493_v35  ;;  %v2028_v38 = vpop.f32.mrb[7].mxu1  ;;  %v1893_v40 = vmul.f32 -1.442695, %v493_v35  ;;  %v2171_v37 = vld [vmem:[#allocation7] sm:$0xff]  }
 0x6a4   :  { %v2172_v38 = vld [vmem:[#allocation7 + $0x8] sm:$0xff]  }
 0x6a5   :  { %2201 = vpow2.f32 %v1893_v40 }
 0x6ad   :  { %v2200_v39 = vpop.eup %2199 }
 0x6ae   :  { %503 = vrot.lane.b32.xlu0 %v2200_v39, %s2411_s21 }
 0x6af   :  { %v2202_v41 = vpop.eup %2201 }
 0x6b0   :  { %v497_v42 = vadd.f32 1.0, %v2202_v41 }
 0x6b2   :  { %2203 = vrcp.f32 %v497_v42 }
 0x6bc   :  { %v2204_v43 = vpop.eup %2203 }
 0x6bd   :  { %v501_v46 = vmul.f32 %v2204_v43, %v415_v24 }
 0x720   :  { %v504_v44 = vpop.permute.xlu0 %503 }
 0x721   :  { %v506_v45 = vmul.f32 %v2204_v43, %v504_v44  ;;  %v717_v44 = vld [vmem:[#allocation2 + $0xa] sm:$0x3] }
 0x723   :  { %508 = vrot.lane.b32.xlu1 %v506_v45, %s2418_s3 }
 0x795   :  { %v509_v47 = vpop.permute.xlu1 %508 }
 0x796   :  { %v511_v48 = vadd.f32 %v509_v47, %v501_v46 }
 0x798   :  { %2205 = vtanh.f32 %v511_v48 }
 0x7a2   :  { %v2206_v51 = vpop.eup %2205 }
 0x7a3   :  { %514 = vrot.lane.b32.xlu0 %v2206_v51, %s2411_s21 }
 0x815   :  { %v515_v52 = vpop.permute.xlu0 %514 }
 0x816   :  { %v2605_v53 = vmul.f32 %v2204_v43, %v515_v52 }
 0x818   :  { %v526_v54 = vpack.c.bf16 %v2605_v53, %v2605_v53 }
 0x81a   :  { %532 = vrot.lane.b32.xlu1 %v526_v54, %s2418_s3 }
 0x88c   :  { %v533_v55 = vpop.permute.xlu1 %532 }
 0x88d   :  { %2034 = vmatmul.mubr.msk.bf16.vlgmr.msra.gmra.mrb[8].mxu0 %vm257_vm2, %v533_v55 }
 0x88e   :  { %2049 = vmatprep.mubr.msk.bf16.mxu0 %vm2415_vm0, %v2414_v1  ;;  %2046 = vmatpush3.bf16.msra.mxu0 %v2171_v37 }
 0x88f   :  { %2047 = vmatprep.subr.bf16.mxu0 %v2414_v1 }
 0x892   :  { %2048 = vmatpush3.bf16.msra.mxu0 %v2172_v38 }
 0x893   :  { %2061 = vmatprep.subr.bf16.mxu0 %v2414_v1 }
 0x960   :  { %v583_v57 = vpop.f32.mrb[8].mxu0 }
 0x961   :  { %v589_v58 = vadd.f32 %v583_v57, %v525_v56  ;;  %v2035_v59 = vpop.f32.mrb[9].mxu0 }
 0x962   :  { %v586_v60 = vpop.f32.mrb[10].mxu0 }
 0x963   :  { %2207 = vtanh.f32 %v589_v58  ;;  %v2036_v61 = vpop.f32.mrb[11].mxu0  ;;  %v1897_v63 = vmul.f32 -1.442695, %v589_v58 }
 0x964   :  { %v2173_v61 = vld [vmem:[#allocation7] sm:$0xff]  }
 0x965   :  { %2209 = vpow2.f32 %v1897_v63 }
 0x96d   :  { %v2208_v62 = vpop.eup %2207 }
 0x96e   :  { %599 = vrot.lane.b32.xlu0 %v2208_v62, %s2411_s21  ;;  %v2174_v62 = vld [vmem:[#allocation7 + $0x8] sm:$0xff]  }
 0x96f   :  { %v2210_v2 = vpop.eup %2209 }
 0x970   :  { %v593_v3 = vadd.f32 1.0, %v2210_v2 }
 0x972   :  { %2211 = vrcp.f32 %v593_v3 }
 0x97c   :  { %v2212_v4 = vpop.eup %2211 }
 0x97d   :  { %v597_v9 = vmul.f32 %v2212_v4, %v511_v48 }
 0x9e0   :  { %v600_v6 = vpop.permute.xlu0 %599 }
 0x9e1   :  { %v602_v8 = vmul.f32 %v2212_v4, %v600_v6 }
 0x9e3   :  { %604 = vrot.lane.b32.xlu1 %v602_v8, %s2418_s3  ;;  %v813_v8 = vld [vmem:[#allocation2 + $0xc] sm:$0x3] }
 0xa55   :  { %v605_v10 = vpop.permute.xlu1 %604 }
 0xa56   :  { %v607_v11 = vadd.f32 %v605_v10, %v597_v9 }
 0xa58   :  { %2213 = vtanh.f32 %v607_v11 }
 0xa62   :  { %v2214_v14 = vpop.eup %2213 }
 0xa63   :  { %610 = vrot.lane.b32.xlu0 %v2214_v14, %s2411_s21 }
 0xad5   :  { %v611_v15 = vpop.permute.xlu0 %610 }
 0xad6   :  { %v2618_v16 = vmul.f32 %v2212_v4, %v611_v15 }
 0xad8   :  { %v622_v17 = vpack.c.bf16 %v2618_v16, %v2618_v16 }
 0xada   :  { %628 = vrot.lane.b32.xlu1 %v622_v17, %s2418_s3 }
 0xb4c   :  { %v629_v18 = vpop.permute.xlu1 %628 }
 0xb4d   :  { %2042 = vmatmul.mubr.msk.bf16.vlgmr.msra.gmra.mrb[8].mxu1 %vm257_vm2, %v629_v18 }
 0xb4e   :  { %2057 = vmatprep.mubr.msk.bf16.mxu1 %vm2415_vm0, %v2414_v1  ;;  %2054 = vmatpush3.bf16.msra.mxu1 %v2173_v61 }
 0xb4f   :  { %2055 = vmatprep.subr.bf16.mxu1 %v2414_v1 }
 0xb52   :  { %2056 = vmatpush3.bf16.msra.mxu1 %v2174_v62 }
 0xb53   :  { %2069 = vmatprep.subr.bf16.mxu1 %v2414_v1 }
 0xc20   :  { %v679_v20 = vpop.f32.mrb[8].mxu1 }
 0xc21   :  { %v685_v21 = vadd.f32 %v679_v20, %v621_v19  ;;  %v2043_v22 = vpop.f32.mrb[9].mxu1 }
 0xc22   :  { %v682_v23 = vpop.f32.mrb[10].mxu1 }
 0xc23   :  { %2215 = vtanh.f32 %v685_v21  ;;  %v2044_v24 = vpop.f32.mrb[11].mxu1  ;;  %v1901_v26 = vmul.f32 -1.442695, %v685_v21 }
 0xc25   :  { %2217 = vpow2.f32 %v1901_v26  ;;  %v2176_v26 = vld [vmem:[#allocation7 + $0x8] sm:$0xff]  }
 0xc2d   :  { %v2216_v25 = vpop.eup %2215 }
 0xc2e   :  { %695 = vrot.lane.b32.xlu0 %v2216_v25, %s2411_s21  ;;  %v2175_v25 = vld [vmem:[#allocation7] sm:$0xff]  }
 0xc2f   :  { %v2218_v27 = vpop.eup %2217 }
 0xc30   :  { %v689_v28 = vadd.f32 1.0, %v2218_v27 }
 0xc32   :  { %2219 = vrcp.f32 %v689_v28 }
 0xc3c   :  { %v2220_v31 = vpop.eup %2219 }
 0xc3d   :  { %v693_v34 = vmul.f32 %v2220_v31, %v607_v11 }
 0xca0   :  { %v696_v32 = vpop.permute.xlu0 %695 }
 0xca1   :  { %v698_v33 = vmul.f32 %v2220_v31, %v696_v32 }
 0xca3   :  { %700 = vrot.lane.b32.xlu1 %v698_v33, %s2418_s3 }
 0xd15   :  { %v701_v35 = vpop.permute.xlu1 %700 }
 0xd16   :  { %v703_v36 = vadd.f32 %v701_v35, %v693_v34  ;;  %v909_v34 = vld [vmem:[#allocation2 + $0xe] sm:$0x3] }
 0xd18   :  { %2221 = vtanh.f32 %v703_v36 }
 0xd22   :  { %v2222_v39 = vpop.eup %2221 }
 0xd23   :  { %706 = vrot.lane.b32.xlu0 %v2222_v39, %s2411_s21 }
 0xd95   :  { %v707_v40 = vpop.permute.xlu0 %706 }
 0xd96   :  { %v2631_v41 = vmul.f32 %v2220_v31, %v707_v40 }
 0xd98   :  { %v718_v42 = vpack.c.bf16 %v2631_v41, %v2631_v41 }
 0xd9a   :  { %724 = vrot.lane.b32.xlu1 %v718_v42, %s2418_s3 }
 0xe0c   :  { %v725_v43 = vpop.permute.xlu1 %724 }
 0xe0d   :  { %2050 = vmatmul.mubr.msk.bf16.vlgmr.msra.gmra.mrb[12].mxu0 %vm257_vm2, %v725_v43 }
 0xe0e   :  { %2065 = vmatprep.mubr.msk.bf16.mxu0 %vm2415_vm0, %v2414_v1  ;;  %2062 = vmatpush3.bf16.msra.mxu0 %v2175_v25  ;;  %v1914_v25 = vld [vmem:[%s2832_s6] ss:$0 sm:$0xff] }
 0xe0f   :  { %2063 = vmatprep.subr.bf16.mxu0 %v2414_v1 }
 0xe12   :  { %2064 = vmatpush3.bf16.msra.mxu0 %v2176_v26 }
 0xe13   :  { %2077 = vmatprep.subr.bf16.mxu0 %v2414_v1 }
 0xee0   :  { %v775_v45 = vpop.f32.mrb[12].mxu0 }
 0xee1   :  { %v781_v46 = vadd.f32 %v775_v45, %v717_v44  ;;  %v2051_v47 = vpop.f32.mrb[13].mxu0 }
 0xee2   :  { %v778_v48 = vpop.f32.mrb[14].mxu0 }
 0xee3   :  { %2223 = vtanh.f32 %v781_v46  ;;  %v2052_v49 = vpop.f32.mrb[15].mxu0  ;;  %v1905_v51 = vmul.f32 -1.442695, %v781_v46 }
 0xee5   :  { %2225 = vpow2.f32 %v1905_v51 }
 0xeed   :  { %v2224_v50 = vpop.eup %2223 }
 0xeee   :  { %791 = vrot.lane.b32.xlu0 %v2224_v50, %s2411_s21 }
 0xeef   :  { %v2226_v52 = vpop.eup %2225 }
 0xef0   :  { %v785_v54 = vadd.f32 1.0, %v2226_v52 }
 0xef2   :  { %2227 = vrcp.f32 %v785_v54 }
 0xefc   :  { %v2228_v55 = vpop.eup %2227 }
 0xefd   :  { %v789_v58 = vmul.f32 %v2228_v55, %v703_v36 }
 0xf60   :  { %v792_v56 = vpop.permute.xlu0 %791 }
 0xf61   :  { %v794_v57 = vmul.f32 %v2228_v55, %v792_v56 }
 0xf63   :  { %796 = vrot.lane.b32.xlu1 %v794_v57, %s2418_s3  ;;  %v2690_v57 = vld [vmem:[#allocation9] sm:$0xff]  }
 0xfd5   :  { %v797_v59 = vpop.permute.xlu1 %796 }
 0xfd6   :  { %v799_v60 = vadd.f32 %v797_v59, %v789_v58  ;;  %v2694_v58 = vld [vmem:[#allocation9 + $0x8] sm:$0xff]  }
 0xfd8   :  { %2229 = vtanh.f32 %v799_v60 }
 0xfe2   :  { %v2230_v63 = vpop.eup %2229 }
 0xfe3   :  { %802 = vrot.lane.b32.xlu0 %v2230_v63, %s2411_s21 }
0x1055   :  { %v803_v2 = vpop.permute.xlu0 %802 }
0x1056   :  { %v2644_v3 = vmul.f32 %v2228_v55, %v803_v2  ;;  %v2178_v55 = vld [vmem:[%s2830_s4 + $0x8] sm:$0xff]  }
0x1058   :  { %v814_v4 = vpack.c.bf16 %v2644_v3, %v2644_v3 }
0x105a   :  { %820 = vrot.lane.b32.xlu1 %v814_v4, %s2418_s3 }
0x10cc   :  { %v821_v6 = vpop.permute.xlu1 %820 }
0x10cd   :  { %2058 = vmatmul.mubr.msk.bf16.vlgmr.msra.gmra.mrb[12].mxu1 %vm257_vm2, %v821_v6 }
0x10ce   :  { %2073 = vmatprep.mubr.msk.bf16.mxu1 %vm2415_vm0, %v2414_v1 }
0x11a0   :  { %v871_v9 = vpop.f32.mrb[12].mxu1 }
0x11a1   :  { %v877_v10 = vadd.f32 %v871_v9, %v813_v8  ;;  %v2059_v11 = vpop.f32.mrb[13].mxu1 }
0x11a2   :  { %v874_v12 = vpop.f32.mrb[14].mxu1 }
0x11a3   :  { %2231 = vtanh.f32 %v877_v10  ;;  %v2060_v13 = vpop.f32.mrb[15].mxu1  ;;  %v1909_v15 = vmul.f32 -1.442695, %v877_v10 }
0x11a5   :  { %2233 = vpow2.f32 %v1909_v15 }
0x11ad   :  { %v2232_v14 = vpop.eup %2231 }
0x11ae   :  { %887 = vrot.lane.b32.xlu0 %v2232_v14, %s2411_s21 }
0x11af   :  { %v2234_v17 = vpop.eup %2233 }
0x11b0   :  { %v881_v18 = vadd.f32 1.0, %v2234_v17 }
0x11b2   :  { %2235 = vrcp.f32 %v881_v18 }
0x11bc   :  { %v2236_v19 = vpop.eup %2235 }
0x11bd   :  { %v885_v22 = vmul.f32 %v2236_v19, %v799_v60 }
0x1220   :  { %v888_v20 = vpop.permute.xlu0 %887 }
0x1221   :  { %v890_v21 = vmul.f32 %v2236_v19, %v888_v20 }
0x1223   :  { %892 = vrot.lane.b32.xlu1 %v890_v21, %s2418_s3 }
0x1295   :  { %v893_v23 = vpop.permute.xlu1 %892 }
0x1296   :  { %v895_v24 = vadd.f32 %v893_v23, %v885_v22 }
0x1298   :  { %2237 = vtanh.f32 %v895_v24 }
0x12a2   :  { %v2238_v27 = vpop.eup %2237 }
0x12a3   :  { %898 = vrot.lane.b32.xlu0 %v2238_v27, %s2411_s21 }
0x1315   :  { %v899_v28 = vpop.permute.xlu0 %898 }
0x1316   :  { %v901_v31 = vmul.f32 %v2236_v19, %v899_v28 }
0x1318   :  { %v910_v32 = vpack.c.bf16 %v901_v31, %v901_v31 }
0x131a   :  { %916 = vrot.lane.b32.xlu1 %v910_v32, %s2418_s3 }
0x138c   :  { %v917_v33 = vpop.permute.xlu1 %916 }
0x138d   :  { %2066 = vmatmul.mubr.msk.bf16.vlgmr.msra.gmra.mrb[16].mxu0 %vm257_vm2, %v917_v33 }
0x138e   :  { %2081 = vmatprep.mubr.msk.bf16.mxu0 %vm2415_vm0, %v2414_v1  ;;  %2078 = vmatpush3.bf16.msra.mxu0 %v2690_v57 }
0x138f   :  { %2079 = vmatprep.subr.bf16.mxu0 %v2414_v1 }
0x1392   :  { %2080 = vmatpush3.bf16.msra.mxu0 %v2694_v58 }
0x1393   :  { %2093 = vmatprep.subr.bf16.mxu0 %v2414_v1 }
0x1395   :  { %2082 = vmatmul.mubr.bf16.vlgmr.msra.gmra.mrb[20].mxu0 %v2417_v29 }
0x1396   :  { %2094 = vmatpush3.bf16.msra.mxu0 %v2690_v57  ;;  %2097 = vmatprep.mubr.msk.bf16.mxu0 %vm2415_vm0, %v2414_v1 }
0x1397   :  { %2095 = vmatprep.subr.bf16.mxu0 %v2414_v1 }
0x139a   :  { %2096 = vmatpush3.bf16.msra.mxu0 %v2694_v58 }
0x139b   :  { %2109 = vmatprep.subr.bf16.mxu0 %v2414_v1 }
0x1460   :  { %v967_v35 = vpop.f32.mrb[16].mxu0 }
0x1461   :  { %v973_v36 = vadd.f32 %v967_v35, %v909_v34  ;;  %v2067_v37 = vpop.f32.mrb[17].mxu0 }
0x1462   :  { %v970_v38 = vpop.f32.mrb[18].mxu0 }
0x1463   :  { %2239 = vtanh.f32 %v973_v36  ;;  %v2068_v39 = vpop.f32.mrb[19].mxu0  ;;  %v1913_v42 = vmul.f32 -1.442695, %v973_v36 }
0x1465   :  { %2241 = vpow2.f32 %v1913_v42 }
0x1468   :  { %v1227_v21 = vpop.f32.mrb[20].mxu0 }
0x1469   :  { %v2083_v22 = vpop.f32.mrb[21].mxu0 }
0x146a   :  { %v1230_v23 = vpop.f32.mrb[22].mxu0 }
0x146d   :  { %v2240_v40 = vpop.eup %2239 }
0x146e   :  { %983 = vrot.lane.b32.xlu0 %v2240_v40, %s2411_s21 }
0x146f   :  { %v2242_v43 = vpop.eup %2241 }
0x1470   :  { %v977_v44 = vadd.f32 1.0, %v2242_v43 }
0x1472   :  { %2243 = vrcp.f32 %v977_v44 }
0x147c   :  { %v2244_v45 = vpop.eup %2243 }
0x147d   :  { %v981_v48 = vmul.f32 %v2244_v45, %v895_v24  ;;  %v2084_v24 = vpop.f32.mrb[23].mxu0 }
0x14e0   :  { %v984_v46 = vpop.permute.xlu0 %983 }
0x14e1   :  { %v986_v47 = vmul.f32 %v2244_v45, %v984_v46 }
0x14e3   :  { %988 = vrot.lane.b32.xlu1 %v986_v47, %s2418_s3 }
0x14e7   :  { %327 = vrot.lane.b32.xlu1 %v2579_v5, %s2418_s3 }
0x14eb   :  { %519 = vrot.lane.b32.xlu1 %v2605_v53, %s2418_s3 }
0x14ef   :  { %711 = vrot.lane.b32.xlu1 %v2631_v41, %s2418_s3  ;;  %v2177_v41 = vld [vmem:[%s2830_s4] sm:$0xff]  }
0x14f0   :  { %2070 = vmatpush3.bf16.msra.mxu1 %v2177_v41 }
0x14f1   :  { %2071 = vmatprep.subr.bf16.mxu1 %v2414_v1 }
0x14f3   :  { %903 = vrot.lane.b32.xlu1 %v901_v31, %s2418_s3 }
0x14f4   :  { %2072 = vmatpush3.bf16.msra.mxu1 %v2178_v55 }
0x14f5   :  { %2085 = vmatprep.subr.bf16.mxu1 %v2414_v1 }
0x1555   :  { %v989_v49 = vpop.permute.xlu1 %988 }
0x1556   :  { %v991_v50 = vadd.f32 %v989_v49, %v981_v48 }
0x1558   :  { %2245 = vtanh.f32 %v991_v50 }
0x1559   :  { %v328_v51 = vpop.permute.xlu1 %327 }
0x155a   :  { %331 = vst.msk [vmem:[#allocation3] sm:$0x3] %vm330_vm3, %v328_v51 }
0x155d   :  { %v520_v52 = vpop.permute.xlu1 %519 }
0x155e   :  { %523 = vst.msk [vmem:[#allocation3 + $0x4] sm:$0x3] %vm330_vm3, %v520_v52 }
0x1561   :  { %v712_v5 = vpop.permute.xlu1 %711  ;;  %v1004_v29 = vld [vmem:[#allocation3] sm:$0x3] }
0x1562   :  { %v2246_v54 = vpop.eup %2245  ;;  %715 = vst.msk [vmem:[#allocation3 + $0x8] sm:$0x3] %vm330_vm3, %v712_v5 }
0x1563   :  { %994 = vrot.lane.b32.xlu0 %v2246_v54, %s2411_s21 }
0x1565   :  { %v904_v53 = vpop.permute.xlu1 %903  ;;  %v1006_v2 = vld [vmem:[#allocation3 + $0x4] sm:$0x3] }
0x1566   :  { %907 = vst.msk [vmem:[#allocation3 + $0xc] sm:$0x3] %vm330_vm3, %v904_v53 }
0x1567   :  { %423 = vrot.lane.b32.xlu0 %v2592_v30, %s2418_s3 }
0x1569   :  { %v1008_v6 = vld [vmem:[#allocation3 + $0x8] sm:$0x3] }
0x156b   :  { %615 = vrot.lane.b32.xlu0 %v2618_v16, %s2418_s3 }
0x156d   :  { %v1010_v10 = vld [vmem:[#allocation3 + $0xc] sm:$0x3] }
0x156f   :  { %807 = vrot.lane.b32.xlu0 %v2644_v3, %s2418_s3 }
0x15d5   :  { %v995_v30 = vpop.permute.xlu0 %994 }
0x15d6   :  { %v997_v56 = vmul.f32 %v2244_v45, %v995_v30 }
0x15d8   :  { %999 = vrot.lane.b32.xlu0 %v997_v56, %s2418_s3 }
0x15d9   :  { %v424_v16 = vpop.permute.xlu0 %423 }
0x15da   :  { %427 = vst.msk [vmem:[#allocation3 + $0x2] sm:$0x3] %vm330_vm3, %v424_v16 }
0x15dd   :  { %v616_v59 = vpop.permute.xlu0 %615 }
0x15de   :  { %619 = vst.msk [vmem:[#allocation3 + $0x6] sm:$0x3] %vm330_vm3, %v616_v59 }
0x15e1   :  { %v808_v60 = vpop.permute.xlu0 %807  ;;  %v1005_v63 = vld [vmem:[#allocation3 + $0x2] sm:$0x3] }
0x15e2   :  { %811 = vst.msk [vmem:[#allocation3 + $0xa] sm:$0x3] %vm330_vm3, %v808_v60  ;;  %v1020_v8 = vcombine.low %v1004_v29, %v1005_v63 }
0x15e4   :  { %v1028_v14 = vrot.slane %v1020_v8, %v2529_v7 }
0x15e5   :  { %v1007_v62 = vld [vmem:[#allocation3 + $0x6] sm:$0x3] }
0x15e6   :  { %v1021_v4 = vcombine.low %v1006_v2, %v1007_v62 }
0x15e8   :  { %v1035_v12 = vrot.slane %v1021_v4, %v2529_v7 }
0x15e9   :  { %v1009_v3 = vld [vmem:[#allocation3 + $0xa] sm:$0x3] }
0x15ea   :  { %v1037_v9 = vcombine.low %v1008_v6, %v1009_v3  ;;  %v1036_v18 = vcombine.low %v1028_v14, %v1035_v12 }
0x15ec   :  { %v1045_v15 = vrot.slane %v1037_v9, %v2529_v7 }
0x164a   :  { %v1000_v61 = vpop.permute.xlu0 %999 }
0x164b   :  { %1003 = vst.msk [vmem:[#allocation3 + $0xe] sm:$0x3] %vm330_vm3, %v1000_v61 }
0x1652   :  { %v1011_v11 = vld [vmem:[#allocation3 + $0xe] sm:$0x3] }
0x1653   :  { %v1038_v13 = vcombine.low %v1010_v10, %v1011_v11 }
0x1655   :  { %v1052_v17 = vrot.slane %v1038_v13, %v2529_v7 }
0x1657   :  { %v1053_v19 = vcombine.low %v1045_v15, %v1052_v17 }
0x1659   :  { %v1056_v20 = vpack.c.bf16 %v1053_v19, %v1036_v18 }
0x165b   :  { %2074 = vmatmul.mubr.msk.bf16.vlgmr.msra.gmra.mrb[16].mxu1 %vm257_vm2, %v1056_v20 }
0x165c   :  { %2086 = vmatpush3.bf16.msra.mxu1 %v2690_v57  ;;  %2089 = vmatprep.mubr.msk.bf16.mxu1 %vm2415_vm0, %v2414_v1 }
0x165d   :  { %2087 = vmatprep.subr.bf16.mxu1 %v2414_v1 }
0x1660   :  { %2088 = vmatpush3.bf16.msra.mxu1 %v2694_v58 }
0x1661   :  { %2101 = vmatprep.subr.bf16.mxu1 %v2414_v1 }
0x172e   :  { %v1117_v26 = vpop.f32.mrb[16].mxu1 }
0x172f   :  { %v1118_v27 = vadd.f32 %v1914_v25, %v1117_v26  ;;  %v2075_v28 = vpop.f32.mrb[17].mxu1 }
0x1730   :  { %v1120_v31 = vpop.f32.mrb[18].mxu1 }
0x1731   :  { %v1126_v32 = vcombine.high %v1118_v27, %v1118_v27  ;;  %v1133_v33 = vrot.slane %v1118_v27, %v2529_v7  ;;  %1918 = vst.sshfl [vmem:[#allocation2] sm:$0x3 pattern:$0x76325410] %v1118_v27  ;;  %v1121_v34 = vadd.f32 %v1914_v25, %v1120_v31  ;;  %v2076_v35 = vpop.f32.mrb[19].mxu1 }
0x1733   :  { %v1140_v36 = vrot.slane %v1126_v32, %v2529_v7  ;;  %v1141_v37 = vcombine.high %v1133_v33, %v1133_v33  ;;  %1919 = vst.sshfl [vmem:[#allocation2 + $0x4] sm:$0x3 pattern:$0x76325410] %v1126_v32  ;;  %v1143_v38 = vcombine.high %v1121_v34, %v1121_v34  ;;  %v1150_v39 = vrot.slane %v1121_v34, %v2529_v7 }
0x1734   :  { %1920 = vst.sshfl [vmem:[#allocation2 + $0x8] sm:$0x3 pattern:$0x76325410] %v1121_v34 }
0x1735   :  { %v1142_v40 = vcombine.high %v1140_v36, %v1140_v36  ;;  %1169 = vst [vmem:[#allocation2 + $0x2] sm:$0x3] %v1141_v37  ;;  %v1157_v42 = vrot.slane %v1143_v38, %v2529_v7  ;;  %v1158_v43 = vcombine.high %v1150_v39, %v1150_v39  ;;  %1921 = vst.sshfl [vmem:[#allocation2 + $0xc] sm:$0x3 pattern:$0x76325410] %v1143_v38 }
0x1737   :  { %1171 = vst [vmem:[#allocation2 + $0x6] sm:$0x3] %v1142_v40  ;;  %v1159_v44 = vcombine.high %v1157_v42, %v1157_v42  ;;  %1173 = vst [vmem:[#allocation2 + $0xa] sm:$0x3] %v1158_v43 }
0x1738   :  { %v1176_v45 = vld [vmem:[#allocation2] sm:$0x3] }
0x1739   :  { %1175 = vst [vmem:[#allocation2 + $0xe] sm:$0x3] %v1159_v44  ;;  %v1233_v46 = vadd.f32 %v1227_v21, %v1176_v45 }
0x173a   :  { %v1331_v20 = vld [vmem:[#allocation2 + $0x4] sm:$0x3] }
0x173b   :  { %2247 = vtanh.f32 %v1233_v46  ;;  %v1924_v48 = vmul.f32 -1.442695, %v1233_v46 }
0x173c   :  { %v1258_v59 = vld [vmem:[#allocation2 + $0x2] sm:$0x3] }
0x173d   :  { %2249 = vpow2.f32 %v1924_v48 }
0x173e   :  { %v1404_v44 = vld [vmem:[#allocation2 + $0x6] sm:$0x3] }
0x1745   :  { %v2248_v47 = vpop.eup %2247 }
0x1746   :  { %1243 = vrot.lane.b32.xlu1 %v2248_v47, %s2411_s21 }
0x1747   :  { %v2250_v49 = vpop.eup %2249 }
0x1748   :  { %v1237_v50 = vadd.f32 1.0, %v2250_v49 }
0x174a   :  { %2251 = vrcp.f32 %v1237_v50 }
0x1754   :  { %v2252_v51 = vpop.eup %2251 }
0x1755   :  { %v1241_v5 = vmul.f32 0.0, %v2252_v51 }
0x17b8   :  { %v1244_v52 = vpop.permute.xlu1 %1243 }
0x17b9   :  { %v1246_v7 = vmul.f32 %v2252_v51, %v1244_v52 }
0x17bb   :  { %1248 = vrot.lane.b32.xlu0 %v1246_v7, %s2418_s3 }
0x182d   :  { %v1249_v54 = vpop.permute.xlu0 %1248 }
0x182e   :  { %v1251_v53 = vadd.f32 %v1249_v54, %v1241_v5 }
0x1830   :  { %2253 = vtanh.f32 %v1251_v53 }
0x183a   :  { %v2254_v41 = vpop.eup %2253 }
0x183b   :  { %1254 = vrot.lane.b32.xlu1 %v2254_v41, %s2411_s21 }
0x18ad   :  { %v1255_v55 = vpop.permute.xlu1 %1254 }
0x18ae   :  { %v1257_v30 = vmul.f32 %v2252_v51, %v1255_v55 }
0x18b0   :  { %v1259_v56 = vpack.c.bf16 %v1257_v30, %v1257_v30 }
0x18b2   :  { %1261 = vrot.lane.b32.xlu0 %v1259_v56, %s2418_s3 }
0x1924   :  { %v1262_v16 = vpop.permute.xlu0 %1261 }
0x1925   :  { %2090 = vmatmul.mubr.msk.bf16.vlgmr.msra.gmra.mrb[20].mxu1 %vm257_vm2, %v1262_v16 }
0x1926   :  { %2102 = vmatpush3.bf16.msra.mxu1 %v2690_v57  ;;  %2105 = vmatprep.mubr.msk.bf16.mxu1 %vm2415_vm0, %v2414_v1 }
0x1927   :  { %2103 = vmatprep.subr.bf16.mxu1 %v2414_v1 }
0x192a   :  { %2104 = vmatpush3.bf16.msra.mxu1 %v2694_v58 }
0x192b   :  { %2117 = vmatprep.subr.bf16.mxu1 %v2414_v1 }
0x19f8   :  { %v1300_v60 = vpop.f32.mrb[20].mxu1 }
0x19f9   :  { %v1306_v61 = vadd.f32 %v1300_v60, %v1258_v59  ;;  %v2091_v62 = vpop.f32.mrb[21].mxu1 }
0x19fa   :  { %v1303_v63 = vpop.f32.mrb[22].mxu1  ;;  %v1477_v62 = vld [vmem:[#allocation2 + $0x8] sm:$0x3] }
0x19fb   :  { %2255 = vtanh.f32 %v1306_v61  ;;  %v2092_v2 = vpop.f32.mrb[23].mxu1  ;;  %v1926_v4 = vmul.f32 -1.442695, %v1306_v61 }
0x19fd   :  { %2257 = vpow2.f32 %v1926_v4 }
0x1a05   :  { %v2256_v3 = vpop.eup %2255 }
0x1a06   :  { %1316 = vrot.lane.b32.xlu1 %v2256_v3, %s2411_s21 }
0x1a07   :  { %v2258_v29 = vpop.eup %2257 }
0x1a08   :  { %v1310_v6 = vadd.f32 1.0, %v2258_v29 }
0x1a0a   :  { %2259 = vrcp.f32 %v1310_v6 }
0x1a14   :  { %v2260_v8 = vpop.eup %2259 }
0x1a15   :  { %v1314_v11 = vmul.f32 %v2260_v8, %v1251_v53 }
0x1a78   :  { %v1317_v9 = vpop.permute.xlu1 %1316 }
0x1a79   :  { %v1319_v10 = vmul.f32 %v2260_v8, %v1317_v9 }
0x1a7b   :  { %1321 = vrot.lane.b32.xlu0 %v1319_v10, %s2418_s3 }
0x1aed   :  { %v1322_v12 = vpop.permute.xlu0 %1321 }
0x1aee   :  { %v1324_v13 = vadd.f32 %v1322_v12, %v1314_v11 }
0x1af0   :  { %2261 = vtanh.f32 %v1324_v13 }
0x1afa   :  { %v2262_v14 = vpop.eup %2261 }
0x1afb   :  { %1327 = vrot.lane.b32.xlu1 %v2262_v14, %s2411_s21 }
0x1b6d   :  { %v1328_v15 = vpop.permute.xlu1 %1327 }
0x1b6e   :  { %v1330_v17 = vmul.f32 %v2260_v8, %v1328_v15 }
0x1b70   :  { %v1332_v18 = vpack.c.bf16 %v1330_v17, %v1330_v17 }
0x1b72   :  { %1334 = vrot.lane.b32.xlu0 %v1332_v18, %s2418_s3 }
0x1be4   :  { %v1335_v19 = vpop.permute.xlu0 %1334 }
0x1be5   :  { %2098 = vmatmul.mubr.msk.bf16.vlgmr.msra.gmra.mrb[24].mxu0 %vm257_vm2, %v1335_v19 }
0x1be6   :  { %2110 = vmatpush3.bf16.msra.mxu0 %v2690_v57  ;;  %2113 = vmatprep.mubr.msk.bf16.mxu0 %vm2415_vm0, %v2414_v1 }
0x1be7   :  { %2111 = vmatprep.subr.bf16.mxu0 %v2414_v1 }
0x1bea   :  { %2112 = vmatpush3.bf16.msra.mxu0 %v2694_v58 }
0x1beb   :  { %2125 = vmatprep.subr.bf16.mxu0 %v2414_v1 }
0x1cb8   :  { %v1373_v21 = vpop.f32.mrb[24].mxu0 }
0x1cb9   :  { %v1379_v22 = vadd.f32 %v1373_v21, %v1331_v20  ;;  %v2099_v23 = vpop.f32.mrb[25].mxu0 }
0x1cba   :  { %v1376_v24 = vpop.f32.mrb[26].mxu0  ;;  %v1550_v23 = vld [vmem:[#allocation2 + $0xa] sm:$0x3] }
0x1cbb   :  { %2263 = vtanh.f32 %v1379_v22  ;;  %v2100_v25 = vpop.f32.mrb[27].mxu0  ;;  %v1928_v27 = vmul.f32 -1.442695, %v1379_v22 }
0x1cbd   :  { %2265 = vpow2.f32 %v1928_v27 }
0x1cc5   :  { %v2264_v26 = vpop.eup %2263 }
0x1cc6   :  { %1389 = vrot.lane.b32.xlu1 %v2264_v26, %s2411_s21 }
0x1cc7   :  { %v2266_v28 = vpop.eup %2265 }
0x1cc8   :  { %v1383_v31 = vadd.f32 1.0, %v2266_v28 }
0x1cca   :  { %2267 = vrcp.f32 %v1383_v31 }
0x1cd4   :  { %v2268_v32 = vpop.eup %2267 }
0x1cd5   :  { %v1387_v35 = vmul.f32 %v2268_v32, %v1324_v13 }
0x1d38   :  { %v1390_v33 = vpop.permute.xlu1 %1389 }
0x1d39   :  { %v1392_v34 = vmul.f32 %v2268_v32, %v1390_v33 }
0x1d3b   :  { %1394 = vrot.lane.b32.xlu0 %v1392_v34, %s2418_s3 }
0x1dad   :  { %v1395_v36 = vpop.permute.xlu0 %1394 }
0x1dae   :  { %v1397_v37 = vadd.f32 %v1395_v36, %v1387_v35 }
0x1db0   :  { %2269 = vtanh.f32 %v1397_v37 }
0x1dba   :  { %v2270_v38 = vpop.eup %2269 }
0x1dbb   :  { %1400 = vrot.lane.b32.xlu1 %v2270_v38, %s2411_s21 }
0x1e2d   :  { %v1401_v39 = vpop.permute.xlu1 %1400 }
0x1e2e   :  { %v1403_v40 = vmul.f32 %v2268_v32, %v1401_v39 }
0x1e30   :  { %v1405_v42 = vpack.c.bf16 %v1403_v40, %v1403_v40 }
0x1e32   :  { %1407 = vrot.lane.b32.xlu0 %v1405_v42, %s2418_s3 }
0x1ea4   :  { %v1408_v43 = vpop.permute.xlu0 %1407 }
0x1ea5   :  { %2106 = vmatmul.mubr.msk.bf16.vlgmr.msra.gmra.mrb[24].mxu1 %vm257_vm2, %v1408_v43 }
0x1ea6   :  { %2118 = vmatpush3.bf16.msra.mxu1 %v2690_v57  ;;  %2121 = vmatprep.mubr.msk.bf16.mxu1 %vm2415_vm0, %v2414_v1 }
0x1ea7   :  { %2119 = vmatprep.subr.bf16.mxu1 %v2414_v1 }
0x1eaa   :  { %2120 = vmatpush3.bf16.msra.mxu1 %v2694_v58 }
0x1eab   :  { %2133 = vmatprep.subr.bf16.mxu1 %v2414_v1 }
0x1f78   :  { %v1446_v45 = vpop.f32.mrb[24].mxu1 }
0x1f79   :  { %v1452_v46 = vadd.f32 %v1446_v45, %v1404_v44  ;;  %v2107_v47 = vpop.f32.mrb[25].mxu1  ;;  %v1623_v45 = vld [vmem:[#allocation2 + $0xc] sm:$0x3] }
0x1f7a   :  { %v1449_v48 = vpop.f32.mrb[26].mxu1 }
0x1f7b   :  { %2271 = vtanh.f32 %v1452_v46  ;;  %v2108_v49 = vpop.f32.mrb[27].mxu1  ;;  %v1930_v51 = vmul.f32 -1.442695, %v1452_v46 }
0x1f7d   :  { %2273 = vpow2.f32 %v1930_v51 }
0x1f85   :  { %v2272_v50 = vpop.eup %2271 }
0x1f86   :  { %1462 = vrot.lane.b32.xlu1 %v2272_v50, %s2411_s21 }
0x1f87   :  { %v2274_v52 = vpop.eup %2273 }
0x1f88   :  { %v1456_v7 = vadd.f32 1.0, %v2274_v52 }
0x1f8a   :  { %2275 = vrcp.f32 %v1456_v7 }
0x1f94   :  { %v2276_v5 = vpop.eup %2275 }
0x1f95   :  { %v1460_v41 = vmul.f32 %v2276_v5, %v1397_v37 }
0x1ff8   :  { %v1463_v54 = vpop.permute.xlu1 %1462 }
0x1ff9   :  { %v1465_v53 = vmul.f32 %v2276_v5, %v1463_v54 }
0x1ffb   :  { %1467 = vrot.lane.b32.xlu0 %v1465_v53, %s2418_s3 }
0x206d   :  { %v1468_v55 = vpop.permute.xlu0 %1467 }
0x206e   :  { %v1470_v30 = vadd.f32 %v1468_v55, %v1460_v41 }
0x2070   :  { %2277 = vtanh.f32 %v1470_v30 }
0x207a   :  { %v2278_v56 = vpop.eup %2277 }
0x207b   :  { %1473 = vrot.lane.b32.xlu1 %v2278_v56, %s2411_s21 }
0x20ed   :  { %v1474_v16 = vpop.permute.xlu1 %1473 }
0x20ee   :  { %v1476_v59 = vmul.f32 %v2276_v5, %v1474_v16 }
0x20f0   :  { %v1478_v60 = vpack.c.bf16 %v1476_v59, %v1476_v59 }
0x20f2   :  { %1480 = vrot.lane.b32.xlu0 %v1478_v60, %s2418_s3 }
0x2164   :  { %v1481_v61 = vpop.permute.xlu0 %1480 }
0x2165   :  { %2114 = vmatmul.mubr.msk.bf16.vlgmr.msra.gmra.mrb[28].mxu0 %vm257_vm2, %v1481_v61 }
0x2166   :  { %2126 = vmatpush3.bf16.msra.mxu0 %v2690_v57  ;;  %2129 = vmatprep.mubr.msk.bf16.mxu0 %vm2415_vm0, %v2414_v1 }
0x2167   :  { %2127 = vmatprep.subr.bf16.mxu0 %v2414_v1 }
0x216a   :  { %2128 = vmatpush3.bf16.msra.mxu0 %v2694_v58 }
0x216b   :  { %2141 = vmatprep.subr.bf16.mxu0 %v2414_v1 }
0x2238   :  { %v1519_v63 = vpop.f32.mrb[28].mxu0 }
0x2239   :  { %v1525_v2 = vadd.f32 %v1519_v63, %v1477_v62  ;;  %v2115_v3 = vpop.f32.mrb[29].mxu0  ;;  %v1696_v63 = vld [vmem:[#allocation2 + $0xe] sm:$0x3] }
0x223a   :  { %v1522_v4 = vpop.f32.mrb[30].mxu0 }
0x223b   :  { %2279 = vtanh.f32 %v1525_v2  ;;  %v2116_v29 = vpop.f32.mrb[31].mxu0  ;;  %v1932_v8 = vmul.f32 -1.442695, %v1525_v2 }
0x223d   :  { %2281 = vpow2.f32 %v1932_v8 }
0x2245   :  { %v2280_v6 = vpop.eup %2279 }
0x2246   :  { %1535 = vrot.lane.b32.xlu1 %v2280_v6, %s2411_s21 }
0x2247   :  { %v2282_v9 = vpop.eup %2281 }
0x2248   :  { %v1529_v10 = vadd.f32 1.0, %v2282_v9 }
0x224a   :  { %2283 = vrcp.f32 %v1529_v10 }
0x2254   :  { %v2284_v11 = vpop.eup %2283 }
0x2255   :  { %v1533_v14 = vmul.f32 %v2284_v11, %v1470_v30 }
0x22b8   :  { %v1536_v12 = vpop.permute.xlu1 %1535 }
0x22b9   :  { %v1538_v13 = vmul.f32 %v2284_v11, %v1536_v12 }
0x22bb   :  { %1540 = vrot.lane.b32.xlu0 %v1538_v13, %s2418_s3 }
0x232d   :  { %v1541_v15 = vpop.permute.xlu0 %1540 }
0x232e   :  { %v1543_v17 = vadd.f32 %v1541_v15, %v1533_v14 }
0x2330   :  { %2285 = vtanh.f32 %v1543_v17 }
0x233a   :  { %v2286_v18 = vpop.eup %2285 }
0x233b   :  { %1546 = vrot.lane.b32.xlu1 %v2286_v18, %s2411_s21 }
0x23ad   :  { %v1547_v19 = vpop.permute.xlu1 %1546 }
0x23ae   :  { %v1549_v20 = vmul.f32 %v2284_v11, %v1547_v19  ;;  %v2181_v19 = vld [vmem:[%s2833_s7] sm:$0xff]  }
0x23b0   :  { %v1551_v21 = vpack.c.bf16 %v1549_v20, %v1549_v20  ;;  %v2182_v20 = vld [vmem:[%s2833_s7 + $0x8] sm:$0xff]   ;;  %s2419_s7 = smov [#allocation10]  }
0x23b2   :  { %1553 = vrot.lane.b32.xlu0 %v1551_v21, %s2418_s3 }
0x2424   :  { %v1554_v22 = vpop.permute.xlu0 %1553 }
0x2425   :  { %2122 = vmatmul.mubr.msk.bf16.vlgmr.msra.gmra.mrb[28].mxu1 %vm257_vm2, %v1554_v22 }
0x2426   :  { %2134 = vmatpush3.bf16.msra.mxu1 %v2690_v57  ;;  %2137 = vmatprep.mubr.msk.bf16.mxu1 %vm2415_vm0, %v2414_v1 }
0x2427   :  { %2135 = vmatprep.subr.bf16.mxu1 %v2414_v1 }
0x242a   :  { %2136 = vmatpush3.bf16.msra.mxu1 %v2694_v58 }
0x24f8   :  { %v1592_v24 = vpop.f32.mrb[28].mxu1 }
0x24f9   :  { %v1598_v25 = vadd.f32 %v1592_v24, %v1550_v23  ;;  %v2123_v26 = vpop.f32.mrb[29].mxu1 }
0x24fa   :  { %v1595_v27 = vpop.f32.mrb[30].mxu1  ;;  %v1840_v26 = vand.u32 127, %v96_v0 }
0x24fb   :  { %2287 = vtanh.f32 %v1598_v25  ;;  %v2124_v28 = vpop.f32.mrb[31].mxu1  ;;  %v1934_v32 = vmul.f32 -1.442695, %v1598_v25  ;;  %v1939_v27 = vld [vmem:[%s2834_s8] ss:$0 sm:$0xff]  ;;  %s1866_s8 = sshll.u32 %s2419_s7, 4  ;;  %s1867_s8 = int_to_ptr.vmem [resolvable:$true] %s1866_s8 }
0x24fc   :  { %vm1841_vm4 = vcmp.lt.s32.totalorder %v1840_v26, 4  ;;  %p2386_p11 = scmp.lt.s32.totalorder %s1867_s8, %s1867_s8 }
0x24fd   :  { %2289 = vpow2.f32 %v1934_v32 }
0x2505   :  { %v2288_v31 = vpop.eup %2287 }
0x2506   :  { %1608 = vrot.lane.b32.xlu1 %v2288_v31, %s2411_s21 }
0x2507   :  { %v2290_v57 = vpop.eup %2289 }
0x2508   :  { %v1602_v33 = vadd.f32 1.0, %v2290_v57 }
0x250a   :  { %2291 = vrcp.f32 %v1602_v33 }
0x2514   :  { %v2292_v34 = vpop.eup %2291 }
0x2515   :  { %v1606_v58 = vmul.f32 %v2292_v34, %v1543_v17 }
0x2578   :  { %v1609_v35 = vpop.permute.xlu1 %1608 }
0x2579   :  { %v1611_v36 = vmul.f32 %v2292_v34, %v1609_v35 }
0x257b   :  { %1613 = vrot.lane.b32.xlu0 %v1611_v36, %s2418_s3 }
0x25ed   :  { %v1614_v37 = vpop.permute.xlu0 %1613 }
0x25ee   :  { %v1616_v38 = vadd.f32 %v1614_v37, %v1606_v58 }
0x25f0   :  { %2293 = vtanh.f32 %v1616_v38 }
0x25fa   :  { %v2294_v39 = vpop.eup %2293 }
0x25fb   :  { %1619 = vrot.lane.b32.xlu1 %v2294_v39, %s2411_s21 }
0x266d   :  { %v1620_v40 = vpop.permute.xlu1 %1619 }
0x266e   :  { %v1622_v42 = vmul.f32 %v2292_v34, %v1620_v40 }
0x2670   :  { %v1624_v43 = vpack.c.bf16 %v1622_v42, %v1622_v42 }
0x2672   :  { %1626 = vrot.lane.b32.xlu0 %v1624_v43, %s2418_s3 }
0x26e4   :  { %v1627_v44 = vpop.permute.xlu0 %1626 }
0x26e5   :  { %2130 = vmatmul.mubr.msk.bf16.vlgmr.msra.gmra.mrb[32].mxu0 %vm257_vm2, %v1627_v44 }
0x26e6   :  { %2145 = vmatprep.mubr.msk.bf16.mxu0 %vm2415_vm0, %v2414_v1  ;;  %2142 = vmatpush3.bf16.msra.mxu0 %v2181_v19 }
0x26e7   :  { %2143 = vmatprep.subr.bf16.mxu0 %v2414_v1 }
0x26ea   :  { %2144 = vmatpush3.bf16.msra.mxu0 %v2182_v20 }
0x27b8   :  { %v1665_v46 = vpop.f32.mrb[32].mxu0 }
0x27b9   :  { %v1671_v47 = vadd.f32 %v1665_v46, %v1623_v45  ;;  %v2131_v48 = vpop.f32.mrb[33].mxu0 }
0x27ba   :  { %v1668_v49 = vpop.f32.mrb[34].mxu0 }
0x27bb   :  { %2295 = vtanh.f32 %v1671_v47  ;;  %v2132_v50 = vpop.f32.mrb[35].mxu0  ;;  %v1936_v52 = vmul.f32 -1.442695, %v1671_v47 }
0x27bd   :  { %2297 = vpow2.f32 %v1936_v52 }
0x27c5   :  { %v2296_v51 = vpop.eup %2295 }
0x27c6   :  { %1681 = vrot.lane.b32.xlu1 %v2296_v51, %s2411_s21 }
0x27c7   :  { %v2298_v7 = vpop.eup %2297 }
0x27c8   :  { %v1675_v5 = vadd.f32 1.0, %v2298_v7 }
0x27ca   :  { %2299 = vrcp.f32 %v1675_v5 }
0x27d4   :  { %v2300_v54 = vpop.eup %2299 }
0x27d5   :  { %v1679_v55 = vmul.f32 %v2300_v54, %v1616_v38 }
0x2838   :  { %v1682_v53 = vpop.permute.xlu1 %1681 }
0x2839   :  { %v1684_v41 = vmul.f32 %v2300_v54, %v1682_v53 }
0x283b   :  { %1686 = vrot.lane.b32.xlu0 %v1684_v41, %s2418_s3 }
0x28ad   :  { %v1687_v30 = vpop.permute.xlu0 %1686 }
0x28ae   :  { %v1689_v56 = vadd.f32 %v1687_v30, %v1679_v55 }
0x28b0   :  { %2301 = vtanh.f32 %v1689_v56 }
0x28ba   :  { %v2302_v16 = vpop.eup %2301 }
0x28bb   :  { %1692 = vrot.lane.b32.xlu1 %v2302_v16, %s2411_s21 }
0x292d   :  { %v1693_v59 = vpop.permute.xlu1 %1692 }
0x292e   :  { %v1695_v60 = vmul.f32 %v2300_v54, %v1693_v59 }
0x2930   :  { %v1697_v61 = vpack.c.bf16 %v1695_v60, %v1695_v60 }
0x2932   :  { %1699 = vrot.lane.b32.xlu0 %v1697_v61, %s2418_s3 }
0x29a4   :  { %v1700_v62 = vpop.permute.xlu0 %1699 }
0x29a5   :  { %2138 = vmatmul.mubr.msk.bf16.vlgmr.msra.gmra.mrb[32].mxu1 %vm257_vm2, %v1700_v62 }
0x2a78   :  { %v1738_v2 = vpop.f32.mrb[32].mxu1 }
0x2a79   :  { %v1744_v3 = vadd.f32 %v1738_v2, %v1696_v63  ;;  %v2139_v4 = vpop.f32.mrb[33].mxu1 }
0x2a7a   :  { %v1741_v29 = vpop.f32.mrb[34].mxu1 }
0x2a7b   :  { %2303 = vtanh.f32 %v1744_v3  ;;  %v2140_v6 = vpop.f32.mrb[35].mxu1  ;;  %v1938_v9 = vmul.f32 -1.442695, %v1744_v3 }
0x2a7d   :  { %2305 = vpow2.f32 %v1938_v9 }
0x2a85   :  { %v2304_v8 = vpop.eup %2303 }
0x2a86   :  { %1754 = vrot.lane.b32.xlu1 %v2304_v8, %s2411_s21 }
0x2a87   :  { %v2306_v10 = vpop.eup %2305 }
0x2a88   :  { %v1748_v11 = vadd.f32 1.0, %v2306_v10 }
0x2a8a   :  { %2307 = vrcp.f32 %v1748_v11 }
0x2a94   :  { %v2308_v12 = vpop.eup %2307 }
0x2a95   :  { %v1752_v15 = vmul.f32 %v2308_v12, %v1689_v56 }
0x2af8   :  { %v1755_v13 = vpop.permute.xlu1 %1754 }
0x2af9   :  { %v1757_v14 = vmul.f32 %v2308_v12, %v1755_v13 }
0x2afb   :  { %1759 = vrot.lane.b32.xlu0 %v1757_v14, %s2418_s3 }
0x2b6d   :  { %v1760_v17 = vpop.permute.xlu0 %1759 }
0x2b6e   :  { %v1762_v18 = vadd.f32 %v1760_v17, %v1752_v15 }
0x2b70   :  { %2309 = vtanh.f32 %v1762_v18 }
0x2b7a   :  { %v2310_v21 = vpop.eup %2309 }
0x2b7b   :  { %1765 = vrot.lane.b32.xlu1 %v2310_v21, %s2411_s21  ;;  %s2381_s21 = scalar_lea.vmem %s1867_s8, 32 }
0x2b7c   :  { %p2382_p10 = scmp.ne.s32.totalorder %s1867_s8, %s2381_s21  ;;  %p2387_p12 = scmp.lt.s32.totalorder %s2381_s21, %s2381_s21 }
0x2b7e   :  { %p2388_p13 = por %p2387_p12, %p2386_p11 }
0x2b80   :  { %p2389_p0 = pnand %p2388_p13, %p2382_p10 }
0x2bed   :  { %v1766_v22 = vpop.permute.xlu1 %1765 }
0x2bee   :  { %v1768_v23 = vmul.f32 %v2308_v12, %v1766_v22 }
0x2bf0   :  { %v1769_v24 = vpack.c.bf16 %v1768_v23, %v1768_v23 }
0x2bf2   :  { %1782 = vrot.lane.b32.xlu0 %v1769_v24, %s2418_s3 }
0x2c64   :  { %v1783_v25 = vpop.permute.xlu0 %1782 }
0x2c65   :  { %2146 = vmatmul.mubr.msk.bf16.vlgmr.msra.gmra.mrb[36].mxu0 %vm257_vm2, %v1783_v25 }
0x2d38   :  { %v1833_v28 = vpop.f32.mrb[36].mxu0 }
0x2d39   :  { %v1834_v1 = vadd.f32 %v1939_v27, %v1833_v28  ;;  %v2147_v31 = vpop.f32.mrb[37].mxu0 }
0x2d3a   :  { %v1836_v32 = vpop.f32.mrb[38].mxu0 }
0x2d3b   :  { %v2148_v57 = vpop.f32.mrb[39].mxu0  ;;  %v1842_v33 = vsel %vm1841_vm4, %v1834_v1, -1e+30 }
0x2d3c   :  { %v1844_v34 = vsel %vm1843_vm5, %v1842_v33, -inf }
0x2d3d   :  { %1845 = vmax.xlane.f32.xlu1 %v1844_v34 }
0x2dca   :  { %v1846_v35 = vpop.xlane.xlu1 %1845 }
0x2dcb   :  { %v1847_v36 = vsub.f32 %v1842_v33, %v1846_v35 }
0x2dcd   :  { %v1848_v58 = vmul.f32 1.442695, %v1847_v36 }
0x2dcf   :  { %2311 = vpow2.f32 %v1848_v58 }
0x2dd9   :  { %v2312_v0 = vpop.eup %2311 }
0x2dda   :  { %v1850_v37 = vsel %vm1843_vm5, %v2312_v0, 0.0 }
0x2ddb   :  { %1851 = vadd.xlane.f32.xlu0 %v1850_v37 }
0x2e68   :  { %v1852_v38 = vpop.xlane.xlu0 %1851 }
0x2e69   :  { %2313 = vrcp.f32 %v1852_v38 }
0x2e73   :  { %v2314_v39 = vpop.eup %2313 }
0x2e74   :  { %v1854_v40 = vmul.f32 %v2314_v39, %v1852_v38 }
0x2e76   :  { %v1855_v42 = vsub.f32 2.0, %v1854_v40 }
0x2e78   :  { %v1856_v43 = vmul.f32 %v2314_v39, %v1855_v42 }
0x2e7a   :  { %v1857_v44 = vmul.f32 %v2312_v0, %v1856_v43 }
0x2e7c   :  { %v1858_v45 = vsel %vm1841_vm4, %v1857_v44, %v1834_v1 }
0x2e7d   :  { %1859 = vst.msk [vmem:[#allocation10] sm:$0x3] %vm1843_vm5, %v1858_v45 }
0x2e7e   :  { %2392 = shalt.err (!%p2389_p0)
}
0x2e7f   :  { %s2393_s30 = scalar_lea.hbm %s2835_s9, 32 }
0x2e80   :  { %p2394_p1 = scmp.ne.s32.totalorder %s2835_s9, %s2393_s30  ;;  %p2397_p2 = scmp.lt.u32.totalorder %s2393_s30, %s2835_s9 }
0x2e82   :  { %p2399_p3 = pnand %p2397_p2, %p2394_p1 }
0x2e84   :  { %2402 = shalt.err (!%p2399_p3)
}
0x2e85   :  { %1869 = dma.vmem_to_hbm [thread:$0]  %s1867_s8, 32, %s2835_s9, [#allocation6]  }
0x2e86   :  { %2407 = dma.done.wait [#allocation6], 32  }
0x2e87   :  { %2408 = vsyncadd [#allocation6], 4294967264 }
0x2e88   :  { %1873 = vsyncpa [#allocation5], 1 }
0x2e89   :  { %1874 = vsyncpa [#allocation8], 1 }
0x2e8a   :  { %1875 = vsyncpa [#allocation6], 1 }

</bundles_post_ra>
